<compile_context>
chip_gen: v7x
topology: tpu7x:2x2x1
jax: 0.10.0
libtpu: 0.0.40
codegen_flags: <defaults>
</compile_context>

<pallas_src>
import functools

import jax
import jax.numpy as jnp
from jax import lax
from jax.experimental import pallas as pl
from jax.experimental.pallas import tpu as pltpu

F32 = jnp.float32
BF16 = jnp.bfloat16
NEG_BIG = -1e30


def _round_up(v, m):
    return ((v + m - 1) // m) * m


def _dot(a, b):
    # bf16 operands, f32 accumulation -> native MXU rate on v5e/v6e/v7x.
    return jnp.dot(a.astype(BF16), b.astype(BF16), preferred_element_type=jnp.float32)


def _vmem_limit_bytes():
    # Per-generation limit: ~80% of physical VMEM (128 MiB v5e/v6e, 64 MiB v7x),
    # conservative fallback if the query is unavailable.
    try:
        cap = int(pltpu.get_tpu_info().vmem_capacity_bytes)
        if cap > 0:
            return int(min(cap - 8 * 1024 * 1024, (cap * 4) // 5))
    except Exception:
        pass
    return 32 * 1024 * 1024


# --------------------------------------------------------------------------
# Fused Pallas kernel: whole GraphConvGRU forward in one call
# --------------------------------------------------------------------------
def _fused_kernel(n_layers, d_real, *refs):
    (x_ref, ea_ref, ssrc_ref, sdst_ref, vmask_ref, invc_ref, hasin_ref, h0_ref,
     l1w_ref, l1b_ref, l2w_ref, l2b_ref,
     lng_ref, lnb_ref, we1c_ref, be1c_ref, we2_ref, be2_ref,
     w1_ref, b1_ref, w1c_ref, b1c_ref, w2a_ref, b2a_ref, w2b_ref, b2b_ref,
     wkqv_ref, bkqv_ref, wskip_ref, abias_ref,
     wgc_ref, wghzr_ref, wghh_ref, bg_ref,
     o_ref) = refs

    n_nodes = x_ref.shape[0]
    e_slots = ssrc_ref.shape[0]          # N * K  (dst-grouped, per-node padded slots)
    k_slots = e_slots // n_nodes         # padded max in-degree (multiple of 8)
    dp = l1w_ref.shape[-1]               # hidden padded to 128 lanes
    lp = l2w_ref.shape[-1]               # latent padded to 128 lanes

    x = x_ref[...]                       # (N, input_dim) bf16
    ea = ea_ref[...]                     # (E_slots, edge_dim) bf16 (padded slots = 0)
    ssrc = ssrc_ref[...]                 # (E_slots, N) bf16 one-hot(src), 0-row if pad
    sdst = sdst_ref[...]                 # (E_slots, N) bf16 one-hot(dst), 0-row if pad

    # ---- preamble: hoisted masks / broadcasts (layer-invariant) ----
    inv_d = 1.0 / float(d_real)
    col = lax.broadcasted_iota(jnp.int32, (1, dp), 1)
    dmask = (col < d_real).astype(F32)                                  # (1, DP)
    vmask_b = jnp.broadcast_to(vmask_ref[...], (e_slots, dp)) > 0.5     # valid slots
    inv_cnt_b = jnp.broadcast_to(invc_ref[...], (n_nodes, dp))          # exact 1/deg
    has_in_b = jnp.broadcast_to(hasin_ref[...], (n_nodes, dp))          # deg>0 ? 1 : 0

    # ---- edge MLP hoisted out of the layer chain (edge_attr is layer-invariant):
    #      one wide stage-1 matmul, per-layer stage-2, all 128-lane-aligned slices.
    e1 = jnp.maximum(_dot(ea, we1c_ref[...]) + be1c_ref[...], 0.0)      # (E, n_layers*DP)
    e_msgs = [_dot(e1[:, l * dp:(l + 1) * dp], we2_ref[l]) + be2_ref[l]
              for l in range(n_layers)]

    def deep_gcn(z, l):
        """DeepGCNLayer(block='res+'): z + CustomConv(relu(LayerNorm(z)))."""
        # LayerNorm over the d_real real columns (padded lanes are exactly 0).
        mu = jnp.sum(z, axis=-1, keepdims=True) * inv_d
        zc = (z - mu) * dmask
        var = jnp.sum(zc * zc, axis=-1, keepdims=True) * inv_d
        h = zc * lax.rsqrt(var + 1e-5) * lng_ref[l] + lnb_ref[l]
        h = jnp.maximum(h, 0.0)          # dropout identity (eval mode / p=0)
        # gathers: one-hot @ features on the MXU (padded slots gather zeros)
        a_j = _dot(ssrc, h)              # (E_slots, DP)
        b_i = _dot(sdst, h)              # (E_slots, DP)
        # node_mlp1(cat([a_j, b_i])): single (2DP, DP) contraction
        n1 = jnp.maximum(
            _dot(jnp.concatenate([a_j, b_i], axis=-1), w1_ref[l]) + b1_ref[l], 0.0)
        n1 = _dot(n1, w1c_ref[l]) + b1c_ref[l]
        msg = e_msgs[l] * n1             # (E_slots, DP)
        # scatter-max: dst-grouped slots -> free reshape + one axis-1 max
        masked = jnp.where(vmask_b, msg, NEG_BIG)
        aggr = jnp.max(masked.reshape(n_nodes, k_slots, dp), axis=1) * has_in_b
        # node_mlp2(h)
        n2 = jnp.maximum(_dot(h, w2a_ref[l]) + b2a_ref[l], 0.0)
        n2 = _dot(n2, w2b_ref[l]) + b2b_ref[l]
        return z + aggr + n2             # 'res+' residual

    def resgated(z, l):
        """ResGatedGraphConv(mean): mean_e[sigmoid(k_i+q_j)*v_j] + lin_skip(z) + bias."""
        kqv = _dot(z, wkqv_ref[l]) + bkqv_ref[l]       # fused k|q|v   (N, 3DP)
        k_i = _dot(sdst, kqv[:, :dp])                  # (E_slots, DP)
        qv_j = _dot(ssrc, kqv[:, dp:])                 # fused q|v gather (E_slots, 2DP)
        msg = jax.nn.sigmoid(k_i + qv_j[:, :dp]) * qv_j[:, dp:]   # padded slots -> 0
        mean = jnp.sum(msg.reshape(n_nodes, k_slots, dp), axis=1) * inv_cnt_b
        return mean + _dot(z, wskip_ref[l]) + abias_ref[l]

    # CustomGraphConv
    z = _dot(x, l1w_ref[...]) + l1b_ref[...]
    z = deep_gcn(z, 0)
    for n in range(n_layers - 1):
        z = resgated(z, n)
        z = deep_gcn(z, n + 1)
    c = _dot(z, l2w_ref[...]) + l2b_ref[...]           # (N, LP)

    # GRU cell (conv output reused for all three gates; fused, 128-aligned gates)
    h0 = h0_ref[...]
    gc = _dot(c, wgc_ref[...]) + bg_ref[...]           # c-halves of [u | r | h] (N, 3LP)
    ghzr = _dot(h0, wghzr_ref[...])                    # h-halves of [u | r]     (N, 2LP)
    zg = jax.nn.sigmoid(gc[:, :lp] + ghzr[:, :lp])
    rg = jax.nn.sigmoid(gc[:, lp:2 * lp] + ghzr[:, lp:])
    hc = jnp.maximum(gc[:, 2 * lp:] + _dot(h0 * rg, wghh_ref[...]), 0.0)
    o_ref[...] = zg * h0 + (1.0 - zg) * hc             # lane-dense (N, 128) store


# --------------------------------------------------------------------------
# Parameter init (f32, "torch-like" layout) and packing for the fused kernel
# --------------------------------------------------------------------------
def _lin_params(key, fan_in, fan_out, bias=True, scale=0.1):
    kw, kb = jax.random.split(key)
    w = scale * jax.random.normal(kw, (fan_in, fan_out), F32)
    b = scale * jax.random.normal(kb, (1, fan_out), F32) if bias else None
    return w, b


def init_params(key, input_dim, hidden, latent, edge_dim, n_layers):
    keys = iter(jax.random.split(key, 256))
    p = {}
    p['lin1_w'], p['lin1_b'] = _lin_params(next(keys), input_dim, hidden)
    p['lin2_w'], p['lin2_b'] = _lin_params(next(keys), hidden, latent)
    p['layers'] = []
    for _ in range(n_layers):
        lyr = {}
        lyr['ln_g'] = jnp.ones((1, hidden), F32)            # LayerNorm default init
        lyr['ln_b'] = jnp.zeros((1, hidden), F32)
        lyr['we1'], lyr['be1'] = _lin_params(next(keys), edge_dim, hidden)   # edge_mlp
        lyr['we2'], lyr['be2'] = _lin_params(next(keys), hidden, hidden)
        lyr['w1'], lyr['b1'] = _lin_params(next(keys), 2 * hidden, hidden)   # node_mlp1
        lyr['w1c'], lyr['b1c'] = _lin_params(next(keys), hidden, hidden)
        lyr['w2a'], lyr['b2a'] = _lin_params(next(keys), hidden, hidden)     # node_mlp2
        lyr['w2b'], lyr['b2b'] = _lin_params(next(keys), hidden, hidden)
        p['layers'].append(lyr)
    p['att'] = []
    for _ in range(n_layers):        # module allocates n_layers, uses n_layers-1
        ap = {}
        ap['wk'], ap['bk'] = _lin_params(next(keys), hidden, hidden)
        ap['wq'], ap['bq'] = _lin_params(next(keys), hidden, hidden)
        ap['wv'], ap['bv'] = _lin_params(next(keys), hidden, hidden)
        ap['wskip'], _ = _lin_params(next(keys), hidden, hidden, bias=False)
        ap['bias'] = 0.1 * jax.random.normal(next(keys), (1, hidden), F32)
        p['att'].append(ap)
    p['wu'], p['bu'] = _lin_params(next(keys), 2 * latent, latent)
    p['wr'], p['br'] = _lin_params(next(keys), 2 * latent, latent)
    p['wh'], p['bh'] = _lin_params(next(keys), 2 * latent, latent)
    return p


def pack_params(p, n_layers, hidden, latent):
    """Stack per-layer weights, zero-pad feature dims to 128 lanes, fuse gates, bf16."""
    D, L = hidden, latent
    DP = _round_up(max(D, 1), 128)
    LP = _round_up(max(L, 1), 128)
    bf = lambda a: a.astype(BF16)

    def padw(w, rows, cols):
        return jnp.zeros((rows, cols), F32).at[:w.shape[0], :w.shape[1]].set(w)

    def padb(b, cols):
        return jnp.zeros((1, cols), F32).at[:, :b.shape[1]].set(b)

    layers = p['layers']
    stw = lambda k, r, c: jnp.stack([padw(lyr[k], r, c) for lyr in layers], 0)
    stb = lambda k, c: jnp.stack([padb(lyr[k], c) for lyr in layers], 0)

    # node_mlp1 first layer: input is [a_j (DP lanes) | b_i (DP lanes)], so split rows.
    w1s = []
    for lyr in layers:
        w = jnp.zeros((2 * DP, DP), F32)
        w = w.at[:D, :D].set(lyr['w1'][:D]).at[DP:DP + D, :D].set(lyr['w1'][D:])
        w1s.append(w)
    w1 = jnp.stack(w1s, 0)

    # edge MLP stage-1 fused wide across layers (edge_attr is layer-invariant)
    we1cat = jnp.concatenate([padw(lyr['we1'], lyr['we1'].shape[0], DP) for lyr in layers], 1)
    be1cat = jnp.concatenate([padb(lyr['be1'], DP) for lyr in layers], 1)

    att = p['att'][:max(n_layers - 1, 1)]        # dummy single entry if n_layers==1
    wkqvs, bkqvs = [], []
    for ap in att:
        w = jnp.zeros((DP, 3 * DP), F32)
        w = (w.at[:D, 0:D].set(ap['wk'])
              .at[:D, DP:DP + D].set(ap['wq'])
              .at[:D, 2 * DP:2 * DP + D].set(ap['wv']))
        b = jnp.zeros((1, 3 * DP), F32)
        b = (b.at[:, 0:D].set(ap['bk'])
              .at[:, DP:DP + D].set(ap['bq'])
              .at[:, 2 * DP:2 * DP + D].set(ap['bv']))
        wkqvs.append(w); bkqvs.append(b)
    wkqv = jnp.stack(wkqvs, 0)
    bkqv = jnp.stack(bkqvs, 0)
    wskip = jnp.stack([padw(ap['wskip'], DP, DP) for ap in att], 0)
    abias = jnp.stack([padb(ap['bias'], DP) for ap in att], 0)

    # GRU: fused c-halves of [u|r|h], h-halves of [u|r], each gate on its own 128 block
    wgc = jnp.concatenate([padw(p['wu'][:L], LP, LP), padw(p['wr'][:L], LP, LP),
                           padw(p['wh'][:L], LP, LP)], axis=1)
    wghzr = jnp.concatenate([padw(p['wu'][L:], LP, LP), padw(p['wr'][L:], LP, LP)], axis=1)
    wghh = padw(p['wh'][L:], LP, LP)
    bg = jnp.concatenate([padb(p['bu'], LP), padb(p['br'], LP), padb(p['bh'], LP)], axis=1)

    return [
        bf(padw(p['lin1_w'], p['lin1_w'].shape[0], DP)), padb(p['lin1_b'], DP),
        bf(padw(p['lin2_w'], DP, LP)), padb(p['lin2_b'], LP),
        stb('ln_g', DP), stb('ln_b', DP),
        bf(we1cat), be1cat,
        bf(stw('we2', DP, DP)), stb('be2', DP),
        bf(w1), stb('b1', DP),
        bf(stw('w1c', DP, DP)), stb('b1c', DP),
        bf(stw('w2a', DP, DP)), stb('b2a', DP),
        bf(stw('w2b', DP, DP)), stb('b2b', DP),
        bf(wkqv), bkqv, bf(wskip), abias,
        bf(wgc), bf(wghzr), bf(wghh), bg,
    ]


# --------------------------------------------------------------------------
# Wrapper: dst-grouped slot layout + one-hot gathers, call the fused kernel
# --------------------------------------------------------------------------
def graph_conv_gru(x, edge_index, edge_attr, packed, n_layers, hidden_dim, latent_dim,
                   h=None):
    n_nodes = x.shape[0]
    n_edges = edge_index.shape[1]
    edge_dim = edge_attr.shape[1]
    src = edge_index[0].astype(jnp.int32)
    dst = edge_index[1].astype(jnp.int32)

    # --- dst-grouped segment layout: each node owns K consecutive edge slots ---
    cnt = jnp.bincount(dst, length=n_nodes)
    max_deg = max(int(jnp.max(cnt)), 1)              # eager (wrapper is not jitted)
    k_slots = max(8, _round_up(max_deg, 8))          # 8-aligned -> free in-kernel reshape
    e_slots = n_nodes * k_slots

    oh_dst = jax.nn.one_hot(dst, n_nodes, dtype=jnp.int32)
    rank = (jnp.cumsum(oh_dst, axis=0) - 1)[jnp.arange(n_edges), dst]
    slot = dst * k_slots + rank                      # unique slot per edge

    # Padded slots get index -1 -> all-zero one-hot rows (they gather zeros and
    # contribute 0 to the mean; the max uses the explicit validity mask).
    slot_src = jnp.full((e_slots,), -1, jnp.int32).at[slot].set(src)
    slot_dst = jnp.full((e_slots,), -1, jnp.int32).at[slot].set(dst)
    vmask = jnp.zeros((e_slots, 1), F32).at[slot, 0].set(1.0)
    ea_slots = jnp.zeros((e_slots, edge_dim), F32).at[slot].set(edge_attr.astype(F32))

    ssrc = jax.nn.one_hot(slot_src, n_nodes, dtype=BF16)   # (E_slots, N)
    sdst = jax.nn.one_hot(slot_dst, n_nodes, dtype=BF16)   # (E_slots, N)

    cnt_f = cnt.astype(F32)[:, None]
    inv_cnt = 1.0 / jnp.maximum(cnt_f, 1.0)                # exact (glue-side) reciprocal
    has_in = (cnt_f > 0.5).astype(F32)

    dp = int(packed[0].shape[-1])                          # padded hidden (128*)
    lp = int(packed[2].shape[-1])                          # padded latent (128*)
    if h is None:
        h0 = jnp.zeros((n_nodes, lp), F32)
    else:
        h0 = jnp.zeros((n_nodes, lp), F32).at[:, :latent_dim].set(h.astype(F32))

    # TODO(synk): for large / degree-skewed graphs replace the dense one-hot gathers
    # with scalar-prefetch index-driven row gathers + degree-bucketed slots, and add
    # a node-block "parallel" grid axis to use both TensorCores on v7x.
    args = [x.astype(BF16), ea_slots.astype(BF16), ssrc, sdst,
            vmask, inv_cnt, has_in, h0] + list(packed)

    # Advisory cost estimate for XLA scheduling around the custom call.
    macs = n_nodes * x.shape[1] * dp + n_nodes * dp * lp
    macs += n_layers * (e_slots * edge_dim * dp + e_slots * dp * dp)
    macs += n_layers * (2 * e_slots * n_nodes * dp + 3 * e_slots * dp * dp
                        + 2 * n_nodes * dp * dp)
    macs += max(n_layers - 1, 0) * (4 * n_nodes * dp * dp + 3 * e_slots * n_nodes * dp)
    macs += 6 * n_nodes * lp * lp
    cost = pl.CostEstimate(
        flops=2 * int(macs),
        transcendentals=int(n_layers * e_slots * dp + 3 * n_nodes * lp),
        bytes_accessed=int(sum(int(a.size) * a.dtype.itemsize for a in args)
                           + n_nodes * lp * 4))

    kernel = functools.partial(_fused_kernel, n_layers, hidden_dim)
    vmem = pl.BlockSpec(memory_space=pltpu.MemorySpace.VMEM)
    out = pl.pallas_call(
        kernel,
        out_shape=jax.ShapeDtypeStruct((n_nodes, lp), F32),
        in_specs=[vmem] * len(args),
        out_specs=vmem,
        compiler_params=pltpu.CompilerParams(vmem_limit_bytes=_vmem_limit_bytes()),
        cost_estimate=cost,
    )(*args)
    return out[:, :latent_dim]           # drop lane padding outside the kernel


# --------------------------------------------------------------------------
# Pure-JAX f32 reference (highest matmul precision) for validation
# --------------------------------------------------------------------------
def _ref_forward(x, edge_index, edge_attr, p, n_layers, latent_dim):
    def dot(a, b):
        return jnp.dot(a, b, precision=jax.lax.Precision.HIGHEST)

    n_nodes = x.shape[0]
    src, dst = edge_index[0], edge_index[1]
    ssrc = jax.nn.one_hot(src, n_nodes, dtype=F32)
    sdst = jax.nn.one_hot(dst, n_nodes, dtype=F32)
    sdstT = sdst.T
    count = jnp.sum(sdstT, axis=-1, keepdims=True)

    def lin(v, w, b):
        return dot(v, w) + b

    def deep_gcn(xx, lyr):
        mu = jnp.mean(xx, axis=-1, keepdims=True)
        var = jnp.mean(jnp.square(xx - mu), axis=-1, keepdims=True)
        hh = jnp.maximum((xx - mu) * jax.lax.rsqrt(var + 1e-5) * lyr['ln_g'] + lyr['ln_b'], 0.0)
        a_j, b_i = dot(ssrc, hh), dot(sdst, hh)
        e = dot(jnp.maximum(lin(edge_attr, lyr['we1'], lyr['be1']), 0.0), lyr['we2']) + lyr['be2']
        n1 = jnp.maximum(dot(jnp.concatenate([a_j, b_i], axis=-1), lyr['w1']) + lyr['b1'], 0.0)
        n1 = dot(n1, lyr['w1c']) + lyr['b1c']
        msg = e * n1
        masked = jnp.where(sdstT[:, :, None] > 0.5, msg[None, :, :], NEG_BIG)
        aggr = jnp.where(count > 0.5, jnp.max(masked, axis=1), 0.0)
        n2 = dot(jnp.maximum(lin(hh, lyr['w2a'], lyr['b2a']), 0.0), lyr['w2b']) + lyr['b2b']
        return xx + aggr + n2

    def resg(xx, ap):
        k, q, v = lin(xx, ap['wk'], ap['bk']), lin(xx, ap['wq'], ap['bq']), lin(xx, ap['wv'], ap['bv'])
        msg = jax.nn.sigmoid(dot(sdst, k) + dot(ssrc, q)) * dot(ssrc, v)
        return dot(sdstT, msg) / jnp.maximum(count, 1.0) + dot(xx, ap['wskip']) + ap['bias']

    z = lin(x, p['lin1_w'], p['lin1_b'])
    z = deep_gcn(z, p['layers'][0])
    for n in range(n_layers - 1):
        z = resg(z, p['att'][n])
        z = deep_gcn(z, p['layers'][n + 1])
    c = lin(z, p['lin2_w'], p['lin2_b'])

    h0 = jnp.zeros((n_nodes, latent_dim), F32)
    L = latent_dim
    zg = jax.nn.sigmoid(dot(c, p['wu'][:L]) + dot(h0, p['wu'][L:]) + p['bu'])
    rg = jax.nn.sigmoid(dot(c, p['wr'][:L]) + dot(h0, p['wr'][L:]) + p['br'])
    hc = jnp.maximum(dot(c, p['wh'][:L]) + dot(h0 * rg, p['wh'][L:]) + p['bh'], 0.0)
    return zg * h0 + (1.0 - zg) * hc


# --------------------------------------------------------------------------
if __name__ == "__main__":
    # Small synthetic graph consistent with the module's forward signature.
    N, E = 16, 48
    input_dim, hidden_dim, latent_dim, edge_dim = 8, 32, 32, 8
    n_layers = 2
    # TODO(synk): training-mode stochastic dropout is not modeled (p=0 / eval => identity).

    key = jax.random.PRNGKey(0)
    kx, ke, ks, kd, kp = jax.random.split(key, 5)
    x = jax.random.normal(kx, (N, input_dim), F32)
    edge_attr = jax.random.normal(ke, (E, edge_dim), F32)
    src = jax.random.randint(ks, (E,), 0, N)
    dst = jax.random.randint(kd, (E,), 0, N)
    edge_index = jnp.stack([src, dst], axis=0)   # PyG convention: [2, E], row0=src, row1=dst

    params = init_params(kp, input_dim, hidden_dim, latent_dim, edge_dim, n_layers)
    packed = pack_params(params, n_layers, hidden_dim, latent_dim)

    h_out = graph_conv_gru(x, edge_index, edge_attr, packed, n_layers,
                           hidden_dim, latent_dim, h=None)
    h_out = jax.block_until_ready(h_out)

    ref = _ref_forward(x, edge_index, edge_attr, params, n_layers, latent_dim)
    assert h_out.shape == (N, latent_dim)
    assert bool(jnp.all(jnp.isfinite(h_out)))
    err = float(jnp.max(jnp.abs(h_out - ref)))
    # bf16 MXU operands (f32 accumulation) vs f32 HIGHEST reference -> relaxed tolerance.
    assert bool(jnp.allclose(h_out, ref, rtol=2e-2, atol=2e-2)), err

    print("KERNEL_OK")
</pallas_src>

<mosaic_0001>
module attributes {stable_mosaic.version = 11 : i64} {
  func.func @_fused_kernel(%arg0: memref<16x8xbf16, #tpu.memory_space<vmem>>, %arg1: memref<128x8xbf16, #tpu.memory_space<vmem>>, %arg2: memref<128x16xbf16, #tpu.memory_space<vmem>>, %arg3: memref<128x16xbf16, #tpu.memory_space<vmem>>, %arg4: memref<128x1xf32, #tpu.memory_space<vmem>>, %arg5: memref<16x1xf32, #tpu.memory_space<vmem>>, %arg6: memref<16x1xf32, #tpu.memory_space<vmem>>, %arg7: memref<16x128xf32, #tpu.memory_space<vmem>>, %arg8: memref<8x128xbf16, #tpu.memory_space<vmem>>, %arg9: memref<1x128xf32, #tpu.memory_space<vmem>>, %arg10: memref<128x128xbf16, #tpu.memory_space<vmem>>, %arg11: memref<1x128xf32, #tpu.memory_space<vmem>>, %arg12: memref<2x1x128xf32, #tpu.memory_space<vmem>>, %arg13: memref<2x1x128xf32, #tpu.memory_space<vmem>>, %arg14: memref<8x256xbf16, #tpu.memory_space<vmem>>, %arg15: memref<1x256xf32, #tpu.memory_space<vmem>>, %arg16: memref<2x128x128xbf16, #tpu.memory_space<vmem>>, %arg17: memref<2x1x128xf32, #tpu.memory_space<vmem>>, %arg18: memref<2x256x128xbf16, #tpu.memory_space<vmem>>, %arg19: memref<2x1x128xf32, #tpu.memory_space<vmem>>, %arg20: memref<2x128x128xbf16, #tpu.memory_space<vmem>>, %arg21: memref<2x1x128xf32, #tpu.memory_space<vmem>>, %arg22: memref<2x128x128xbf16, #tpu.memory_space<vmem>>, %arg23: memref<2x1x128xf32, #tpu.memory_space<vmem>>, %arg24: memref<2x128x128xbf16, #tpu.memory_space<vmem>>, %arg25: memref<2x1x128xf32, #tpu.memory_space<vmem>>, %arg26: memref<1x128x384xbf16, #tpu.memory_space<vmem>>, %arg27: memref<1x1x384xf32, #tpu.memory_space<vmem>>, %arg28: memref<1x128x128xbf16, #tpu.memory_space<vmem>>, %arg29: memref<1x1x128xf32, #tpu.memory_space<vmem>>, %arg30: memref<128x384xbf16, #tpu.memory_space<vmem>>, %arg31: memref<128x256xbf16, #tpu.memory_space<vmem>>, %arg32: memref<128x128xbf16, #tpu.memory_space<vmem>>, %arg33: memref<1x384xf32, #tpu.memory_space<vmem>>, %arg34: memref<16x128xf32, #tpu.memory_space<vmem>>) attributes {dimension_semantics = [], scalar_prefetch = 0 : i64, scratch_operands = 0 : i64, tpu.core_type = #tpu.core_type<tc>} {
    %c0 = arith.constant 0 : index
    %c0_0 = arith.constant 0 : index
    %0 = vector.load %arg0[%c0, %c0_0] : memref<16x8xbf16, #tpu.memory_space<vmem>>, vector<16x8xbf16>
    %c0_1 = arith.constant 0 : index
    %c0_2 = arith.constant 0 : index
    %1 = vector.load %arg1[%c0_1, %c0_2] : memref<128x8xbf16, #tpu.memory_space<vmem>>, vector<128x8xbf16>
    %c0_3 = arith.constant 0 : index
    %c0_4 = arith.constant 0 : index
    %2 = vector.load %arg2[%c0_3, %c0_4] : memref<128x16xbf16, #tpu.memory_space<vmem>>, vector<128x16xbf16>
    %c0_5 = arith.constant 0 : index
    %c0_6 = arith.constant 0 : index
    %3 = vector.load %arg3[%c0_5, %c0_6] : memref<128x16xbf16, #tpu.memory_space<vmem>>, vector<128x16xbf16>
    %4 = tpu.iota {dimensions = array<i32: 1>} : vector<1x128xi32>
    %c32_i32 = arith.constant 32 : i32
    %5 = vector.broadcast %c32_i32 : i32 to vector<1x128xi32>
    %6 = arith.cmpi slt, %4, %5 : vector<1x128xi32>
    %7 = arith.extui %6 : vector<1x128xi1> to vector<1x128xi32>
    %8 = arith.sitofp %7 : vector<1x128xi32> to vector<1x128xf32>
    %c0_7 = arith.constant 0 : index
    %c0_8 = arith.constant 0 : index
    %9 = vector.load %arg4[%c0_7, %c0_8] : memref<128x1xf32, #tpu.memory_space<vmem>>, vector<128x1xf32>
    %10 = vector.shape_cast %9 : vector<128x1xf32> to vector<128x1xf32>
    %11 = vector.broadcast %10 : vector<128x1xf32> to vector<128x128xf32>
    %cst = arith.constant 5.000000e-01 : f32
    %12 = vector.broadcast %cst : f32 to vector<128x128xf32>
    %13 = arith.cmpf ogt, %11, %12 : vector<128x128xf32>
    %c0_9 = arith.constant 0 : index
    %c0_10 = arith.constant 0 : index
    %14 = vector.load %arg5[%c0_9, %c0_10] : memref<16x1xf32, #tpu.memory_space<vmem>>, vector<16x1xf32>
    %15 = vector.shape_cast %14 : vector<16x1xf32> to vector<16x1xf32>
    %16 = vector.broadcast %15 : vector<16x1xf32> to vector<16x128xf32>
    %c0_11 = arith.constant 0 : index
    %c0_12 = arith.constant 0 : index
    %17 = vector.load %arg6[%c0_11, %c0_12] : memref<16x1xf32, #tpu.memory_space<vmem>>, vector<16x1xf32>
    %18 = vector.shape_cast %17 : vector<16x1xf32> to vector<16x1xf32>
    %19 = vector.broadcast %18 : vector<16x1xf32> to vector<16x128xf32>
    %c0_13 = arith.constant 0 : index
    %c0_14 = arith.constant 0 : index
    %20 = vector.load %arg14[%c0_13, %c0_14] : memref<8x256xbf16, #tpu.memory_space<vmem>>, vector<8x256xbf16>
    %cst_15 = arith.constant dense<0.000000e+00> : vector<128x256xf32>
    %21 = tpu.matmul %1, %20, %cst_15 {dimension_numbers = #tpu.dot_dimension_numbers<[1], [0], [0], [1], [0, 0, 1, 1], [], []>} : vector<128x8xbf16>, vector<8x256xbf16>, vector<128x256xf32> -> vector<128x256xf32>
    %c0_16 = arith.constant 0 : index
    %c0_17 = arith.constant 0 : index
    %22 = vector.load %arg15[%c0_16, %c0_17] : memref<1x256xf32, #tpu.memory_space<vmem>>, vector<1x256xf32>
    %23 = vector.broadcast %22 : vector<1x256xf32> to vector<128x256xf32>
    %24 = arith.addf %21, %23 : vector<128x256xf32>
    %cst_18 = arith.constant 0.000000e+00 : f32
    %25 = vector.broadcast %cst_18 : f32 to vector<128x256xf32>
    %26 = arith.maximumf %24, %25 : vector<128x256xf32>
    %27 = vector.extract_strided_slice %26 {offsets = [0, 0], sizes = [128, 128], strides = [1, 1]} : vector<128x256xf32> to vector<128x128xf32>
    %c0_19 = arith.constant 0 : index
    %c0_20 = arith.constant 0 : index
    %c0_21 = arith.constant 0 : index
    %28 = vector.load %arg16[%c0_19, %c0_20, %c0_21] : memref<2x128x128xbf16, #tpu.memory_space<vmem>>, vector<1x128x128xbf16>
    %29 = vector.shape_cast %28 : vector<1x128x128xbf16> to vector<128x128xbf16>
    %30 = arith.truncf %27 : vector<128x128xf32> to vector<128x128xbf16>
    %cst_22 = arith.constant dense<0.000000e+00> : vector<128x128xf32>
    %31 = tpu.matmul %30, %29, %cst_22 {dimension_numbers = #tpu.dot_dimension_numbers<[1], [0], [0], [1], [0, 0, 1, 1], [], []>} : vector<128x128xbf16>, vector<128x128xbf16>, vector<128x128xf32> -> vector<128x128xf32>
    %c0_23 = arith.constant 0 : index
    %c0_24 = arith.constant 0 : index
    %c0_25 = arith.constant 0 : index
    %32 = vector.load %arg17[%c0_23, %c0_24, %c0_25] : memref<2x1x128xf32, #tpu.memory_space<vmem>>, vector<1x1x128xf32>
    %33 = vector.shape_cast %32 : vector<1x1x128xf32> to vector<1x128xf32>
    %34 = vector.broadcast %33 : vector<1x128xf32> to vector<128x128xf32>
    %35 = arith.addf %31, %34 : vector<128x128xf32>
    %36 = vector.extract_strided_slice %26 {offsets = [0, 128], sizes = [128, 128], strides = [1, 1]} : vector<128x256xf32> to vector<128x128xf32>
    %c1 = arith.constant 1 : index
    %c0_26 = arith.constant 0 : index
    %c0_27 = arith.constant 0 : index
    %37 = vector.load %arg16[%c1, %c0_26, %c0_27] : memref<2x128x128xbf16, #tpu.memory_space<vmem>>, vector<1x128x128xbf16>
    %38 = vector.shape_cast %37 : vector<1x128x128xbf16> to vector<128x128xbf16>
    %39 = arith.truncf %36 : vector<128x128xf32> to vector<128x128xbf16>
    %cst_28 = arith.constant dense<0.000000e+00> : vector<128x128xf32>
    %40 = tpu.matmul %39, %38, %cst_28 {dimension_numbers = #tpu.dot_dimension_numbers<[1], [0], [0], [1], [0, 0, 1, 1], [], []>} : vector<128x128xbf16>, vector<128x128xbf16>, vector<128x128xf32> -> vector<128x128xf32>
    %c1_29 = arith.constant 1 : index
    %c0_30 = arith.constant 0 : index
    %c0_31 = arith.constant 0 : index
    %41 = vector.load %arg17[%c1_29, %c0_30, %c0_31] : memref<2x1x128xf32, #tpu.memory_space<vmem>>, vector<1x1x128xf32>
    %42 = vector.shape_cast %41 : vector<1x1x128xf32> to vector<1x128xf32>
    %43 = vector.broadcast %42 : vector<1x128xf32> to vector<128x128xf32>
    %44 = arith.addf %40, %43 : vector<128x128xf32>
    %c0_32 = arith.constant 0 : index
    %c0_33 = arith.constant 0 : index
    %45 = vector.load %arg8[%c0_32, %c0_33] : memref<8x128xbf16, #tpu.memory_space<vmem>>, vector<8x128xbf16>
    %cst_34 = arith.constant dense<0.000000e+00> : vector<16x128xf32>
    %46 = tpu.matmul %0, %45, %cst_34 {dimension_numbers = #tpu.dot_dimension_numbers<[1], [0], [0], [1], [0, 0, 1, 1], [], []>} : vector<16x8xbf16>, vector<8x128xbf16>, vector<16x128xf32> -> vector<16x128xf32>
    %c0_35 = arith.constant 0 : index
    %c0_36 = arith.constant 0 : index
    %47 = vector.load %arg9[%c0_35, %c0_36] : memref<1x128xf32, #tpu.memory_space<vmem>>, vector<1x128xf32>
    %48 = vector.broadcast %47 : vector<1x128xf32> to vector<16x128xf32>
    %49 = arith.addf %46, %48 : vector<16x128xf32>
    %cst_37 = arith.constant dense<0.000000e+00> : vector<16xf32>
    %50 = vector.multi_reduction <add>, %49, %cst_37 [1] : vector<16x128xf32> to vector<16xf32>
    %51 = vector.shape_cast %50 : vector<16xf32> to vector<16x1xf32>
    %cst_38 = arith.constant 3.125000e-02 : f32
    %52 = vector.broadcast %cst_38 : f32 to vector<16x1xf32>
    %53 = arith.mulf %51, %52 : vector<16x1xf32>
    %54 = vector.broadcast %53 : vector<16x1xf32> to vector<16x128xf32>
    %55 = arith.subf %49, %54 : vector<16x128xf32>
    %56 = vector.broadcast %8 : vector<1x128xf32> to vector<16x128xf32>
    %57 = arith.mulf %55, %56 : vector<16x128xf32>
    %58 = arith.mulf %57, %57 : vector<16x128xf32>
    %cst_39 = arith.constant dense<0.000000e+00> : vector<16xf32>
    %59 = vector.multi_reduction <add>, %58, %cst_39 [1] : vector<16x128xf32> to vector<16xf32>
    %60 = vector.shape_cast %59 : vector<16xf32> to vector<16x1xf32>
    %cst_40 = arith.constant 3.125000e-02 : f32
    %61 = vector.broadcast %cst_40 : f32 to vector<16x1xf32>
    %62 = arith.mulf %60, %61 : vector<16x1xf32>
    %cst_41 = arith.constant 9.99999974E-6 : f32
    %63 = vector.broadcast %cst_41 : f32 to vector<16x1xf32>
    %64 = arith.addf %62, %63 : vector<16x1xf32>
    %65 = math.rsqrt %64 : vector<16x1xf32>
    %66 = vector.broadcast %65 : vector<16x1xf32> to vector<16x128xf32>
    %67 = arith.mulf %57, %66 : vector<16x128xf32>
    %c0_42 = arith.constant 0 : index
    %c0_43 = arith.constant 0 : index
    %c0_44 = arith.constant 0 : index
    %68 = vector.load %arg12[%c0_42, %c0_43, %c0_44] : memref<2x1x128xf32, #tpu.memory_space<vmem>>, vector<1x1x128xf32>
    %69 = vector.shape_cast %68 : vector<1x1x128xf32> to vector<1x128xf32>
    %70 = vector.broadcast %69 : vector<1x128xf32> to vector<16x128xf32>
    %71 = arith.mulf %67, %70 : vector<16x128xf32>
    %c0_45 = arith.constant 0 : index
    %c0_46 = arith.constant 0 : index
    %c0_47 = arith.constant 0 : index
    %72 = vector.load %arg13[%c0_45, %c0_46, %c0_47] : memref<2x1x128xf32, #tpu.memory_space<vmem>>, vector<1x1x128xf32>
    %73 = vector.shape_cast %72 : vector<1x1x128xf32> to vector<1x128xf32>
    %74 = vector.broadcast %73 : vector<1x128xf32> to vector<16x128xf32>
    %75 = arith.addf %71, %74 : vector<16x128xf32>
    %cst_48 = arith.constant 0.000000e+00 : f32
    %76 = vector.broadcast %cst_48 : f32 to vector<16x128xf32>
    %77 = arith.maximumf %75, %76 : vector<16x128xf32>
    %78 = arith.truncf %77 : vector<16x128xf32> to vector<16x128xbf16>
    %cst_49 = arith.constant dense<0.000000e+00> : vector<128x128xf32>
    %79 = tpu.matmul %2, %78, %cst_49 {dimension_numbers = #tpu.dot_dimension_numbers<[1], [0], [0], [1], [0, 0, 1, 1], [], []>} : vector<128x16xbf16>, vector<16x128xbf16>, vector<128x128xf32> -> vector<128x128xf32>
    %80 = arith.truncf %77 : vector<16x128xf32> to vector<16x128xbf16>
    %cst_50 = arith.constant dense<0.000000e+00> : vector<128x128xf32>
    %81 = tpu.matmul %3, %80, %cst_50 {dimension_numbers = #tpu.dot_dimension_numbers<[1], [0], [0], [1], [0, 0, 1, 1], [], []>} : vector<128x16xbf16>, vector<16x128xbf16>, vector<128x128xf32> -> vector<128x128xf32>
    %82 = tpu.concatenate %79, %81 in 1 : vector<128x128xf32>, vector<128x128xf32> -> vector<128x256xf32>
    %c0_51 = arith.constant 0 : index
    %c0_52 = arith.constant 0 : index
    %c0_53 = arith.constant 0 : index
    %83 = vector.load %arg18[%c0_51, %c0_52, %c0_53] : memref<2x256x128xbf16, #tpu.memory_space<vmem>>, vector<1x256x128xbf16>
    %84 = vector.shape_cast %83 : vector<1x256x128xbf16> to vector<256x128xbf16>
    %85 = arith.truncf %82 : vector<128x256xf32> to vector<128x256xbf16>
    %cst_54 = arith.constant dense<0.000000e+00> : vector<128x128xf32>
    %86 = tpu.matmul %85, %84, %cst_54 {dimension_numbers = #tpu.dot_dimension_numbers<[1], [0], [0], [1], [0, 0, 1, 1], [], []>} : vector<128x256xbf16>, vector<256x128xbf16>, vector<128x128xf32> -> vector<128x128xf32>
    %c0_55 = arith.constant 0 : index
    %c0_56 = arith.constant 0 : index
    %c0_57 = arith.constant 0 : index
    %87 = vector.load %arg19[%c0_55, %c0_56, %c0_57] : memref<2x1x128xf32, #tpu.memory_space<vmem>>, vector<1x1x128xf32>
    %88 = vector.shape_cast %87 : vector<1x1x128xf32> to vector<1x128xf32>
    %89 = vector.broadcast %88 : vector<1x128xf32> to vector<128x128xf32>
    %90 = arith.addf %86, %89 : vector<128x128xf32>
    %cst_58 = arith.constant 0.000000e+00 : f32
    %91 = vector.broadcast %cst_58 : f32 to vector<128x128xf32>
    %92 = arith.maximumf %90, %91 : vector<128x128xf32>
    %c0_59 = arith.constant 0 : index
    %c0_60 = arith.constant 0 : index
    %c0_61 = arith.constant 0 : index
    %93 = vector.load %arg20[%c0_59, %c0_60, %c0_61] : memref<2x128x128xbf16, #tpu.memory_space<vmem>>, vector<1x128x128xbf16>
    %94 = vector.shape_cast %93 : vector<1x128x128xbf16> to vector<128x128xbf16>
    %95 = arith.truncf %92 : vector<128x128xf32> to vector<128x128xbf16>
    %cst_62 = arith.constant dense<0.000000e+00> : vector<128x128xf32>
    %96 = tpu.matmul %95, %94, %cst_62 {dimension_numbers = #tpu.dot_dimension_numbers<[1], [0], [0], [1], [0, 0, 1, 1], [], []>} : vector<128x128xbf16>, vector<128x128xbf16>, vector<128x128xf32> -> vector<128x128xf32>
    %c0_63 = arith.constant 0 : index
    %c0_64 = arith.constant 0 : index
    %c0_65 = arith.constant 0 : index
    %97 = vector.load %arg21[%c0_63, %c0_64, %c0_65] : memref<2x1x128xf32, #tpu.memory_space<vmem>>, vector<1x1x128xf32>
    %98 = vector.shape_cast %97 : vector<1x1x128xf32> to vector<1x128xf32>
    %99 = vector.broadcast %98 : vector<1x128xf32> to vector<128x128xf32>
    %100 = arith.addf %96, %99 : vector<128x128xf32>
    %101 = arith.mulf %35, %100 : vector<128x128xf32>
    %cst_66 = arith.constant -1.000000e+30 : f32
    %102 = vector.broadcast %cst_66 : f32 to vector<128x128xf32>
    %103 = arith.select %13, %101, %102 : vector<128x128xi1>, vector<128x128xf32>
    %104 = vector.shape_cast %103 : vector<128x128xf32> to vector<16x8x128xf32>
    %cst_67 = arith.constant dense<0xFF800000> : vector<16x128xf32>
    %105 = vector.multi_reduction <maximumf>, %104, %cst_67 [1] : vector<16x8x128xf32> to vector<16x128xf32>
    %106 = arith.mulf %105, %19 : vector<16x128xf32>
    %c0_68 = arith.constant 0 : index
    %c0_69 = arith.constant 0 : index
    %c0_70 = arith.constant 0 : index
    %107 = vector.load %arg22[%c0_68, %c0_69, %c0_70] : memref<2x128x128xbf16, #tpu.memory_space<vmem>>, vector<1x128x128xbf16>
    %108 = vector.shape_cast %107 : vector<1x128x128xbf16> to vector<128x128xbf16>
    %109 = arith.truncf %77 : vector<16x128xf32> to vector<16x128xbf16>
    %cst_71 = arith.constant dense<0.000000e+00> : vector<16x128xf32>
    %110 = tpu.matmul %109, %108, %cst_71 {dimension_numbers = #tpu.dot_dimension_numbers<[1], [0], [0], [1], [0, 0, 1, 1], [], []>} : vector<16x128xbf16>, vector<128x128xbf16>, vector<16x128xf32> -> vector<16x128xf32>
    %c0_72 = arith.constant 0 : index
    %c0_73 = arith.constant 0 : index
    %c0_74 = arith.constant 0 : index
    %111 = vector.load %arg23[%c0_72, %c0_73, %c0_74] : memref<2x1x128xf32, #tpu.memory_space<vmem>>, vector<1x1x128xf32>
    %112 = vector.shape_cast %111 : vector<1x1x128xf32> to vector<1x128xf32>
    %113 = vector.broadcast %112 : vector<1x128xf32> to vector<16x128xf32>
    %114 = arith.addf %110, %113 : vector<16x128xf32>
    %cst_75 = arith.constant 0.000000e+00 : f32
    %115 = vector.broadcast %cst_75 : f32 to vector<16x128xf32>
    %116 = arith.maximumf %114, %115 : vector<16x128xf32>
    %c0_76 = arith.constant 0 : index
    %c0_77 = arith.constant 0 : index
    %c0_78 = arith.constant 0 : index
    %117 = vector.load %arg24[%c0_76, %c0_77, %c0_78] : memref<2x128x128xbf16, #tpu.memory_space<vmem>>, vector<1x128x128xbf16>
    %118 = vector.shape_cast %117 : vector<1x128x128xbf16> to vector<128x128xbf16>
    %119 = arith.truncf %116 : vector<16x128xf32> to vector<16x128xbf16>
    %cst_79 = arith.constant dense<0.000000e+00> : vector<16x128xf32>
    %120 = tpu.matmul %119, %118, %cst_79 {dimension_numbers = #tpu.dot_dimension_numbers<[1], [0], [0], [1], [0, 0, 1, 1], [], []>} : vector<16x128xbf16>, vector<128x128xbf16>, vector<16x128xf32> -> vector<16x128xf32>
    %c0_80 = arith.constant 0 : index
    %c0_81 = arith.constant 0 : index
    %c0_82 = arith.constant 0 : index
    %121 = vector.load %arg25[%c0_80, %c0_81, %c0_82] : memref<2x1x128xf32, #tpu.memory_space<vmem>>, vector<1x1x128xf32>
    %122 = vector.shape_cast %121 : vector<1x1x128xf32> to vector<1x128xf32>
    %123 = vector.broadcast %122 : vector<1x128xf32> to vector<16x128xf32>
    %124 = arith.addf %120, %123 : vector<16x128xf32>
    %125 = arith.addf %49, %106 : vector<16x128xf32>
    %126 = arith.addf %125, %124 : vector<16x128xf32>
    %c0_83 = arith.constant 0 : index
    %c0_84 = arith.constant 0 : index
    %c0_85 = arith.constant 0 : index
    %127 = vector.load %arg26[%c0_83, %c0_84, %c0_85] : memref<1x128x384xbf16, #tpu.memory_space<vmem>>, vector<1x128x384xbf16>
    %128 = vector.shape_cast %127 : vector<1x128x384xbf16> to vector<128x384xbf16>
    %129 = arith.truncf %126 : vector<16x128xf32> to vector<16x128xbf16>
    %cst_86 = arith.constant dense<0.000000e+00> : vector<16x384xf32>
    %130 = tpu.matmul %129, %128, %cst_86 {dimension_numbers = #tpu.dot_dimension_numbers<[1], [0], [0], [1], [0, 0, 1, 1], [], []>} : vector<16x128xbf16>, vector<128x384xbf16>, vector<16x384xf32> -> vector<16x384xf32>
    %c0_87 = arith.constant 0 : index
    %c0_88 = arith.constant 0 : index
    %c0_89 = arith.constant 0 : index
    %131 = vector.load %arg27[%c0_87, %c0_88, %c0_89] : memref<1x1x384xf32, #tpu.memory_space<vmem>>, vector<1x1x384xf32>
    %132 = vector.shape_cast %131 : vector<1x1x384xf32> to vector<1x384xf32>
    %133 = vector.broadcast %132 : vector<1x384xf32> to vector<16x384xf32>
    %134 = arith.addf %130, %133 : vector<16x384xf32>
    %135 = vector.extract_strided_slice %134 {offsets = [0, 0], sizes = [16, 128], strides = [1, 1]} : vector<16x384xf32> to vector<16x128xf32>
    %136 = arith.truncf %135 : vector<16x128xf32> to vector<16x128xbf16>
    %cst_90 = arith.constant dense<0.000000e+00> : vector<128x128xf32>
    %137 = tpu.matmul %3, %136, %cst_90 {dimension_numbers = #tpu.dot_dimension_numbers<[1], [0], [0], [1], [0, 0, 1, 1], [], []>} : vector<128x16xbf16>, vector<16x128xbf16>, vector<128x128xf32> -> vector<128x128xf32>
    %138 = vector.extract_strided_slice %134 {offsets = [0, 128], sizes = [16, 256], strides = [1, 1]} : vector<16x384xf32> to vector<16x256xf32>
    %139 = arith.truncf %138 : vector<16x256xf32> to vector<16x256xbf16>
    %cst_91 = arith.constant dense<0.000000e+00> : vector<128x256xf32>
    %140 = tpu.matmul %2, %139, %cst_91 {dimension_numbers = #tpu.dot_dimension_numbers<[1], [0], [0], [1], [0, 0, 1, 1], [], []>} : vector<128x16xbf16>, vector<16x256xbf16>, vector<128x256xf32> -> vector<128x256xf32>
    %141 = vector.extract_strided_slice %140 {offsets = [0, 0], sizes = [128, 128], strides = [1, 1]} : vector<128x256xf32> to vector<128x128xf32>
    %142 = arith.addf %137, %141 : vector<128x128xf32>
    %143 = arith.negf %142 : vector<128x128xf32>
    %144 = math.exp %143 : vector<128x128xf32>
    %cst_92 = arith.constant 1.000000e+00 : f32
    %145 = vector.broadcast %cst_92 : f32 to vector<128x128xf32>
    %146 = arith.addf %145, %144 : vector<128x128xf32>
    %147 = arith.divf %145, %146 : vector<128x128xf32>
    %148 = vector.extract_strided_slice %140 {offsets = [0, 128], sizes = [128, 128], strides = [1, 1]} : vector<128x256xf32> to vector<128x128xf32>
    %149 = arith.mulf %147, %148 : vector<128x128xf32>
    %150 = vector.shape_cast %149 : vector<128x128xf32> to vector<16x8x128xf32>
    %cst_93 = arith.constant dense<0.000000e+00> : vector<16x128xf32>
    %151 = vector.multi_reduction <add>, %150, %cst_93 [1] : vector<16x8x128xf32> to vector<16x128xf32>
    %152 = arith.mulf %151, %16 : vector<16x128xf32>
    %c0_94 = arith.constant 0 : index
    %c0_95 = arith.constant 0 : index
    %c0_96 = arith.constant 0 : index
    %153 = vector.load %arg28[%c0_94, %c0_95, %c0_96] : memref<1x128x128xbf16, #tpu.memory_space<vmem>>, vector<1x128x128xbf16>
    %154 = vector.shape_cast %153 : vector<1x128x128xbf16> to vector<128x128xbf16>
    %155 = arith.truncf %126 : vector<16x128xf32> to vector<16x128xbf16>
    %cst_97 = arith.constant dense<0.000000e+00> : vector<16x128xf32>
    %156 = tpu.matmul %155, %154, %cst_97 {dimension_numbers = #tpu.dot_dimension_numbers<[1], [0], [0], [1], [0, 0, 1, 1], [], []>} : vector<16x128xbf16>, vector<128x128xbf16>, vector<16x128xf32> -> vector<16x128xf32>
    %157 = arith.addf %152, %156 : vector<16x128xf32>
    %c0_98 = arith.constant 0 : index
    %c0_99 = arith.constant 0 : index
    %c0_100 = arith.constant 0 : index
    %158 = vector.load %arg29[%c0_98, %c0_99, %c0_100] : memref<1x1x128xf32, #tpu.memory_space<vmem>>, vector<1x1x128xf32>
    %159 = vector.shape_cast %158 : vector<1x1x128xf32> to vector<1x128xf32>
    %160 = vector.broadcast %159 : vector<1x128xf32> to vector<16x128xf32>
    %161 = arith.addf %157, %160 : vector<16x128xf32>
    %cst_101 = arith.constant dense<0.000000e+00> : vector<16xf32>
    %162 = vector.multi_reduction <add>, %161, %cst_101 [1] : vector<16x128xf32> to vector<16xf32>
    %163 = vector.shape_cast %162 : vector<16xf32> to vector<16x1xf32>
    %cst_102 = arith.constant 3.125000e-02 : f32
    %164 = vector.broadcast %cst_102 : f32 to vector<16x1xf32>
    %165 = arith.mulf %163, %164 : vector<16x1xf32>
    %166 = vector.broadcast %165 : vector<16x1xf32> to vector<16x128xf32>
    %167 = arith.subf %161, %166 : vector<16x128xf32>
    %168 = vector.broadcast %8 : vector<1x128xf32> to vector<16x128xf32>
    %169 = arith.mulf %167, %168 : vector<16x128xf32>
    %170 = arith.mulf %169, %169 : vector<16x128xf32>
    %cst_103 = arith.constant dense<0.000000e+00> : vector<16xf32>
    %171 = vector.multi_reduction <add>, %170, %cst_103 [1] : vector<16x128xf32> to vector<16xf32>
    %172 = vector.shape_cast %171 : vector<16xf32> to vector<16x1xf32>
    %cst_104 = arith.constant 3.125000e-02 : f32
    %173 = vector.broadcast %cst_104 : f32 to vector<16x1xf32>
    %174 = arith.mulf %172, %173 : vector<16x1xf32>
    %cst_105 = arith.constant 9.99999974E-6 : f32
    %175 = vector.broadcast %cst_105 : f32 to vector<16x1xf32>
    %176 = arith.addf %174, %175 : vector<16x1xf32>
    %177 = math.rsqrt %176 : vector<16x1xf32>
    %178 = vector.broadcast %177 : vector<16x1xf32> to vector<16x128xf32>
    %179 = arith.mulf %169, %178 : vector<16x128xf32>
    %c1_106 = arith.constant 1 : index
    %c0_107 = arith.constant 0 : index
    %c0_108 = arith.constant 0 : index
    %180 = vector.load %arg12[%c1_106, %c0_107, %c0_108] : memref<2x1x128xf32, #tpu.memory_space<vmem>>, vector<1x1x128xf32>
    %181 = vector.shape_cast %180 : vector<1x1x128xf32> to vector<1x128xf32>
    %182 = vector.broadcast %181 : vector<1x128xf32> to vector<16x128xf32>
    %183 = arith.mulf %179, %182 : vector<16x128xf32>
    %c1_109 = arith.constant 1 : index
    %c0_110 = arith.constant 0 : index
    %c0_111 = arith.constant 0 : index
    %184 = vector.load %arg13[%c1_109, %c0_110, %c0_111] : memref<2x1x128xf32, #tpu.memory_space<vmem>>, vector<1x1x128xf32>
    %185 = vector.shape_cast %184 : vector<1x1x128xf32> to vector<1x128xf32>
    %186 = vector.broadcast %185 : vector<1x128xf32> to vector<16x128xf32>
    %187 = arith.addf %183, %186 : vector<16x128xf32>
    %cst_112 = arith.constant 0.000000e+00 : f32
    %188 = vector.broadcast %cst_112 : f32 to vector<16x128xf32>
    %189 = arith.maximumf %187, %188 : vector<16x128xf32>
    %190 = arith.truncf %189 : vector<16x128xf32> to vector<16x128xbf16>
    %cst_113 = arith.constant dense<0.000000e+00> : vector<128x128xf32>
    %191 = tpu.matmul %2, %190, %cst_113 {dimension_numbers = #tpu.dot_dimension_numbers<[1], [0], [0], [1], [0, 0, 1, 1], [], []>} : vector<128x16xbf16>, vector<16x128xbf16>, vector<128x128xf32> -> vector<128x128xf32>
    %192 = arith.truncf %189 : vector<16x128xf32> to vector<16x128xbf16>
    %cst_114 = arith.constant dense<0.000000e+00> : vector<128x128xf32>
    %193 = tpu.matmul %3, %192, %cst_114 {dimension_numbers = #tpu.dot_dimension_numbers<[1], [0], [0], [1], [0, 0, 1, 1], [], []>} : vector<128x16xbf16>, vector<16x128xbf16>, vector<128x128xf32> -> vector<128x128xf32>
    %194 = tpu.concatenate %191, %193 in 1 : vector<128x128xf32>, vector<128x128xf32> -> vector<128x256xf32>
    %c1_115 = arith.constant 1 : index
    %c0_116 = arith.constant 0 : index
    %c0_117 = arith.constant 0 : index
    %195 = vector.load %arg18[%c1_115, %c0_116, %c0_117] : memref<2x256x128xbf16, #tpu.memory_space<vmem>>, vector<1x256x128xbf16>
    %196 = vector.shape_cast %195 : vector<1x256x128xbf16> to vector<256x128xbf16>
    %197 = arith.truncf %194 : vector<128x256xf32> to vector<128x256xbf16>
    %cst_118 = arith.constant dense<0.000000e+00> : vector<128x128xf32>
    %198 = tpu.matmul %197, %196, %cst_118 {dimension_numbers = #tpu.dot_dimension_numbers<[1], [0], [0], [1], [0, 0, 1, 1], [], []>} : vector<128x256xbf16>, vector<256x128xbf16>, vector<128x128xf32> -> vector<128x128xf32>
    %c1_119 = arith.constant 1 : index
    %c0_120 = arith.constant 0 : index
    %c0_121 = arith.constant 0 : index
    %199 = vector.load %arg19[%c1_119, %c0_120, %c0_121] : memref<2x1x128xf32, #tpu.memory_space<vmem>>, vector<1x1x128xf32>
    %200 = vector.shape_cast %199 : vector<1x1x128xf32> to vector<1x128xf32>
    %201 = vector.broadcast %200 : vector<1x128xf32> to vector<128x128xf32>
    %202 = arith.addf %198, %201 : vector<128x128xf32>
    %cst_122 = arith.constant 0.000000e+00 : f32
    %203 = vector.broadcast %cst_122 : f32 to vector<128x128xf32>
    %204 = arith.maximumf %202, %203 : vector<128x128xf32>
    %c1_123 = arith.constant 1 : index
    %c0_124 = arith.constant 0 : index
    %c0_125 = arith.constant 0 : index
    %205 = vector.load %arg20[%c1_123, %c0_124, %c0_125] : memref<2x128x128xbf16, #tpu.memory_space<vmem>>, vector<1x128x128xbf16>
    %206 = vector.shape_cast %205 : vector<1x128x128xbf16> to vector<128x128xbf16>
    %207 = arith.truncf %204 : vector<128x128xf32> to vector<128x128xbf16>
    %cst_126 = arith.constant dense<0.000000e+00> : vector<128x128xf32>
    %208 = tpu.matmul %207, %206, %cst_126 {dimension_numbers = #tpu.dot_dimension_numbers<[1], [0], [0], [1], [0, 0, 1, 1], [], []>} : vector<128x128xbf16>, vector<128x128xbf16>, vector<128x128xf32> -> vector<128x128xf32>
    %c1_127 = arith.constant 1 : index
    %c0_128 = arith.constant 0 : index
    %c0_129 = arith.constant 0 : index
    %209 = vector.load %arg21[%c1_127, %c0_128, %c0_129] : memref<2x1x128xf32, #tpu.memory_space<vmem>>, vector<1x1x128xf32>
    %210 = vector.shape_cast %209 : vector<1x1x128xf32> to vector<1x128xf32>
    %211 = vector.broadcast %210 : vector<1x128xf32> to vector<128x128xf32>
    %212 = arith.addf %208, %211 : vector<128x128xf32>
    %213 = arith.mulf %44, %212 : vector<128x128xf32>
    %cst_130 = arith.constant -1.000000e+30 : f32
    %214 = vector.broadcast %cst_130 : f32 to vector<128x128xf32>
    %215 = arith.select %13, %213, %214 : vector<128x128xi1>, vector<128x128xf32>
    %216 = vector.shape_cast %215 : vector<128x128xf32> to vector<16x8x128xf32>
    %cst_131 = arith.constant dense<0xFF800000> : vector<16x128xf32>
    %217 = vector.multi_reduction <maximumf>, %216, %cst_131 [1] : vector<16x8x128xf32> to vector<16x128xf32>
    %218 = arith.mulf %217, %19 : vector<16x128xf32>
    %c1_132 = arith.constant 1 : index
    %c0_133 = arith.constant 0 : index
    %c0_134 = arith.constant 0 : index
    %219 = vector.load %arg22[%c1_132, %c0_133, %c0_134] : memref<2x128x128xbf16, #tpu.memory_space<vmem>>, vector<1x128x128xbf16>
    %220 = vector.shape_cast %219 : vector<1x128x128xbf16> to vector<128x128xbf16>
    %221 = arith.truncf %189 : vector<16x128xf32> to vector<16x128xbf16>
    %cst_135 = arith.constant dense<0.000000e+00> : vector<16x128xf32>
    %222 = tpu.matmul %221, %220, %cst_135 {dimension_numbers = #tpu.dot_dimension_numbers<[1], [0], [0], [1], [0, 0, 1, 1], [], []>} : vector<16x128xbf16>, vector<128x128xbf16>, vector<16x128xf32> -> vector<16x128xf32>
    %c1_136 = arith.constant 1 : index
    %c0_137 = arith.constant 0 : index
    %c0_138 = arith.constant 0 : index
    %223 = vector.load %arg23[%c1_136, %c0_137, %c0_138] : memref<2x1x128xf32, #tpu.memory_space<vmem>>, vector<1x1x128xf32>
    %224 = vector.shape_cast %223 : vector<1x1x128xf32> to vector<1x128xf32>
    %225 = vector.broadcast %224 : vector<1x128xf32> to vector<16x128xf32>
    %226 = arith.addf %222, %225 : vector<16x128xf32>
    %cst_139 = arith.constant 0.000000e+00 : f32
    %227 = vector.broadcast %cst_139 : f32 to vector<16x128xf32>
    %228 = arith.maximumf %226, %227 : vector<16x128xf32>
    %c1_140 = arith.constant 1 : index
    %c0_141 = arith.constant 0 : index
    %c0_142 = arith.constant 0 : index
    %229 = vector.load %arg24[%c1_140, %c0_141, %c0_142] : memref<2x128x128xbf16, #tpu.memory_space<vmem>>, vector<1x128x128xbf16>
    %230 = vector.shape_cast %229 : vector<1x128x128xbf16> to vector<128x128xbf16>
    %231 = arith.truncf %228 : vector<16x128xf32> to vector<16x128xbf16>
    %cst_143 = arith.constant dense<0.000000e+00> : vector<16x128xf32>
    %232 = tpu.matmul %231, %230, %cst_143 {dimension_numbers = #tpu.dot_dimension_numbers<[1], [0], [0], [1], [0, 0, 1, 1], [], []>} : vector<16x128xbf16>, vector<128x128xbf16>, vector<16x128xf32> -> vector<16x128xf32>
    %c1_144 = arith.constant 1 : index
    %c0_145 = arith.constant 0 : index
    %c0_146 = arith.constant 0 : index
    %233 = vector.load %arg25[%c1_144, %c0_145, %c0_146] : memref<2x1x128xf32, #tpu.memory_space<vmem>>, vector<1x1x128xf32>
    %234 = vector.shape_cast %233 : vector<1x1x128xf32> to vector<1x128xf32>
    %235 = vector.broadcast %234 : vector<1x128xf32> to vector<16x128xf32>
    %236 = arith.addf %232, %235 : vector<16x128xf32>
    %237 = arith.addf %161, %218 : vector<16x128xf32>
    %238 = arith.addf %237, %236 : vector<16x128xf32>
    %c0_147 = arith.constant 0 : index
    %c0_148 = arith.constant 0 : index
    %239 = vector.load %arg10[%c0_147, %c0_148] : memref<128x128xbf16, #tpu.memory_space<vmem>>, vector<128x128xbf16>
    %240 = arith.truncf %238 : vector<16x128xf32> to vector<16x128xbf16>
    %cst_149 = arith.constant dense<0.000000e+00> : vector<16x128xf32>
    %241 = tpu.matmul %240, %239, %cst_149 {dimension_numbers = #tpu.dot_dimension_numbers<[1], [0], [0], [1], [0, 0, 1, 1], [], []>} : vector<16x128xbf16>, vector<128x128xbf16>, vector<16x128xf32> -> vector<16x128xf32>
    %c0_150 = arith.constant 0 : index
    %c0_151 = arith.constant 0 : index
    %242 = vector.load %arg11[%c0_150, %c0_151] : memref<1x128xf32, #tpu.memory_space<vmem>>, vector<1x128xf32>
    %243 = vector.broadcast %242 : vector<1x128xf32> to vector<16x128xf32>
    %244 = arith.addf %241, %243 : vector<16x128xf32>
    %c0_152 = arith.constant 0 : index
    %c0_153 = arith.constant 0 : index
    %245 = vector.load %arg7[%c0_152, %c0_153] : memref<16x128xf32, #tpu.memory_space<vmem>>, vector<16x128xf32>
    %c0_154 = arith.constant 0 : index
    %c0_155 = arith.constant 0 : index
    %246 = vector.load %arg30[%c0_154, %c0_155] : memref<128x384xbf16, #tpu.memory_space<vmem>>, vector<128x384xbf16>
    %247 = arith.truncf %244 : vector<16x128xf32> to vector<16x128xbf16>
    %cst_156 = arith.constant dense<0.000000e+00> : vector<16x384xf32>
    %248 = tpu.matmul %247, %246, %cst_156 {dimension_numbers = #tpu.dot_dimension_numbers<[1], [0], [0], [1], [0, 0, 1, 1], [], []>} : vector<16x128xbf16>, vector<128x384xbf16>, vector<16x384xf32> -> vector<16x384xf32>
    %c0_157 = arith.constant 0 : index
    %c0_158 = arith.constant 0 : index
    %249 = vector.load %arg33[%c0_157, %c0_158] : memref<1x384xf32, #tpu.memory_space<vmem>>, vector<1x384xf32>
    %250 = vector.broadcast %249 : vector<1x384xf32> to vector<16x384xf32>
    %251 = arith.addf %248, %250 : vector<16x384xf32>
    %c0_159 = arith.constant 0 : index
    %c0_160 = arith.constant 0 : index
    %252 = vector.load %arg31[%c0_159, %c0_160] : memref<128x256xbf16, #tpu.memory_space<vmem>>, vector<128x256xbf16>
    %253 = arith.truncf %245 : vector<16x128xf32> to vector<16x128xbf16>
    %cst_161 = arith.constant dense<0.000000e+00> : vector<16x256xf32>
    %254 = tpu.matmul %253, %252, %cst_161 {dimension_numbers = #tpu.dot_dimension_numbers<[1], [0], [0], [1], [0, 0, 1, 1], [], []>} : vector<16x128xbf16>, vector<128x256xbf16>, vector<16x256xf32> -> vector<16x256xf32>
    %255 = vector.extract_strided_slice %251 {offsets = [0, 0], sizes = [16, 128], strides = [1, 1]} : vector<16x384xf32> to vector<16x128xf32>
    %256 = vector.extract_strided_slice %254 {offsets = [0, 0], sizes = [16, 128], strides = [1, 1]} : vector<16x256xf32> to vector<16x128xf32>
    %257 = arith.addf %255, %256 : vector<16x128xf32>
    %258 = arith.negf %257 : vector<16x128xf32>
    %259 = math.exp %258 : vector<16x128xf32>
    %cst_162 = arith.constant 1.000000e+00 : f32
    %260 = vector.broadcast %cst_162 : f32 to vector<16x128xf32>
    %261 = arith.addf %260, %259 : vector<16x128xf32>
    %262 = arith.divf %260, %261 : vector<16x128xf32>
    %263 = vector.extract_strided_slice %251 {offsets = [0, 128], sizes = [16, 128], strides = [1, 1]} : vector<16x384xf32> to vector<16x128xf32>
    %264 = vector.extract_strided_slice %254 {offsets = [0, 128], sizes = [16, 128], strides = [1, 1]} : vector<16x256xf32> to vector<16x128xf32>
    %265 = arith.addf %263, %264 : vector<16x128xf32>
    %266 = arith.negf %265 : vector<16x128xf32>
    %267 = math.exp %266 : vector<16x128xf32>
    %cst_163 = arith.constant 1.000000e+00 : f32
    %268 = vector.broadcast %cst_163 : f32 to vector<16x128xf32>
    %269 = arith.addf %268, %267 : vector<16x128xf32>
    %270 = arith.divf %268, %269 : vector<16x128xf32>
    %271 = vector.extract_strided_slice %251 {offsets = [0, 256], sizes = [16, 128], strides = [1, 1]} : vector<16x384xf32> to vector<16x128xf32>
    %272 = arith.mulf %245, %270 : vector<16x128xf32>
    %c0_164 = arith.constant 0 : index
    %c0_165 = arith.constant 0 : index
    %273 = vector.load %arg32[%c0_164, %c0_165] : memref<128x128xbf16, #tpu.memory_space<vmem>>, vector<128x128xbf16>
    %274 = arith.truncf %272 : vector<16x128xf32> to vector<16x128xbf16>
    %cst_166 = arith.constant dense<0.000000e+00> : vector<16x128xf32>
    %275 = tpu.matmul %274, %273, %cst_166 {dimension_numbers = #tpu.dot_dimension_numbers<[1], [0], [0], [1], [0, 0, 1, 1], [], []>} : vector<16x128xbf16>, vector<128x128xbf16>, vector<16x128xf32> -> vector<16x128xf32>
    %276 = arith.addf %271, %275 : vector<16x128xf32>
    %cst_167 = arith.constant 0.000000e+00 : f32
    %277 = vector.broadcast %cst_167 : f32 to vector<16x128xf32>
    %278 = arith.maximumf %276, %277 : vector<16x128xf32>
    %279 = arith.mulf %262, %245 : vector<16x128xf32>
    %cst_168 = arith.constant 1.000000e+00 : f32
    %280 = vector.broadcast %cst_168 : f32 to vector<16x128xf32>
    %281 = arith.subf %280, %262 : vector<16x128xf32>
    %282 = arith.mulf %281, %278 : vector<16x128xf32>
    %283 = arith.addf %279, %282 : vector<16x128xf32>
    %c0_169 = arith.constant 0 : index
    %c0_170 = arith.constant 0 : index
    %284 = vector.load %arg34[%c0_169, %c0_170] : memref<16x128xf32, #tpu.memory_space<vmem>>, vector<16x128xf32>
    tpu.vector_store %arg34[%c0_169, %c0_170], %283 {strides = array<i32>} : memref<16x128xf32, #tpu.memory_space<vmem>>, vector<16x128xf32>,
    return
  }
}

</mosaic_0001>

<bundles_post_ra>
// kernel: tpu_custom_call.1
= control target key start
LH: loop header
LB: loop body
LE: loop exit
PB: predicated region body
PF: predicated region fallthrough
CT: control target
= control target key end

     0   :  { %s7585_s6 = smov 1   ;;  %s7586_s10 = smov 2   ;;  %s9224_s0 = inlined_call_operand.smem [shape: u32[35], index: -1, kind: input, shape index: {}] }
   0x1   :  { %s7657_s5 = sld [smem:[%s9224_s0]]   ;;  %s7587_s14 = smov 3  }
   0x2   :  { %s7662_s9 = sld [smem:[%s9224_s0 + %s7585_s6]]   ;;  %s7588_s18 = smov 4  }
   0x3   :  { %s7667_s13 = sld [smem:[%s9224_s0 + %s7586_s10]]   ;;  %s7589_s22 = smov 5  }
   0x4   :  { %s7672_s17 = sld [smem:[%s9224_s0 + %s7587_s14]]   ;;  %s7590_s26 = smov 6  }
   0x5   :  { %s7677_s21 = sld [smem:[%s9224_s0 + %s7588_s18]]   ;;  %s7591_s30 = smov 7  }
   0x6   :  { %s7682_s25 = sld [smem:[%s9224_s0 + %s7589_s22]]   ;;  %s7592_s4 = smov 8  }
   0x7   :  { %9289 = sst [smem:[#allocation43_spill]] %s7657_s5  ;;  %s7593_s10 = smov 9  }
   0x8   :  { %9290 = sst [smem:[#allocation44_spill]] %s7662_s9  ;;  %s7594_s15 = smov 10  }
   0x9   :  { %9291 = sst [smem:[#allocation45_spill]] %s7667_s13  ;;  %s7595_s20 = smov 11  }
   0xa   :  { %9292 = sst [smem:[#allocation46_spill]] %s7672_s17  ;;  %s7597_s1 = smov 13  }
   0xb   :  { %9293 = sst [smem:[#allocation47_spill]] %s7677_s21  ;;  %s7598_s7 = smov 14  }
   0xc   :  { %9294 = sst [smem:[#allocation48_spill]] %s7682_s25  ;;  %s7600_s22 = smov 16  }
   0xd   :  { %s7687_s29 = sld [smem:[%s9224_s0 + %s7590_s26]]   ;;  %s7596_s26 = smov 12  }
   0xe   :  { %s7692_s3 = sld [smem:[%s9224_s0 + %s7591_s30]]   ;;  %s7601_s28 = smov 17  }
   0xf   :  { %s7697_s8 = sld [smem:[%s9224_s0 + %s7592_s4]]  }
  0x10   :  { %s7702_s14 = sld [smem:[%s9224_s0 + %s7593_s10]]  }
  0x11   :  { %s7707_s19 = sld [smem:[%s9224_s0 + %s7594_s15]]   ;;  %s7599_s15 = smov 15  }
  0x12   :  { %s7712_s24 = sld [smem:[%s9224_s0 + %s7595_s20]]  }
  0x13   :  { %9295 = sst [smem:[#allocation49_spill]] %s7687_s29 }
  0x14   :  { %s7717_s30 = sld [smem:[%s9224_s0 + %s7596_s26]]  }
  0x15   :  { %9296 = sst [smem:[#allocation50_spill]] %s7697_s8 }
  0x16   :  { %s7722_s6 = sld [smem:[%s9224_s0 + %s7597_s1]]  }
  0x17   :  { %s7727_s12 = sld [smem:[%s9224_s0 + %s7598_s7]]   ;;  %s7602_s7 = smov 18  }
  0x18   :  { %s7732_s20 = sld [smem:[%s9224_s0 + %s7599_s15]]   ;;  %s7603_s15 = smov 19  }
  0x19   :  { %s7737_s27 = sld [smem:[%s9224_s0 + %s7600_s22]]   ;;  %s7604_s22 = smov 20  }
  0x1a   :  { %s7742_s4 = sld [smem:[%s9224_s0 + %s7601_s28]]   ;;  %s7605_s28 = smov 21  }
  0x1b   :  { %s7747_s25 = sld [smem:[%s9224_s0 + %s7602_s7]]   ;;  %s7606_s7 = smov 22  }
  0x1c   :  { %s7752_s29 = sld [smem:[%s9224_s0 + %s7603_s15]]   ;;  %s7607_s15 = smov 23  }
  0x1d   :  { %s7757_s21 = sld [smem:[%s9224_s0 + %s7604_s22]]   ;;  %s7608_s22 = smov 24  }
  0x1e   :  { %s7762_s17 = sld [smem:[%s9224_s0 + %s7605_s28]]   ;;  %s7609_s28 = smov 25  }
  0x1f   :  { %s7772_s13 = sld [smem:[%s9224_s0 + %s7607_s15]]   ;;  %s7611_s15 = smov 27  }
  0x20   :  { %s7777_s5 = sld [smem:[%s9224_s0 + %s7608_s22]]   ;;  %s7612_s22 = smov 28  }
  0x21   :  { %9297 = sst [smem:[#allocation51_spill]] %s7747_s25 }
  0x22   :  { %s7767_s25 = sld [smem:[%s9224_s0 + %s7606_s7]]   ;;  %s7610_s7 = smov 26  }
  0x23   :  { %s7787_s8 = sld [smem:[%s9224_s0 + %s7610_s7]]   ;;  %s7614_s7 = smov 30  }
  0x24   :  { %9298 = sst [smem:[#allocation52_spill]] %s7762_s17 }
  0x25   :  { %9300 = sst [smem:[#allocation54_spill]] %s7772_s13 }
  0x26   :  { %s7782_s17 = sld [smem:[%s9224_s0 + %s7609_s28]]   ;;  %s7613_s28 = smov 29  }
  0x27   :  { %s7792_s13 = sld [smem:[%s9224_s0 + %s7611_s15]]   ;;  %s7615_s15 = smov 31  }
  0x28   :  { %9299 = sst [smem:[#allocation53_spill]] %s7767_s25 }
  0x29   :  { %9302 = sst [smem:[#allocation56_spill]] %s7787_s8 }
  0x2a   :  { %s7797_s9 = sld [smem:[%s9224_s0 + %s7612_s22]]   ;;  %s7616_s22 = smov 32  }
  0x2b   :  { %s7807_s8 = sld [smem:[%s9224_s0 + %s7614_s7]]   ;;  %s7618_s7 = smov 34  }
  0x2c   :  { %9301 = sst [smem:[#allocation55_spill]] %s7782_s17 }
  0x2d   :  { %9303 = sst [smem:[#allocation57_spill]] %s7792_s13 }
  0x2e   :  { %s7802_s17 = sld [smem:[%s9224_s0 + %s7613_s28]]   ;;  %s7617_s28 = smov 33  }
  0x2f   :  { %s7812_s13 = sld [smem:[%s9224_s0 + %s7615_s15]]  }
  0x30   :  { %9304 = sst [smem:[#allocation58_spill]] %s7797_s9 }
  0x31   :  { %s7817_s9 = sld [smem:[%s9224_s0 + %s7616_s22]]  }
  0x32   :  { %s7827_s25 = sld [smem:[%s9224_s0 + %s7618_s7]]  }
  0x34   :  { %9305 = sst [smem:[#allocation59_spill]] %s7802_s17 }
  0x35   :  { %s7822_s17 = sld [smem:[%s9224_s0 + %s7617_s28]]  }
  0x36   :  { %74 = vsyncpa [#allocation3], 0 }
  0x37   :  { %75 = vsyncpa [#allocation6], 0 }
  0x38   :  { %76 = vsyncpa [#allocation9], 0 }
  0x39   :  { %77 = vsyncpa [#allocation12], 0 }
  0x3a   :  { %78 = vsyncpa [#allocation15], 0 }
  0x3b   :  { %79 = vsyncpa [#allocation18], 0 }
  0x3c   :  { %80 = vsyncpa [#allocation21], 0 }
  0x3d   :  { %81 = vsyncpa [#allocation24], 0 }
  0x3e   :  { %82 = vsyncpa [#allocation27], 0 }
  0x3f   :  { %83 = vsyncpa [#allocation30], 0 }
  0x40   :  { %84 = vsyncpa [#allocation4], 0  ;;  %s7619_s15 = smov [#allocation5]   ;;  %s7620_s18 = smov [#allocation8]  }
  0x41   :  { %s119_s16 = sshll.u32 %s7619_s15, 4  ;;  %s141_s22 = sshll.u32 %s7620_s18, 4  ;;  %s120_s16 = int_to_ptr.vmem [resolvable:$true] %s119_s16  ;;  %s142_s22 = int_to_ptr.vmem [resolvable:$true] %s141_s22 }
  0x42   :  { %s7145_s0 = scalar_lea.hbm %s7702_s14, 16 }
  0x43   :  { %p7146_p0 = scmp.ne.s32.totalorder %s7702_s14, %s7145_s0  ;;  %p7149_p1 = scmp.lt.u32.totalorder %s7145_s0, %s7702_s14 }
  0x45   :  { %p7151_p2 = pnand %p7149_p1, %p7146_p0 }
  0x47   :  { %7154 = shalt.err (!%p7151_p2)
}
  0x48   :  { %s7155_s23 = scalar_lea.vmem %s120_s16, 16  ;;  %s7159_s26 = scalar_lea.vmem %s120_s16, 32 }
  0x49   :  { %p7156_p3 = scmp.ne.s32.totalorder %s120_s16, %s7155_s23  ;;  %p7160_p4 = scmp.lt.s32.totalorder %s120_s16, %s120_s16 }
  0x4a   :  { %p7161_p5 = scmp.lt.s32.totalorder %s7159_s26, %s7155_s23 }
  0x4c   :  { %p7162_p6 = por %p7161_p5, %p7160_p4 }
  0x4e   :  { %p7163_p7 = pnand %p7162_p6, %p7156_p3 }
  0x50   :  { %7166 = shalt.err (!%p7163_p7)
}
  0x51   :  { %122 = dma.hbm_to_vmem [thread:$0]  %s7702_s14, 16, %s120_s16, [#allocation6]  }
  0x52   :  { %s7167_s28 = scalar_lea.hbm %s7712_s24, 16 }
  0x53   :  { %p7168_p8 = scmp.ne.s32.totalorder %s7712_s24, %s7167_s28  ;;  %p7171_p9 = scmp.lt.u32.totalorder %s7167_s28, %s7712_s24 }
  0x55   :  { %p7173_p10 = pnand %p7171_p9, %p7168_p8 }
  0x57   :  { %7176 = shalt.err (!%p7173_p10)
}
  0x58   :  { %s7177_s1 = scalar_lea.vmem %s142_s22, 16  ;;  %s7181_s2 = scalar_lea.vmem %s142_s22, 32 }
  0x59   :  { %p7178_p11 = scmp.ne.s32.totalorder %s142_s22, %s7177_s1  ;;  %p7182_p12 = scmp.lt.s32.totalorder %s142_s22, %s142_s22 }
  0x5a   :  { %p7183_p13 = scmp.lt.s32.totalorder %s7181_s2, %s7177_s1 }
  0x5c   :  { %p7184_p0 = por %p7183_p13, %p7182_p12 }
  0x5e   :  { %p7185_p1 = pnand %p7184_p0, %p7178_p11 }
  0x60   :  { %7188 = shalt.err (!%p7185_p1)
}
  0x61   :  { %144 = dma.hbm_to_vmem [thread:$0]  %s7712_s24, 16, %s142_s22, [#allocation9]  }
  0x62   :  { %s7621_s7 = smov [#allocation11]   ;;  %s7622_s10 = smov [#allocation14]  }
  0x63   :  { %s162_s14 = sshll.u32 %s7621_s7, 4  ;;  %s185_s11 = sshll.u32 %s7622_s10, 4  ;;  %s163_s14 = int_to_ptr.vmem [resolvable:$true] %s162_s14  ;;  %s186_s11 = int_to_ptr.vmem [resolvable:$true] %s185_s11 }
  0x64   :  { %s7189_s15 = scalar_lea.hbm %s7722_s6, 32 }
  0x65   :  { %p7190_p2 = scmp.ne.s32.totalorder %s7722_s6, %s7189_s15  ;;  %p7193_p3 = scmp.lt.u32.totalorder %s7189_s15, %s7722_s6 }
  0x67   :  { %p7195_p4 = pnand %p7193_p3, %p7190_p2 }
  0x69   :  { %7198 = shalt.err (!%p7195_p4)
}
  0x6a   :  { %s7199_s16 = scalar_lea.vmem %s163_s14, 32  ;;  %p7204_p6 = scmp.lt.s32.totalorder %s163_s14, %s163_s14 }
  0x6b   :  { %p7200_p5 = scmp.ne.s32.totalorder %s163_s14, %s7199_s16  ;;  %p7205_p7 = scmp.lt.s32.totalorder %s7199_s16, %s7199_s16 }
  0x6d   :  { %p7206_p8 = por %p7205_p7, %p7204_p6 }
  0x6f   :  { %p7207_p9 = pnand %p7206_p8, %p7200_p5 }
  0x71   :  { %7210 = shalt.err (!%p7207_p9)
}
  0x72   :  { %s7623_s18 = smov 16   ;;  %s7624_s24 = smov 1  }
  0x73   :  { %168 = dma.hbm_to_vmem [thread:$0]  %s7722_s6, 32, %s163_s14, [#allocation12], %s7623_s18, %s7623_s18, %s7624_s24  }
  0x74   :  { %s7211_s22 = scalar_lea.hbm %s7732_s20, 32 }
  0x75   :  { %p7212_p10 = scmp.ne.s32.totalorder %s7732_s20, %s7211_s22  ;;  %p7215_p11 = scmp.lt.u32.totalorder %s7211_s22, %s7732_s20 }
  0x77   :  { %p7217_p12 = pnand %p7215_p11, %p7212_p10 }
  0x79   :  { %7220 = shalt.err (!%p7217_p12)
}
  0x7a   :  { %s7221_s0 = scalar_lea.vmem %s186_s11, 32  ;;  %p7226_p0 = scmp.lt.s32.totalorder %s186_s11, %s186_s11 }
  0x7b   :  { %p7222_p13 = scmp.ne.s32.totalorder %s186_s11, %s7221_s0  ;;  %p7227_p1 = scmp.lt.s32.totalorder %s7221_s0, %s7221_s0 }
  0x7d   :  { %p7228_p2 = por %p7227_p1, %p7226_p0 }
  0x7f   :  { %p7229_p3 = pnand %p7228_p2, %p7222_p13 }
  0x81   :  { %7232 = shalt.err (!%p7229_p3)
}
  0x82   :  { %188 = dma.hbm_to_vmem [thread:$0]  %s7732_s20, 32, %s186_s11, [#allocation15]  }
  0x83   :  { %s7625_s23 = smov [#allocation17]   ;;  %s7233_s6 = scalar_lea.hbm %s7742_s4, 32 }
  0x84   :  { %s206_s26 = sshll.u32 %s7625_s23, 4  ;;  %p7234_p4 = scmp.ne.s32.totalorder %s7742_s4, %s7233_s6  ;;  %s207_s26 = int_to_ptr.vmem [resolvable:$true] %s206_s26 }
  0x85   :  { %p7237_p5 = scmp.lt.u32.totalorder %s7233_s6, %s7742_s4 }
  0x87   :  { %p7239_p6 = pnand %p7237_p5, %p7234_p4 }
  0x89   :  { %7242 = shalt.err (!%p7239_p6)
}
  0x8a   :  { %s7243_s28 = scalar_lea.vmem %s207_s26, 32  ;;  %p7248_p8 = scmp.lt.s32.totalorder %s207_s26, %s207_s26 }
  0x8b   :  { %p7244_p7 = scmp.ne.s32.totalorder %s207_s26, %s7243_s28  ;;  %p7249_p9 = scmp.lt.s32.totalorder %s7243_s28, %s7243_s28 }
  0x8d   :  { %p7250_p10 = por %p7249_p9, %p7248_p8 }
  0x8f   :  { %p7251_p11 = pnand %p7250_p10, %p7244_p7 }
  0x91   :  { %7254 = shalt.err (!%p7251_p11)
}
  0x92   :  { %212 = dma.hbm_to_vmem [thread:$0]  %s7742_s4, 32, %s207_s26, [#allocation18], %s7623_s18, %s7623_s18, %s7624_s24  }
  0x93   :  { %s7626_s20 = smov [#allocation20]   ;;  %s7627_s2 = smov [#allocation23]  }
  0x94   :  { %s232_s1 = sshll.u32 %s7626_s20, 4  ;;  %s260_s7 = sshll.u32 %s7627_s2, 4  ;;  %s233_s1 = int_to_ptr.vmem [resolvable:$true] %s232_s1  ;;  %s261_s7 = int_to_ptr.vmem [resolvable:$true] %s260_s7 }
  0x95   :  { %s7255_s14 = scalar_lea.hbm %s7757_s21, 2048 }
  0x96   :  { %p7256_p12 = scmp.ne.s32.totalorder %s7757_s21, %s7255_s14  ;;  %p7259_p13 = scmp.lt.u32.totalorder %s7255_s14, %s7757_s21 }
  0x98   :  { %p7261_p0 = pnand %p7259_p13, %p7256_p12 }
  0x9a   :  { %7264 = shalt.err (!%p7261_p0)
}
  0x9b   :  { %s7265_s10 = scalar_lea.vmem %s233_s1, 2048  ;;  %p7270_p2 = scmp.lt.s32.totalorder %s233_s1, %s233_s1 }
  0x9c   :  { %p7266_p1 = scmp.ne.s32.totalorder %s233_s1, %s7265_s10  ;;  %p7271_p3 = scmp.lt.s32.totalorder %s7265_s10, %s7265_s10 }
  0x9e   :  { %p7272_p4 = por %p7271_p3, %p7270_p2 }
  0xa0   :  { %p7273_p5 = pnand %p7272_p4, %p7266_p1 }
  0xa2   :  { %7276 = shalt.err (!%p7273_p5)
}
  0xa3   :  { %s7628_s11 = smov 64   ;;  %s7629_s4 = smov 4  }
  0xa4   :  { %238 = dma.hbm_to_vmem [thread:$0]  %s7757_s21, 2048, %s233_s1, [#allocation21], %s7628_s11, %s7628_s11, %s7629_s4  }
  0xa5   :  { %s7277_s15 = scalar_lea.hbm %s7777_s5, 2048 }
  0xa6   :  { %p7278_p6 = scmp.ne.s32.totalorder %s7777_s5, %s7277_s15  ;;  %p7281_p7 = scmp.lt.u32.totalorder %s7277_s15, %s7777_s5 }
  0xa8   :  { %p7283_p8 = pnand %p7281_p7, %p7278_p6 }
  0xaa   :  { %7286 = shalt.err (!%p7283_p8)
}
  0xab   :  { %s7287_s16 = scalar_lea.vmem %s261_s7, 2048  ;;  %p7292_p10 = scmp.lt.s32.totalorder %s261_s7, %s261_s7 }
  0xac   :  { %p7288_p9 = scmp.ne.s32.totalorder %s261_s7, %s7287_s16  ;;  %p7293_p11 = scmp.lt.s32.totalorder %s7287_s16, %s7287_s16 }
  0xae   :  { %p7294_p12 = por %p7293_p11, %p7292_p10 }
  0xb0   :  { %p7295_p13 = pnand %p7294_p12, %p7288_p9 }
  0xb2   :  { %7298 = shalt.err (!%p7295_p13)
}
  0xb3   :  { %266 = dma.hbm_to_vmem [thread:$0]  %s7777_s5, 2048, %s261_s7, [#allocation24], %s7628_s11, %s7628_s11, %s7629_s4  }
  0xb4   :  { %s7630_s21 = smov [#allocation26]   ;;  %s7299_s0 = scalar_lea.hbm %s7807_s8, 3072 }
  0xb5   :  { %s292_s22 = sshll.u32 %s7630_s21, 4  ;;  %p7300_p0 = scmp.ne.s32.totalorder %s7807_s8, %s7299_s0  ;;  %s293_s22 = int_to_ptr.vmem [resolvable:$true] %s292_s22 }
  0xb6   :  { %p7303_p1 = scmp.lt.u32.totalorder %s7299_s0, %s7807_s8 }
  0xb8   :  { %p7305_p2 = pnand %p7303_p1, %p7300_p0 }
  0xba   :  { %7308 = shalt.err (!%p7305_p2)
}
  0xbb   :  { %s7309_s23 = scalar_lea.vmem %s293_s22, 3072  ;;  %p7314_p4 = scmp.lt.s32.totalorder %s293_s22, %s293_s22 }
  0xbc   :  { %p7310_p3 = scmp.ne.s32.totalorder %s293_s22, %s7309_s23  ;;  %p7315_p5 = scmp.lt.s32.totalorder %s7309_s23, %s7309_s23 }
  0xbe   :  { %p7316_p6 = por %p7315_p5, %p7314_p4 }
  0xc0   :  { %p7317_p7 = pnand %p7316_p6, %p7310_p3 }
  0xc2   :  { %7320 = shalt.err (!%p7317_p7)
}
  0xc3   :  { %s7631_s26 = smov 192   ;;  %s7632_s5 = smov 12  }
  0xc4   :  { %298 = dma.hbm_to_vmem [thread:$0]  %s7807_s8, 3072, %s293_s22, [#allocation27], %s7631_s26, %s7631_s26, %s7632_s5  }
  0xc5   :  { %s7633_s6 = smov [#allocation2]   ;;  %s7321_s20 = scalar_lea.hbm %s7692_s3, 256 }
  0xc6   :  { %s104_s28 = sshll.u32 %s7633_s6, 4  ;;  %p7322_p8 = scmp.ne.s32.totalorder %s7692_s3, %s7321_s20  ;;  %s105_s28 = int_to_ptr.vmem [resolvable:$true] %s104_s28 }
  0xc7   :  { %p7325_p9 = scmp.lt.u32.totalorder %s7321_s20, %s7692_s3 }
  0xc9   :  { %p7327_p10 = pnand %p7325_p9, %p7322_p8 }
  0xcb   :  { %7330 = shalt.err (!%p7327_p10)
}
  0xcc   :  { %s7331_s1 = scalar_lea.vmem %s105_s28, 256  ;;  %p7336_p12 = scmp.lt.s32.totalorder %s105_s28, %s105_s28 }
  0xcd   :  { %p7332_p11 = scmp.ne.s32.totalorder %s105_s28, %s7331_s1  ;;  %p7337_p13 = scmp.lt.s32.totalorder %s7331_s1, %s7331_s1 }
  0xcf   :  { %p7338_p0 = por %p7337_p13, %p7336_p12 }
  0xd1   :  { %p7339_p1 = pnand %p7338_p0, %p7332_p11 }
  0xd3   :  { %7342 = shalt.err (!%p7339_p1)
}
  0xd4   :  { %s7634_s2 = smov 128   ;;  %s7635_s8 = smov 8  }
  0xd5   :  { %110 = dma.hbm_to_vmem [thread:$0]  %s7692_s3, 256, %s105_s28, [#allocation3], %s7634_s2, %s7634_s2, %s7635_s8  }
  0xd6   :  { %s7636_s7 = smov [#allocation7]   ;;  %s7637_s10 = smov [#allocation10]  }
  0xd7   :  { %s128_s14 = sshll.u32 %s7636_s7, 4  ;;  %s150_s15 = sshll.u32 %s7637_s10, 4  ;;  %s129_s14 = int_to_ptr.vmem [resolvable:$true] %s128_s14  ;;  %s151_s15 = int_to_ptr.vmem [resolvable:$true] %s150_s15 }
  0xd8   :  { %s7343_s16 = scalar_lea.hbm %s7707_s19, 1024 }
  0xd9   :  { %p7344_p2 = scmp.ne.s32.totalorder %s7707_s19, %s7343_s16  ;;  %p7347_p3 = scmp.lt.u32.totalorder %s7343_s16, %s7707_s19 }
  0xdb   :  { %p7349_p4 = pnand %p7347_p3, %p7344_p2 }
  0xdd   :  { %7352 = shalt.err (!%p7349_p4)
}
  0xde   :  { %s7353_s21 = scalar_lea.vmem %s129_s14, 1024  ;;  %p7358_p6 = scmp.lt.s32.totalorder %s129_s14, %s129_s14 }
  0xdf   :  { %p7354_p5 = scmp.ne.s32.totalorder %s129_s14, %s7353_s21  ;;  %p7359_p7 = scmp.lt.s32.totalorder %s7353_s21, %s7353_s21 }
  0xe1   :  { %p7360_p8 = por %p7359_p7, %p7358_p6 }
  0xe3   :  { %p7361_p9 = pnand %p7360_p8, %p7354_p5 }
  0xe5   :  { %7364 = shalt.err (!%p7361_p9)
}
  0xe6   :  { %134 = dma.hbm_to_vmem [thread:$0]  %s7707_s19, 1024, %s129_s14, [#allocation6], %s7628_s11, %s7628_s11, %s7629_s4  }
  0xe7   :  { %s7365_s3 = scalar_lea.hbm %s7717_s30, 32 }
  0xe8   :  { %p7366_p10 = scmp.ne.s32.totalorder %s7717_s30, %s7365_s3  ;;  %p7369_p11 = scmp.lt.u32.totalorder %s7365_s3, %s7717_s30 }
  0xea   :  { %p7371_p12 = pnand %p7369_p11, %p7366_p10 }
  0xec   :  { %7374 = shalt.err (!%p7371_p12)
}
  0xed   :  { %s7375_s22 = scalar_lea.vmem %s151_s15, 32  ;;  %p7380_p0 = scmp.lt.s32.totalorder %s151_s15, %s151_s15 }
  0xee   :  { %p7376_p13 = scmp.ne.s32.totalorder %s151_s15, %s7375_s22  ;;  %p7381_p1 = scmp.lt.s32.totalorder %s7375_s22, %s7375_s22 }
  0xf0   :  { %p7382_p2 = por %p7381_p1, %p7380_p0 }
  0xf2   :  { %p7383_p3 = pnand %p7382_p2, %p7376_p13 }
  0xf4   :  { %7386 = shalt.err (!%p7383_p3)
}
  0xf5   :  { %156 = dma.hbm_to_vmem [thread:$0]  %s7717_s30, 32, %s151_s15, [#allocation9], %s7623_s18, %s7623_s18, %s7624_s24  }
  0xf6   :  { %s7638_s19 = smov [#allocation13]   ;;  %s7639_s23 = smov [#allocation16]  }
  0xf7   :  { %s175_s0 = sshll.u32 %s7638_s19, 4  ;;  %s194_s26 = sshll.u32 %s7639_s23, 4  ;;  %s176_s0 = int_to_ptr.vmem [resolvable:$true] %s175_s0  ;;  %s195_s26 = int_to_ptr.vmem [resolvable:$true] %s194_s26 }
  0xf8   :  { %s7387_s5 = scalar_lea.hbm %s7727_s12, 128 }
  0xf9   :  { %p7388_p4 = scmp.ne.s32.totalorder %s7727_s12, %s7387_s5  ;;  %p7391_p5 = scmp.lt.u32.totalorder %s7387_s5, %s7727_s12 }
  0xfb   :  { %p7393_p6 = pnand %p7391_p5, %p7388_p4 }
  0xfd   :  { %7396 = shalt.err (!%p7393_p6)
}
  0xfe   :  { %s7397_s6 = scalar_lea.vmem %s176_s0, 128  ;;  %p7402_p8 = scmp.lt.s32.totalorder %s176_s0, %s176_s0 }
  0xff   :  { %p7398_p7 = scmp.ne.s32.totalorder %s176_s0, %s7397_s6  ;;  %p7403_p9 = scmp.lt.s32.totalorder %s7397_s6, %s7397_s6 }
 0x101   :  { %p7404_p10 = por %p7403_p9, %p7402_p8 }
 0x103   :  { %p7405_p11 = pnand %p7404_p10, %p7398_p7 }
 0x105   :  { %7408 = shalt.err (!%p7405_p11)
}
 0x106   :  { %178 = dma.hbm_to_vmem [thread:$0]  %s7727_s12, 128, %s176_s0, [#allocation12]  }
 0x107   :  { %s7409_s30 = scalar_lea.hbm %s7737_s27, 2048 }
 0x108   :  { %p7410_p12 = scmp.ne.s32.totalorder %s7737_s27, %s7409_s30  ;;  %p7413_p13 = scmp.lt.u32.totalorder %s7409_s30, %s7737_s27 }
 0x10a   :  { %p7415_p0 = pnand %p7413_p13, %p7410_p12 }
 0x10c   :  { %7418 = shalt.err (!%p7415_p0)
}
 0x10d   :  { %s7419_s28 = scalar_lea.vmem %s195_s26, 2048  ;;  %p7424_p2 = scmp.lt.s32.totalorder %s195_s26, %s195_s26 }
 0x10e   :  { %p7420_p1 = scmp.ne.s32.totalorder %s195_s26, %s7419_s28  ;;  %p7425_p3 = scmp.lt.s32.totalorder %s7419_s28, %s7419_s28 }
 0x110   :  { %p7426_p4 = por %p7425_p3, %p7424_p2 }
 0x112   :  { %p7427_p5 = pnand %p7426_p4, %p7420_p1 }
 0x114   :  { %7430 = shalt.err (!%p7427_p5)
}
 0x115   :  { %200 = dma.hbm_to_vmem [thread:$0]  %s7737_s27, 2048, %s195_s26, [#allocation15], %s7628_s11, %s7628_s11, %s7629_s4  }
 0x116   :  { %s7640_s12 = smov [#allocation19]   ;;  %s7641_s1 = smov [#allocation22]  }
 0x117   :  { %s220_s20 = sshll.u32 %s7640_s12, 4  ;;  %s246_s7 = sshll.u32 %s7641_s1, 4  ;;  %s221_s20 = int_to_ptr.vmem [resolvable:$true] %s220_s20  ;;  %s247_s7 = int_to_ptr.vmem [resolvable:$true] %s246_s7 }
 0x118   :  { %s7431_s14 = scalar_lea.hbm %s7752_s29, 32 }
 0x119   :  { %p7432_p6 = scmp.ne.s32.totalorder %s7752_s29, %s7431_s14  ;;  %p7435_p7 = scmp.lt.u32.totalorder %s7431_s14, %s7752_s29 }
 0x11b   :  { %p7437_p8 = pnand %p7435_p7, %p7432_p6 }
 0x11d   :  { %7440 = shalt.err (!%p7437_p8)
}
 0x11e   :  { %s7441_s10 = scalar_lea.vmem %s221_s20, 32  ;;  %p7446_p10 = scmp.lt.s32.totalorder %s221_s20, %s221_s20 }
 0x11f   :  { %p7442_p9 = scmp.ne.s32.totalorder %s221_s20, %s7441_s10  ;;  %p7447_p11 = scmp.lt.s32.totalorder %s7441_s10, %s7441_s10 }
 0x121   :  { %p7448_p12 = por %p7447_p11, %p7446_p10 }
 0x123   :  { %p7449_p13 = pnand %p7448_p12, %p7442_p9 }
 0x125   :  { %7452 = shalt.err (!%p7449_p13)
}
 0x126   :  { %s9306_s27 = sld [smem:[#allocation53_spill]] }
 0x127   :  { %226 = dma.hbm_to_vmem [thread:$0]  %s7752_s29, 32, %s221_s20, [#allocation18], %s7623_s18, %s7623_s18, %s7624_s24  }
 0x12c   :  { %s7453_s15 = scalar_lea.hbm %s9306_s27, 2048 }
 0x12d   :  { %p7454_p0 = scmp.ne.s32.totalorder %s9306_s27, %s7453_s15  ;;  %p7457_p1 = scmp.lt.u32.totalorder %s7453_s15, %s9306_s27 }
 0x12f   :  { %p7459_p2 = pnand %p7457_p1, %p7454_p0 }
 0x131   :  { %7462 = shalt.err (!%p7459_p2)
}
 0x132   :  { %s7463_s16 = scalar_lea.vmem %s247_s7, 2048  ;;  %p7468_p4 = scmp.lt.s32.totalorder %s247_s7, %s247_s7 }
 0x133   :  { %p7464_p3 = scmp.ne.s32.totalorder %s247_s7, %s7463_s16  ;;  %p7469_p5 = scmp.lt.s32.totalorder %s7463_s16, %s7463_s16 }
 0x135   :  { %p7470_p6 = por %p7469_p5, %p7468_p4 }
 0x137   :  { %p7471_p7 = pnand %p7470_p6, %p7464_p3 }
 0x139   :  { %7474 = shalt.err (!%p7471_p7)
}
 0x13a   :  { %s9307_s21 = sld [smem:[#allocation58_spill]]  ;;  %s7642_s29 = smov [#allocation25]  }
 0x13b   :  { %252 = dma.hbm_to_vmem [thread:$0]  %s9306_s27, 2048, %s247_s7, [#allocation21], %s7628_s11, %s7628_s11, %s7629_s4  }
 0x13c   :  { %s278_s18 = sshll.u32 %s7642_s29, 4  ;;  %s7643_s24 = smov [#allocation28]   ;;  %s279_s18 = int_to_ptr.vmem [resolvable:$true] %s278_s18 }
 0x13d   :  { %s304_s3 = sshll.u32 %s7643_s24, 4  ;;  %s305_s3 = int_to_ptr.vmem [resolvable:$true] %s304_s3 }
 0x140   :  { %s7475_s22 = scalar_lea.hbm %s9307_s21, 1024 }
 0x141   :  { %p7476_p8 = scmp.ne.s32.totalorder %s9307_s21, %s7475_s22  ;;  %p7479_p9 = scmp.lt.u32.totalorder %s7475_s22, %s9307_s21 }
 0x143   :  { %p7481_p10 = pnand %p7479_p9, %p7476_p8 }
 0x145   :  { %7484 = shalt.err (!%p7481_p10)
}
 0x146   :  { %s7485_s19 = scalar_lea.vmem %s279_s18, 1024  ;;  %p7490_p12 = scmp.lt.s32.totalorder %s279_s18, %s279_s18 }
 0x147   :  { %p7486_p11 = scmp.ne.s32.totalorder %s279_s18, %s7485_s19  ;;  %p7491_p13 = scmp.lt.s32.totalorder %s7485_s19, %s7485_s19 }
 0x149   :  { %p7492_p0 = por %p7491_p13, %p7490_p12 }
 0x14b   :  { %p7493_p1 = pnand %p7492_p0, %p7486_p11 }
 0x14d   :  { %7496 = shalt.err (!%p7493_p1)
}
 0x14e   :  { %284 = dma.hbm_to_vmem [thread:$0]  %s9307_s21, 1024, %s279_s18, [#allocation24], %s7628_s11, %s7628_s11, %s7629_s4  }
 0x14f   :  { %s7497_s0 = scalar_lea.hbm %s7812_s13, 2048 }
 0x150   :  { %p7498_p2 = scmp.ne.s32.totalorder %s7812_s13, %s7497_s0  ;;  %p7501_p3 = scmp.lt.u32.totalorder %s7497_s0, %s7812_s13 }
 0x152   :  { %p7503_p4 = pnand %p7501_p3, %p7498_p2 }
 0x154   :  { %7506 = shalt.err (!%p7503_p4)
}
 0x155   :  { %s7507_s23 = scalar_lea.vmem %s305_s3, 2048  ;;  %p7512_p6 = scmp.lt.s32.totalorder %s305_s3, %s305_s3 }
 0x156   :  { %p7508_p5 = scmp.ne.s32.totalorder %s305_s3, %s7507_s23  ;;  %p7513_p7 = scmp.lt.s32.totalorder %s7507_s23, %s7507_s23 }
 0x158   :  { %p7514_p8 = por %p7513_p7, %p7512_p6 }
 0x15a   :  { %p7515_p9 = pnand %p7514_p8, %p7508_p5 }
 0x15c   :  { %7518 = shalt.err (!%p7515_p9)
}
 0x15d   :  { %310 = dma.hbm_to_vmem [thread:$0]  %s7812_s13, 2048, %s305_s3, [#allocation27], %s7634_s2, %s7634_s2, %s7635_s8  }
 0x15e   :  { %s7644_s26 = smov [#allocation29]   ;;  %s7519_s6 = scalar_lea.hbm %s7817_s9, 1024 }
 0x15f   :  { %s316_s5 = sshll.u32 %s7644_s26, 4  ;;  %p7520_p10 = scmp.ne.s32.totalorder %s7817_s9, %s7519_s6  ;;  %s317_s5 = int_to_ptr.vmem [resolvable:$true] %s316_s5 }
 0x160   :  { %p7523_p11 = scmp.lt.u32.totalorder %s7519_s6, %s7817_s9 }
 0x162   :  { %p7525_p12 = pnand %p7523_p11, %p7520_p10 }
 0x164   :  { %7528 = shalt.err (!%p7525_p12)
}
 0x165   :  { %s7529_s30 = scalar_lea.vmem %s317_s5, 1024  ;;  %p7534_p0 = scmp.lt.s32.totalorder %s317_s5, %s317_s5 }
 0x166   :  { %p7530_p13 = scmp.ne.s32.totalorder %s317_s5, %s7529_s30  ;;  %p7535_p1 = scmp.lt.s32.totalorder %s7529_s30, %s7529_s30 }
 0x168   :  { %p7536_p2 = por %p7535_p1, %p7534_p0 }
 0x16a   :  { %p7537_p3 = pnand %p7536_p2, %p7530_p13 }
 0x16c   :  { %7540 = shalt.err (!%p7537_p3)
}
 0x16d   :  { %322 = dma.hbm_to_vmem [thread:$0]  %s7817_s9, 1024, %s317_s5, [#allocation30], %s7628_s11, %s7628_s11, %s7629_s4  }
 0x16e   :  { %7563 = dma.done.wait [#allocation3], 256  }
 0x16f   :  { %7564 = vsyncadd [#allocation3], 4294967040 }
 0x170   :  { %7565 = dma.done.wait [#allocation6], 1040  }
 0x171   :  { %7566 = vsyncadd [#allocation6], 4294966256 }
 0x172   :  { %7567 = dma.done.wait [#allocation9], 48  }
 0x173   :  { %7568 = vsyncadd [#allocation9], 4294967248 }
 0x174   :  { %7569 = dma.done.wait [#allocation12], 160  }
 0x175   :  { %7570 = vsyncadd [#allocation12], 4294967136 }
 0x176   :  { %7571 = dma.done.wait [#allocation15], 2080  }
 0x177   :  { %7572 = vsyncadd [#allocation15], 4294965216 }
 0x178   :  { %7573 = dma.done.wait [#allocation18], 64  }
 0x179   :  { %7574 = vsyncadd [#allocation18], 4294967232 }
 0x17a   :  { %7575 = dma.done.wait [#allocation21], 4096  }
 0x17b   :  { %7576 = vsyncadd [#allocation21], 4294963200 }
 0x17c   :  { %7577 = dma.done.wait [#allocation24], 3072  }
 0x17d   :  { %7578 = vsyncadd [#allocation24], 4294964224 }
 0x17e   :  { %7579 = dma.done.wait [#allocation27], 5120  }
 0x17f   :  { %7580 = vsyncadd [#allocation27], 4294962176 }
 0x180   :  { %7581 = dma.done.wait [#allocation30], 1024  }
 0x181   :  { %7582 = vsyncadd [#allocation30], 4294966272  ;;  %s9308_s9 = sld [smem:[#allocation44_spill]]  ;;  %v9238_v0 = vmov 0   ;;  %s9309_s13 = sld [smem:[#allocation50_spill]]  ;;  %v567_v1 = vld [vmem:[#allocation13] sm:$0xff]  ;;  %v430_v26 = vlaneseq }
 0x182   :  { %689 = vmatprep.mubr.bf16.mxu0 %v9238_v0  ;;  %6791 = vset.pattern.permute.xlu1 %v9238_v0  ;;  %vm650_vm0 = vcmask 1043456   ;;  %v5656_v2 = vcombine.high %v567_v1, %v567_v1  ;;  %v5655_v3 = vcombine.low %v567_v1, %v567_v1  ;;  %vm625_vm1 = vcmask 64512   ;;  %v6803_v10 = vld [vmem:[#allocation16] sm:$0xff]   ;;  %v6804_v11 = vld [vmem:[#allocation16 + $0x8] sm:$0xff]   ;;  %v6805_v12 = vld [vmem:[#allocation16 + $0x10] sm:$0xff]   ;;  %s9310_s11 = sld [smem:[#allocation43_spill]] }
 0x183   :  { %6790 = vset.pattern.permute.xlu0 %v9238_v0  ;;  %v9240_v6 = vmov 0.0   ;;  %6308 = vmatprep.subr.bf16.mxu1 %v6803_v10  ;;  %v6806_v13 = vld [vmem:[#allocation16 + $0x18] sm:$0xff]   ;;  %vm9286_vm2 = vmmov 0   ;;  %v6807_v21 = vld [vmem:[#allocation16 + $0x20] sm:$0xff]   ;;  %v6808_v22 = vld [vmem:[#allocation16 + $0x28] sm:$0xff]   ;;  %v7973_v27 = vshrl.u32 %v430_v26, 7 }
 0x184   :  { %5657 = vmatprep.subr.msk.bf16.mxu0 %vm650_vm0, %v5656_v2  ;;  %v652_v4 = vsel %vm650_vm0, %v5655_v3, 0  ;;  %6309 = vmatpush3.bf16.msra.mxu1 %v6803_v10  ;;  %v6809_v23 = vld [vmem:[#allocation16 + $0x30] sm:$0xff]   ;;  %v6810_v24 = vld [vmem:[#allocation16 + $0x38] sm:$0xff]   ;;  %v6811_v25 = vld [vmem:[#allocation16 + $0x40] sm:$0xff]   ;;  %s9314_s4 = sld [smem:[#allocation45_spill]]  ;;  %s9315_s28 = sld [smem:[#allocation46_spill]] }
 0x185   :  { %658 = vmatpush1.bf16.msra.mxu0 %v652_v4  ;;  %6310 = vmatprep.subr.bf16.mxu1 %v6804_v11  ;;  %9311 = vst [vmem:[#allocation60_spill] sm:$0xff] %v7973_v27  ;;  %v7976_v28 = vsub.s32 0, %v7973_v27  ;;  %v568_v29 = vld [vmem:[#allocation14] sm:$0x3]  ;;  %v7979_v30 = vsub.s32 1, %v7973_v27  ;;  %v6812_v60 = vld [vmem:[#allocation16 + $0x48] sm:$0xff]  }
 0x186   :  { %6372 = vmatprep.subr.bf16.mxu0 %v9240_v6  ;;  %vm1301_vm4 = vcmask 130048   ;;  %s9320_s12 = sld [smem:[#allocation51_spill]]  ;;  %s9322_s20 = sld [smem:[#allocation47_spill]]  ;;  %vm2442_vm13 = vcmask 1041409   ;;  %vm2445_vm14 = vcmask 1042434   ;;  %vm2448_vm15 = vcmask 1043459  }
 0x187   :  { %v6794_v5 = vld [vmem:[%s9308_s9] sm:$0xff]   ;;  %v6795_v8 = vld [vmem:[%s9308_s9 + $0x8] sm:$0xff]   ;;  %v6796_v14 = vld [vmem:[%s9308_s9 + $0x10] sm:$0xff]   ;;  %9312 = vst [vmem:[#allocation61_spill] sm:$0xff] %v7976_v28  ;;  %v7982_v31 = vrot.slane %v568_v29, %v7976_v28  ;;  %v7985_v32 = vrot.slane %v568_v29, %v7979_v30  ;;  %s9323_s1 = sld [smem:[#allocation49_spill]]  ;;  %s9325_s7 = sld [smem:[#allocation48_spill]] }
 0x188   :  { %5658 = vmatmul.mubr.msk.bf16.vlgmr.msra.gmra.mrb[0].mxu0 %vm625_vm1, %v6794_v5  ;;  %v1156_v7 = vld [vmem:[%s9309_s13] sm:$0xf]  ;;  %6311 = vmatpush3.bf16.msra.mxu1 %v6804_v11  ;;  %v6797_v15 = vld [vmem:[%s9308_s9 + $0x18] sm:$0xff]   ;;  %v6799_v17 = vld [vmem:[%s9308_s9 + $0x28] sm:$0xff]   ;;  %9313 = vst [vmem:[#allocation62_spill] sm:$0xff] %v7979_v30  ;;  %s9326_s14 = sld [smem:[#allocation56_spill]] }
 0x189   :  { %699 = vmatprep.mubr.bf16.mxu0 %v9238_v0  ;;  %v1173_v9 = vsel %vm650_vm0, %v1156_v7, 0  ;;  %6312 = vmatprep.subr.bf16.mxu1 %v6805_v12  ;;  %v6798_v16 = vld [vmem:[%s9308_s9 + $0x20] sm:$0xff]   ;;  %v6800_v18 = vld [vmem:[%s9308_s9 + $0x30] sm:$0xff]   ;;  %v6801_v19 = vld [vmem:[%s9308_s9 + $0x38] sm:$0xff]   ;;  %s9328_s10 = sld [smem:[#allocation52_spill]]  ;;  %s9345_s27 = sld [smem:[#allocation54_spill]] }
 0x18a   :  { %6373 = vmatpush3.bf16.msra.mxu0 %v1173_v9  ;;  %v6802_v20 = vld [vmem:[%s9310_s11] sm:$0xff]   ;;  %s9346_s15 = sld [smem:[#allocation55_spill]]  ;;  %s9347_s16 = sld [smem:[#allocation57_spill]] }
 0x18b   :  { %v6813_v7 = vld [vmem:[#allocation16 + $0x50] sm:$0xff]   ;;  %s9348_s21 = sld [smem:[#allocation59_spill]] }
 0x18c   :  { %6313 = vmatpush3.bf16.msra.mxu1 %v6805_v12 }
 0x18d   :  { %6314 = vmatprep.subr.bf16.mxu1 %v6806_v13 }
 0x190   :  { %5659 = vmatmul.mubr.msk.bf16.gmra.mrb[4].mxu0 %vm625_vm1, %v6795_v8  ;;  %6315 = vmatpush3.bf16.msra.mxu1 %v6806_v13 }
 0x191   :  { %709 = vmatprep.mubr.bf16.mxu0 %v9238_v0  ;;  %6316 = vmatprep.subr.bf16.mxu1 %v6807_v21 }
 0x194   :  { %6317 = vmatpush3.bf16.msra.mxu1 %v6807_v21 }
 0x195   :  { %6318 = vmatprep.subr.bf16.mxu1 %v6808_v22 }
 0x198   :  { %5660 = vmatmul.mubr.msk.bf16.gmra.mrb[8].mxu0 %vm625_vm1, %v6796_v14  ;;  %6319 = vmatpush3.bf16.msra.mxu1 %v6808_v22  ;;  %v6814_v14 = vld [vmem:[#allocation16 + $0x58] sm:$0xff]  }
 0x199   :  { %719 = vmatprep.mubr.bf16.mxu0 %v9238_v0  ;;  %6320 = vmatprep.subr.bf16.mxu1 %v6809_v23 }
 0x19c   :  { %6321 = vmatpush3.bf16.msra.mxu1 %v6809_v23  ;;  %v6815_v23 = vld [vmem:[#allocation16 + $0x60] sm:$0xff]  }
 0x19d   :  { %6322 = vmatprep.subr.bf16.mxu1 %v6810_v24 }
 0x1a0   :  { %5661 = vmatmul.mubr.msk.bf16.gmra.mrb[12].mxu0 %vm625_vm1, %v6797_v15  ;;  %6323 = vmatpush3.bf16.msra.mxu1 %v6810_v24 }
 0x1a1   :  { %729 = vmatprep.mubr.bf16.mxu0 %v9238_v0  ;;  %6340 = vmatprep.subr.bf16.mxu1 %v6811_v25 }
 0x1a8   :  { %5662 = vmatmul.mubr.msk.bf16.gmra.mrb[16].mxu0 %vm625_vm1, %v6798_v16 }
 0x1a9   :  { %739 = vmatprep.mubr.bf16.mxu0 %v9238_v0 }
 0x1b0   :  { %5663 = vmatmul.mubr.msk.bf16.gmra.mrb[20].mxu0 %vm625_vm1, %v6799_v17 }
 0x1b1   :  { %749 = vmatprep.mubr.bf16.mxu0 %v9238_v0 }
 0x1b8   :  { %5664 = vmatmul.mubr.msk.bf16.gmra.mrb[24].mxu0 %vm625_vm1, %v6800_v18 }
 0x1b9   :  { %759 = vmatprep.mubr.bf16.mxu0 %v9238_v0 }
 0x1c0   :  { %5665 = vmatmul.mubr.msk.bf16.gmra.mrb[28].mxu0 %vm625_vm1, %v6801_v19 }
 0x1c1   :  { %6374 = vmatprep.mubr.msk.bf16.mxu0 %vm9286_vm2, %v9240_v6 }
 0x1c8   :  { %6375 = vmatmul.mubr.msk.bf16.vlgmr.msra.gmra.mrb[32].mxu0 %vm625_vm1, %v6802_v20 }
 0x25b   :  { %v691_v33 = vpop.f32.mrb[0].mxu0 }
 0x25c   :  { %v692_v34 = vadd.f32 %v691_v33, %v7982_v31  ;;  %v693_v35 = vpop.f32.mrb[1].mxu0 }
 0x25d   :  { %v694_v36 = vadd.f32 %v693_v35, %v7985_v32  ;;  %v695_v37 = vpop.f32.mrb[2].mxu0 }
 0x25e   :  { %v696_v38 = vadd.f32 %v695_v37, %v7982_v31  ;;  %v697_v39 = vpop.f32.mrb[3].mxu0  ;;  %v770_v41 = vmax.f32 %v692_v34, 0.0 }
 0x25f   :  { %v698_v40 = vadd.f32 %v697_v39, %v7985_v32  ;;  %v771_v43 = vmax.f32 %v694_v36, 0.0  ;;  %v6816_v36 = vld [vmem:[#allocation16 + $0x68] sm:$0xff]  }
 0x260   :  { %v772_v42 = vmax.f32 %v696_v38, 0.0 }
 0x261   :  { %v773_v44 = vmax.f32 %v698_v40, 0.0 }
 0x262   :  { %v818_v45 = vpack.c.bf16 %v772_v42, %v770_v41 }
 0x263   :  { %v7991_v46 = vpack.c.bf16 %v773_v44, %v771_v43  ;;  %v701_v47 = vpop.f32.mrb[4].mxu0 }
 0x264   :  { %v702_v48 = vadd.f32 %v701_v47, %v7982_v31  ;;  %v703_v49 = vpop.f32.mrb[5].mxu0  ;;  %6324 = vmatprep.mubr.bf16.mxu1 %v818_v45  ;;  %v6817_v45 = vld [vmem:[#allocation16 + $0x70] sm:$0xff]  }
 0x265   :  { %v704_v50 = vadd.f32 %v703_v49, %v7985_v32  ;;  %v705_v51 = vpop.f32.mrb[6].mxu0 }
 0x266   :  { %v706_v52 = vadd.f32 %v705_v51, %v7982_v31  ;;  %v707_v53 = vpop.f32.mrb[7].mxu0  ;;  %v774_v55 = vmax.f32 %v702_v48, 0.0 }
 0x267   :  { %v708_v54 = vadd.f32 %v707_v53, %v7985_v32  ;;  %v775_v57 = vmax.f32 %v704_v50, 0.0  ;;  %v6818_v53 = vld [vmem:[#allocation16 + $0x78] sm:$0xff]  }
 0x268   :  { %v776_v56 = vmax.f32 %v706_v52, 0.0 }
 0x269   :  { %v777_v58 = vmax.f32 %v708_v54, 0.0 }
 0x26a   :  { %v819_v59 = vpack.c.bf16 %v776_v56, %v774_v55 }
 0x26b   :  { %v7997_v61 = vpack.c.bf16 %v777_v58, %v775_v57  ;;  %v711_v62 = vpop.f32.mrb[8].mxu0 }
 0x26c   :  { %v712_v63 = vadd.f32 %v711_v62, %v7982_v31  ;;  %v713_v1 = vpop.f32.mrb[9].mxu0  ;;  %6325 = vmatmul.mubr.bf16.vlgmr.msra.gmra.mrb[0].mxu1 %v819_v59 }
 0x26d   :  { %v714_v2 = vadd.f32 %v713_v1, %v7985_v32  ;;  %v715_v3 = vpop.f32.mrb[10].mxu0  ;;  %6341 = vmatpush3.bf16.msra.mxu1 %v6811_v25 }
 0x26e   :  { %v716_v4 = vadd.f32 %v715_v3, %v7982_v31  ;;  %v717_v5 = vpop.f32.mrb[11].mxu0  ;;  %6342 = vmatprep.subr.bf16.mxu1 %v6812_v60  ;;  %v778_v9 = vmax.f32 %v712_v63, 0.0 }
 0x26f   :  { %v718_v8 = vadd.f32 %v717_v5, %v7985_v32  ;;  %v779_v11 = vmax.f32 %v714_v2, 0.0 }
 0x270   :  { %v780_v10 = vmax.f32 %v716_v4, 0.0 }
 0x271   :  { %v781_v12 = vmax.f32 %v718_v8, 0.0  ;;  %6343 = vmatpush3.bf16.msra.mxu1 %v6812_v60 }
 0x272   :  { %v820_v13 = vpack.c.bf16 %v780_v10, %v778_v9  ;;  %6344 = vmatprep.subr.bf16.mxu1 %v6813_v7 }
 0x273   :  { %v8003_v15 = vpack.c.bf16 %v781_v12, %v779_v11  ;;  %v721_v16 = vpop.f32.mrb[12].mxu0 }
 0x274   :  { %v722_v17 = vadd.f32 %v721_v16, %v7982_v31  ;;  %v723_v18 = vpop.f32.mrb[13].mxu0  ;;  %6328 = vmatprep.mubr.bf16.mxu1 %v820_v13 }
 0x275   :  { %v724_v19 = vadd.f32 %v723_v18, %v7985_v32  ;;  %v725_v20 = vpop.f32.mrb[14].mxu0  ;;  %6345 = vmatpush3.bf16.msra.mxu1 %v6813_v7 }
 0x276   :  { %v726_v21 = vadd.f32 %v725_v20, %v7982_v31  ;;  %v727_v22 = vpop.f32.mrb[15].mxu0  ;;  %6346 = vmatprep.subr.bf16.mxu1 %v6814_v14  ;;  %v782_v25 = vmax.f32 %v722_v17, 0.0 }
 0x277   :  { %v728_v24 = vadd.f32 %v727_v22, %v7985_v32  ;;  %v783_v33 = vmax.f32 %v724_v19, 0.0 }
 0x278   :  { %v784_v29 = vmax.f32 %v726_v21, 0.0 }
 0x279   :  { %v785_v34 = vmax.f32 %v728_v24, 0.0  ;;  %6347 = vmatpush3.bf16.msra.mxu1 %v6814_v14 }
 0x27a   :  { %v821_v35 = vpack.c.bf16 %v784_v29, %v782_v25  ;;  %6348 = vmatprep.subr.bf16.mxu1 %v6815_v23 }
 0x27b   :  { %v8009_v37 = vpack.c.bf16 %v785_v34, %v783_v33  ;;  %v731_v38 = vpop.f32.mrb[16].mxu0 }
 0x27c   :  { %v732_v39 = vadd.f32 %v731_v38, %v7982_v31  ;;  %v733_v40 = vpop.f32.mrb[17].mxu0  ;;  %6329 = vmatmul.mubr.bf16.gmra.mrb[4].mxu1 %v821_v35 }
 0x27d   :  { %v734_v41 = vadd.f32 %v733_v40, %v7985_v32  ;;  %v735_v42 = vpop.f32.mrb[18].mxu0  ;;  %6349 = vmatpush3.bf16.msra.mxu1 %v6815_v23 }
 0x27e   :  { %v736_v43 = vadd.f32 %v735_v42, %v7982_v31  ;;  %v737_v44 = vpop.f32.mrb[19].mxu0  ;;  %6350 = vmatprep.subr.bf16.mxu1 %v6816_v36  ;;  %v786_v48 = vmax.f32 %v732_v39, 0.0  ;;  %v5684_v42 = vld [vmem:[#allocation5] ss:$0 sm:$0xff] }
 0x27f   :  { %v738_v47 = vadd.f32 %v737_v44, %v7985_v32  ;;  %v787_v50 = vmax.f32 %v734_v41, 0.0 }
 0x280   :  { %v788_v49 = vmax.f32 %v736_v43, 0.0 }
 0x281   :  { %v789_v51 = vmax.f32 %v738_v47, 0.0  ;;  %6351 = vmatpush3.bf16.msra.mxu1 %v6816_v36 }
 0x282   :  { %v822_v52 = vpack.c.bf16 %v788_v49, %v786_v48  ;;  %6352 = vmatprep.subr.bf16.mxu1 %v6817_v45 }
 0x283   :  { %v999_v54 = vpack.c.bf16 %v789_v51, %v787_v50  ;;  %v741_v55 = vpop.f32.mrb[20].mxu0 }
 0x284   :  { %v742_v56 = vadd.f32 %v741_v55, %v7982_v31  ;;  %v743_v57 = vpop.f32.mrb[21].mxu0  ;;  %6332 = vmatprep.mubr.bf16.mxu1 %v822_v52 }
 0x285   :  { %v744_v58 = vadd.f32 %v743_v57, %v7985_v32  ;;  %v745_v59 = vpop.f32.mrb[22].mxu0  ;;  %6353 = vmatpush3.bf16.msra.mxu1 %v6817_v45 }
 0x286   :  { %v746_v60 = vadd.f32 %v745_v59, %v7982_v31  ;;  %v747_v62 = vpop.f32.mrb[23].mxu0  ;;  %6354 = vmatprep.subr.bf16.mxu1 %v6818_v53  ;;  %v790_v1 = vmax.f32 %v742_v56, 0.0 }
 0x287   :  { %v748_v63 = vadd.f32 %v747_v62, %v7985_v32  ;;  %v791_v3 = vmax.f32 %v744_v58, 0.0 }
 0x288   :  { %v792_v2 = vmax.f32 %v746_v60, 0.0 }
 0x289   :  { %v793_v4 = vmax.f32 %v748_v63, 0.0  ;;  %6355 = vmatpush3.bf16.msra.mxu1 %v6818_v53 }
 0x28a   :  { %v823_v5 = vpack.c.bf16 %v792_v2, %v790_v1 }
 0x28b   :  { %v1000_v7 = vpack.c.bf16 %v793_v4, %v791_v3  ;;  %v751_v8 = vpop.f32.mrb[24].mxu0 }
 0x28c   :  { %v752_v9 = vadd.f32 %v751_v8, %v7982_v31  ;;  %v753_v10 = vpop.f32.mrb[25].mxu0  ;;  %6333 = vmatmul.mubr.bf16.gmra.mrb[8].mxu1 %v823_v5  ;;  %v6819_v5 = vld [vmem:[%s9314_s4] sm:$0xff]  }
 0x28d   :  { %v754_v11 = vadd.f32 %v753_v10, %v7985_v32  ;;  %v755_v12 = vpop.f32.mrb[26].mxu0  ;;  %6380 = vmatprep.mubr.msk.bf16.mxu0 %vm1301_vm4, %v6819_v5  ;;  %v6822_v5 = vld [vmem:[%s9315_s28 + $0x8] sm:$0xff]  }
 0x28e   :  { %v756_v13 = vadd.f32 %v755_v12, %v7982_v31  ;;  %v757_v14 = vpop.f32.mrb[27].mxu0  ;;  %v794_v17 = vmax.f32 %v752_v9, 0.0 }
 0x28f   :  { %v758_v16 = vadd.f32 %v757_v14, %v7985_v32  ;;  %v795_v19 = vmax.f32 %v754_v11, 0.0 }
 0x290   :  { %v796_v18 = vmax.f32 %v756_v13, 0.0 }
 0x291   :  { %v797_v20 = vmax.f32 %v758_v16, 0.0 }
 0x292   :  { %v824_v21 = vpack.c.bf16 %v796_v18, %v794_v17 }
 0x293   :  { %v1001_v22 = vpack.c.bf16 %v797_v20, %v795_v19  ;;  %v761_v23 = vpop.f32.mrb[28].mxu0 }
 0x294   :  { %v762_v24 = vadd.f32 %v761_v23, %v7982_v31  ;;  %v763_v25 = vpop.f32.mrb[29].mxu0  ;;  %6336 = vmatprep.mubr.bf16.mxu1 %v824_v21 }
 0x295   :  { %v764_v29 = vadd.f32 %v763_v25, %v7985_v32  ;;  %v765_v33 = vpop.f32.mrb[30].mxu0 }
 0x296   :  { %v766_v34 = vadd.f32 %v765_v33, %v7982_v31  ;;  %v767_v35 = vpop.f32.mrb[31].mxu0  ;;  %v798_v38 = vmax.f32 %v762_v24, 0.0 }
 0x297   :  { %v768_v36 = vadd.f32 %v767_v35, %v7985_v32  ;;  %v799_v40 = vmax.f32 %v764_v29, 0.0  ;;  %v431_v32 = vand.u32 127, %v430_v26 }
 0x298   :  { %v800_v39 = vmax.f32 %v766_v34, 0.0 }
 0x299   :  { %v801_v41 = vmax.f32 %v768_v36, 0.0  ;;  %vm432_vm3 = vcmp.lt.s32.totalorder %v431_v32, 32  ;;  %v5688_v32 = vld [vmem:[#allocation11] ss:$0 sm:$0xff] }
 0x29a   :  { %v825_v43 = vpack.c.bf16 %v800_v39, %v798_v38  ;;  %v8039_v52 = vsel %vm432_vm3, 1.0, %v9240_v6 }
 0x29b   :  { %v1002_v44 = vpack.c.bf16 %v801_v41, %v799_v40  ;;  %v1209_v45 = vpop.f32.mrb[32].mxu0 }
 0x29c   :  { %v8027_v47 = vadd.f32 %v5684_v42, %v1209_v45  ;;  %6337 = vmatmul.mubr.bf16.gmra.mrb[12].mxu1 %v825_v43  ;;  %v6376_v48 = vpop.f32.mrb[33].mxu0  ;;  %v5687_v45 = vld [vmem:[#allocation10] ss:$0 sm:$0xff] }
 0x29d   :  { %6356 = vmatprep.mubr.bf16.mxu1 %v7991_v46  ;;  %v1212_v49 = vpop.f32.mrb[34].mxu0 }
 0x29e   :  { %1216 = vadd.xlane.f32.xlu0 %v8027_v47  ;;  %v6377_v31 = vpop.f32.mrb[35].mxu0  ;;  %v8031_v50 = vadd.f32 %v5684_v42, %v1212_v49 }
 0x2a2   :  { %1218 = vadd.xlane.f32.xlu0 %v8031_v50 }
 0x2a4   :  { %6357 = vmatmul.mubr.bf16.vlgmr.msra.gmra.mrb[16].mxu1 %v7997_v61 }
 0x2a5   :  { %6360 = vmatprep.mubr.bf16.mxu1 %v8003_v15 }
 0x2ac   :  { %6361 = vmatmul.mubr.bf16.gmra.mrb[20].mxu1 %v8009_v37 }
 0x2ad   :  { %6364 = vmatprep.mubr.bf16.mxu1 %v999_v54 }
 0x2b4   :  { %6365 = vmatmul.mubr.bf16.gmra.mrb[24].mxu1 %v1000_v7  ;;  %v6820_v7 = vld [vmem:[%s9315_s28] sm:$0xff]  }
 0x2b5   :  { %6368 = vmatprep.mubr.bf16.mxu1 %v1001_v22 }
 0x2bc   :  { %6369 = vmatmul.mubr.bf16.gmra.mrb[28].mxu1 %v1002_v44 }
 0x2bd   :  { %6398 = vmatprep.mubr.msk.bf16.mxu1 %vm1301_vm4, %v6820_v7  ;;  %v6824_v7 = vld [vmem:[%s9314_s4 + $0x10] sm:$0xff]  }
 0x32b   :  { %v1217_v46 = vpop.xlane.xlu0 %1216 }
 0x32c   :  { %v1220_v51 = vmul.f32 0.03125, %v1217_v46 }
 0x32e   :  { %v1222_v53 = vsub.f32 %v8027_v47, %v1220_v51 }
 0x32f   :  { %v1219_v55 = vpop.xlane.xlu0 %1218 }
 0x330   :  { %v1221_v61 = vmul.f32 0.03125, %v1219_v55  ;;  %v1224_v15 = vmul.f32 %v8039_v52, %v1222_v53 }
 0x332   :  { %v1223_v37 = vsub.f32 %v8031_v50, %v1221_v61  ;;  %v1226_v54 = vmul.f32 %v1224_v15, %v1224_v15 }
 0x334   :  { %1228 = vadd.xlane.f32.xlu1 %v1226_v54  ;;  %v1225_v26 = vmul.f32 %v8039_v52, %v1223_v37 }
 0x336   :  { %v1227_v56 = vmul.f32 %v1225_v26, %v1225_v26 }
 0x338   :  { %1230 = vadd.xlane.f32.xlu1 %v1227_v56  ;;  %v6835_v56 = vld [vmem:[%s9320_s12 + $0x40] sm:$0xff]  }
 0x33f   :  { %v8045_v57 = vpop.f32.mrb[0].mxu1 }
 0x340   :  { %v8047_v58 = vpop.f32.mrb[1].mxu1 }
 0x341   :  { %v8049_v59 = vpop.f32.mrb[2].mxu1 }
 0x342   :  { %v8051_v60 = vpop.f32.mrb[3].mxu1 }
 0x34f   :  { %v8053_v62 = vpop.f32.mrb[4].mxu1 }
 0x350   :  { %v8055_v63 = vpop.f32.mrb[5].mxu1 }
 0x351   :  { %v8057_v1 = vpop.f32.mrb[6].mxu1 }
 0x352   :  { %v8059_v2 = vpop.f32.mrb[7].mxu1 }
 0x35f   :  { %v8061_v3 = vpop.f32.mrb[8].mxu1 }
 0x360   :  { %v8063_v4 = vpop.f32.mrb[9].mxu1 }
 0x361   :  { %v8067_v8 = vpop.f32.mrb[10].mxu1 }
 0x362   :  { %v8069_v9 = vpop.f32.mrb[11].mxu1 }
 0x36f   :  { %v8073_v10 = vpop.f32.mrb[12].mxu1 }
 0x370   :  { %v8075_v11 = vpop.f32.mrb[13].mxu1 }
 0x371   :  { %v8077_v12 = vpop.f32.mrb[14].mxu1 }
 0x372   :  { %v8079_v13 = vpop.f32.mrb[15].mxu1 }
 0x377   :  { %v8081_v14 = vpop.f32.mrb[16].mxu1 }
 0x378   :  { %v8083_v16 = vpop.f32.mrb[17].mxu1 }
 0x379   :  { %v8085_v17 = vpop.f32.mrb[18].mxu1 }
 0x37a   :  { %v8087_v18 = vpop.f32.mrb[19].mxu1 }
 0x37f   :  { %v8089_v19 = vpop.f32.mrb[20].mxu1 }
 0x380   :  { %v8091_v20 = vpop.f32.mrb[21].mxu1 }
 0x381   :  { %v8093_v21 = vpop.f32.mrb[22].mxu1 }
 0x382   :  { %v8095_v22 = vpop.f32.mrb[23].mxu1 }
 0x387   :  { %v8097_v23 = vpop.f32.mrb[24].mxu1 }
 0x388   :  { %v8099_v24 = vpop.f32.mrb[25].mxu1 }
 0x389   :  { %v8101_v25 = vpop.f32.mrb[26].mxu1 }
 0x38a   :  { %v8103_v29 = vpop.f32.mrb[27].mxu1 }
 0x38f   :  { %v8105_v33 = vpop.f32.mrb[28].mxu1 }
 0x390   :  { %9316 = vst [vmem:[#allocation63_spill] sm:$0xff] %v8105_v33  ;;  %v8107_v34 = vpop.f32.mrb[29].mxu1 }
 0x391   :  { %9317 = vst [vmem:[#allocation64_spill] sm:$0xff] %v8107_v34  ;;  %v8109_v35 = vpop.f32.mrb[30].mxu1 }
 0x392   :  { %9318 = vst [vmem:[#allocation65_spill] sm:$0xff] %v8109_v35  ;;  %v8111_v36 = vpop.f32.mrb[31].mxu1 }
 0x393   :  { %9319 = vst [vmem:[#allocation66_spill] sm:$0xff] %v8111_v36 }
 0x3c1   :  { %v1229_v38 = vpop.xlane.xlu1 %1228 }
 0x3c2   :  { %v1232_v39 = vmul.f32 0.03125, %v1229_v38  ;;  %v6836_v38 = vld [vmem:[%s9320_s12] sm:$0xff]  }
 0x3c4   :  { %v1234_v40 = vadd.f32 1e-05, %v1232_v39  ;;  %v6837_v39 = vld [vmem:[%s9320_s12 + $0x48] sm:$0xff]  }
 0x3c5   :  { %v1231_v41 = vpop.xlane.xlu1 %1230 }
 0x3c6   :  { %7027 = vrsqrt.f32 %v1234_v40  ;;  %v1233_v42 = vmul.f32 0.03125, %v1231_v41  ;;  %v6838_v40 = vld [vmem:[%s9320_s12 + $0x8] sm:$0xff]   ;;  %v6839_v41 = vld [vmem:[%s9320_s12 + $0x50] sm:$0xff]  }
 0x3c8   :  { %v1235_v43 = vadd.f32 1e-05, %v1233_v42  ;;  %v6825_v42 = vld [vmem:[%s9315_s28 + $0x18] sm:$0xff]  }
 0x3ca   :  { %7029 = vrsqrt.f32 %v1235_v43  ;;  %v6826_v43 = vld [vmem:[%s9314_s4 + $0x18] sm:$0xff]  }
 0x3d0   :  { %v7028_v44 = vpop.eup %7027 }
 0x3d1   :  { %v1238_v48 = vmul.f32 %v7028_v44, %v1224_v15  ;;  %v6821_v15 = vld [vmem:[%s9314_s4 + $0x8] sm:$0xff]   ;;  %v6827_v44 = vld [vmem:[%s9315_s28 + $0x20] sm:$0xff]  }
 0x3d3   :  { %v1247_v49 = vmul.f32 %v5687_v45, %v1238_v48  ;;  %v6840_v48 = vld [vmem:[%s9320_s12 + $0x10] sm:$0xff]  }
 0x3d4   :  { %v7030_v31 = vpop.eup %7029 }
 0x3d5   :  { %v1239_v46 = vmul.f32 %v7030_v31, %v1225_v26  ;;  %v1256_v53 = vadd.f32 %v5688_v32, %v1247_v49  ;;  %v6823_v26 = vld [vmem:[%s9315_s28 + $0x10] sm:$0xff]   ;;  %v6841_v49 = vld [vmem:[%s9320_s12 + $0x58] sm:$0xff]  }
 0x3d6   :  { %v6842_v31 = vld [vmem:[%s9320_s12 + $0x18] sm:$0xff]  }
 0x3d7   :  { %v1248_v51 = vmul.f32 %v5687_v45, %v1239_v46  ;;  %v1258_v61 = vmax.f32 %v1256_v53, 0.0  ;;  %v6828_v45 = vld [vmem:[%s9314_s4 + $0x20] sm:$0xff]   ;;  %v6829_v46 = vld [vmem:[%s9315_s28 + $0x28] sm:$0xff]   ;;  %v6831_v53 = vld [vmem:[%s9315_s28 + $0x30] sm:$0xff]  }
 0x3d9   :  { %v1257_v55 = vadd.f32 %v5688_v32, %v1248_v51  ;;  %v6843_v32 = vld [vmem:[%s9320_s12 + $0x60] sm:$0xff]   ;;  %v6830_v51 = vld [vmem:[%s9314_s4 + $0x28] sm:$0xff]  }
 0x3db   :  { %v1259_v37 = vmax.f32 %v1257_v55, 0.0  ;;  %v6832_v55 = vld [vmem:[%s9314_s4 + $0x30] sm:$0xff]  }
 0x3dd   :  { %v8113_v54 = vpack.c.bf16 %v1259_v37, %v1258_v61  ;;  %v6844_v61 = vld [vmem:[%s9320_s12 + $0x20] sm:$0xff]   ;;  %v6845_v37 = vld [vmem:[%s9320_s12 + $0x68] sm:$0xff]  }
 0x3df   :  { %6378 = vmatprep.subr.bf16.mxu0 %v8113_v54  ;;  %6396 = vmatprep.subr.bf16.mxu1 %v8113_v54 }
 0x3e0   :  { %6379 = vmatpush3.bf16.msra.mxu0 %v8113_v54  ;;  %6397 = vmatpush3.bf16.msra.mxu1 %v8113_v54 }
 0x3e1   :  { %6040 = vmatprep.subr.bf16.mxu0 %v6835_v56  ;;  %v6846_v56 = vld [vmem:[%s9320_s12 + $0x28] sm:$0xff]  }
 0x3e3   :  { %6381 = vmatmul.mubr.msk.bf16.vlgmr.msra.gmra.mrb[36].mxu0 %vm1301_vm4, %v6821_v15  ;;  %6399 = vmatmul.mubr.msk.bf16.vlgmr.msra.gmra.mrb[32].mxu1 %vm1301_vm4, %v6822_v5  ;;  %v6847_v15 = vld [vmem:[%s9320_s12 + $0x70] sm:$0xff]   ;;  %v6833_v5 = vld [vmem:[%s9315_s28 + $0x38] sm:$0xff]  }
 0x3e4   :  { %6402 = vmatprep.mubr.msk.bf16.mxu1 %vm1301_vm4, %v6823_v26  ;;  %6384 = vmatprep.mubr.msk.bf16.mxu0 %vm1301_vm4, %v6824_v7  ;;  %v6834_v26 = vld [vmem:[%s9314_s4 + $0x38] sm:$0xff]   ;;  %v6848_v7 = vld [vmem:[%s9320_s12 + $0x30] sm:$0xff]  }
 0x3e5   :  { %6041 = vmatpush3.bf16.msra.mxu0 %v6836_v38  ;;  %v6849_v38 = vld [vmem:[%s9320_s12 + $0x78] sm:$0xff]  }
 0x3e6   :  { %6042 = vmatprep.subr.bf16.mxu0 %v6837_v39  ;;  %v6850_v39 = vld [vmem:[%s9320_s12 + $0x38] sm:$0xff]  }
 0x3e9   :  { %6043 = vmatpush3.bf16.msra.mxu0 %v6838_v40  ;;  %v6851_v40 = vld [vmem:[#allocation20] sm:$0xff]  }
 0x3ea   :  { %6044 = vmatprep.subr.bf16.mxu0 %v6839_v41  ;;  %v6852_v41 = vld [vmem:[#allocation20 + $0x8] sm:$0xff]   ;;  %6414 = vmatprep.subr.bf16.mxu1 %v6851_v40 }
 0x3eb   :  { %6403 = vmatmul.mubr.msk.bf16.gmra.mrb[36].mxu1 %vm1301_vm4, %v6825_v42  ;;  %6385 = vmatmul.mubr.msk.bf16.gmra.mrb[40].mxu0 %vm1301_vm4, %v6826_v43  ;;  %v6853_v42 = vld [vmem:[#allocation20 + $0x10] sm:$0xff]  }
 0x3ec   :  { %6406 = vmatprep.mubr.msk.bf16.mxu1 %vm1301_vm4, %v6827_v44  ;;  %6388 = vmatprep.mubr.msk.bf16.mxu0 %vm1301_vm4, %v6828_v45 }
 0x3ed   :  { %6045 = vmatpush3.bf16.msra.mxu0 %v6840_v48  ;;  %6415 = vmatpush3.bf16.msra.mxu1 %v6851_v40 }
 0x3ee   :  { %6046 = vmatprep.subr.bf16.mxu0 %v6841_v49  ;;  %6416 = vmatprep.subr.bf16.mxu1 %v6852_v41 }
 0x3f1   :  { %6047 = vmatpush3.bf16.msra.mxu0 %v6842_v31  ;;  %6417 = vmatpush3.bf16.msra.mxu1 %v6852_v41 }
 0x3f2   :  { %6048 = vmatprep.subr.bf16.mxu0 %v6843_v32  ;;  %6418 = vmatprep.subr.bf16.mxu1 %v6853_v42 }
 0x3f3   :  { %6407 = vmatmul.mubr.msk.bf16.gmra.mrb[40].mxu1 %vm1301_vm4, %v6829_v46  ;;  %6389 = vmatmul.mubr.msk.bf16.gmra.mrb[44].mxu0 %vm1301_vm4, %v6830_v51 }
 0x3f4   :  { %6410 = vmatprep.mubr.msk.bf16.mxu1 %vm1301_vm4, %v6831_v53  ;;  %6392 = vmatprep.mubr.msk.bf16.mxu0 %vm1301_vm4, %v6832_v55 }
 0x3f5   :  { %6049 = vmatpush3.bf16.msra.mxu0 %v6844_v61  ;;  %6419 = vmatpush3.bf16.msra.mxu1 %v6853_v42 }
 0x3f6   :  { %6050 = vmatprep.subr.bf16.mxu0 %v6845_v37 }
 0x3f9   :  { %6051 = vmatpush3.bf16.msra.mxu0 %v6846_v56 }
 0x3fa   :  { %6052 = vmatprep.subr.bf16.mxu0 %v6847_v15 }
 0x3fb   :  { %6411 = vmatmul.mubr.msk.bf16.gmra.mrb[44].mxu1 %vm1301_vm4, %v6833_v5  ;;  %6393 = vmatmul.mubr.msk.bf16.gmra.mrb[48].mxu0 %vm1301_vm4, %v6834_v26 }
 0x3fd   :  { %6053 = vmatpush3.bf16.msra.mxu0 %v6848_v7 }
 0x3fe   :  { %6054 = vmatprep.subr.bf16.mxu0 %v6849_v38 }
 0x401   :  { %6055 = vmatpush3.bf16.msra.mxu0 %v6850_v39 }
 0x402   :  { %6466 = vmatprep.subr.bf16.mxu0 %v9240_v6 }
 0x4b6   :  { %v6382_v43 = vpop.f32.mrb[36].mxu0  ;;  %v6400_v44 = vpop.f32.mrb[32].mxu1 }
 0x4b7   :  { %v1360_v45 = vpop.f32.mrb[37].mxu0  ;;  %v1521_v48 = vpop.f32.mrb[33].mxu1 }
 0x4b8   :  { %v6383_v49 = vpop.f32.mrb[38].mxu0  ;;  %v6401_v31 = vpop.f32.mrb[34].mxu1 }
 0x4b9   :  { %v1618_v32 = vpack.c.bf16 %v6383_v49, %v6382_v43  ;;  %v1619_v46 = vpack.c.bf16 %v6401_v31, %v6400_v44  ;;  %v1363_v51 = vpop.f32.mrb[39].mxu0  ;;  %v1524_v53 = vpop.f32.mrb[35].mxu1 }
 0x4ba   :  { %v1616_v55 = vpack.c.bf16 %v1363_v51, %v1360_v45  ;;  %v1617_v61 = vpack.c.bf16 %v1524_v53, %v1521_v48 }
 0x4bc   :  { %1767 = vmatprep.mubr.bf16.mxu0 %v1617_v61 }
 0x4bd   :  { %1768 = vmatmul.mubr.bf16.vlgmr.msra.gmra.mrb[52].mxu0 %v1616_v55 }
 0x4be   :  { %1775 = vmatprep.mubr.bf16.mxu0 %v1619_v46  ;;  %v6404_v37 = vpop.f32.mrb[36].mxu1  ;;  %v6386_v56 = vpop.f32.mrb[40].mxu0 }
 0x4bf   :  { %v1537_v15 = vpop.f32.mrb[37].mxu1  ;;  %v1376_v5 = vpop.f32.mrb[41].mxu0 }
 0x4c0   :  { %v6405_v26 = vpop.f32.mrb[38].mxu1  ;;  %v6387_v7 = vpop.f32.mrb[42].mxu0 }
 0x4c1   :  { %v1623_v38 = vpack.c.bf16 %v6405_v26, %v6404_v37  ;;  %v1622_v39 = vpack.c.bf16 %v6387_v7, %v6386_v56  ;;  %v1540_v40 = vpop.f32.mrb[39].mxu1  ;;  %v1379_v41 = vpop.f32.mrb[43].mxu0 }
 0x4c2   :  { %v1621_v42 = vpack.c.bf16 %v1540_v40, %v1537_v15  ;;  %v1620_v43 = vpack.c.bf16 %v1379_v41, %v1376_v5 }
 0x4c5   :  { %1776 = vmatmul.mubr.bf16.gmra.mrb[56].mxu0 %v1618_v32 }
 0x4c6   :  { %1783 = vmatprep.mubr.bf16.mxu0 %v1621_v42  ;;  %v6408_v44 = vpop.f32.mrb[40].mxu1  ;;  %v6390_v45 = vpop.f32.mrb[44].mxu0 }
 0x4c7   :  { %v1553_v48 = vpop.f32.mrb[41].mxu1  ;;  %v1392_v49 = vpop.f32.mrb[45].mxu0 }
 0x4c8   :  { %v6409_v31 = vpop.f32.mrb[42].mxu1  ;;  %v6391_v46 = vpop.f32.mrb[46].mxu0 }
 0x4c9   :  { %v1627_v51 = vpack.c.bf16 %v6409_v31, %v6408_v44  ;;  %v1626_v53 = vpack.c.bf16 %v6391_v46, %v6390_v45  ;;  %v1556_v55 = vpop.f32.mrb[43].mxu1  ;;  %v1395_v61 = vpop.f32.mrb[47].mxu0  ;;  %v6855_v44 = vld [vmem:[#allocation20 + $0x20] sm:$0xff]   ;;  %v435_v31 = vld [vmem:[%s9322_s20] sm:$0xff] }
 0x4ca   :  { %v1625_v0 = vpack.c.bf16 %v1556_v55, %v1553_v48  ;;  %v1624_v6 = vpack.c.bf16 %v1395_v61, %v1392_v49  ;;  %v445_v45 = vld [vmem:[%s9322_s20 + $0x50] sm:$0xff]  ;;  %v436_v48 = vld [vmem:[%s9322_s20 + $0x8] sm:$0xff]  ;;  %v447_v49 = vld [vmem:[%s9322_s20 + $0x60] sm:$0xff] }
 0x4cb   :  { %458 = vperm.xlu0 %6790, %v436_v48   ;;  %v448_v46 = vld [vmem:[%s9322_s20 + $0x68] sm:$0xff]  ;;  %v443_v55 = vld [vmem:[%s9322_s20 + $0x40] sm:$0xff]  ;;  %v450_v61 = vld [vmem:[%s9322_s20 + $0x78] sm:$0xff] }
 0x4cd   :  { %1784 = vmatmul.mubr.bf16.gmra.mrb[60].mxu0 %v1620_v43  ;;  %v6854_v43 = vld [vmem:[#allocation20 + $0x18] sm:$0xff]  }
 0x4ce   :  { %1791 = vmatprep.mubr.bf16.mxu0 %v1623_v38  ;;  %v6412_v37 = vpop.f32.mrb[44].mxu1  ;;  %v6394_v56 = vpop.f32.mrb[48].mxu0  ;;  %v9321_v38 = vmov 0.0   ;;  %6420 = vmatprep.subr.bf16.mxu1 %v6854_v43 }
 0x4cf   :  { %v1569_v15 = vpop.f32.mrb[45].mxu1  ;;  %v1408_v5 = vpop.f32.mrb[49].mxu0  ;;  %6421 = vmatpush3.bf16.msra.mxu1 %v6854_v43  ;;  %513 = vperm.xlu0 %6790, %v447_v49  }
 0x4d0   :  { %v6413_v32 = vpop.f32.mrb[46].mxu1  ;;  %v6395_v26 = vpop.f32.mrb[50].mxu0  ;;  %6422 = vmatprep.subr.bf16.mxu1 %v6855_v44 }
 0x4d1   :  { %v1631_v7 = vpack.c.bf16 %v6413_v32, %v6412_v37  ;;  %v1630_v40 = vpack.c.bf16 %v6395_v26, %v6394_v56  ;;  %v1572_v41 = vpop.f32.mrb[47].mxu1  ;;  %v1411_v42 = vpop.f32.mrb[51].mxu0  ;;  %v446_v37 = vld [vmem:[%s9322_s20 + $0x58] sm:$0xff]  ;;  %v558_v56 = vld [vmem:[%s9323_s1 + $0x8] sm:$0xff]  ;;  %v441_v32 = vld [vmem:[%s9322_s20 + $0x30] sm:$0xff] }
 0x4d2   :  { %v1629_v36 = vpack.c.bf16 %v1572_v41, %v1569_v15  ;;  %v1628_v35 = vpack.c.bf16 %v1411_v42, %v1408_v5  ;;  %v439_v15 = vld [vmem:[%s9322_s20 + $0x20] sm:$0xff]  ;;  %v440_v5 = vld [vmem:[%s9322_s20 + $0x28] sm:$0xff]  ;;  %v442_v26 = vld [vmem:[%s9322_s20 + $0x38] sm:$0xff] }
 0x4d3   :  { %6423 = vmatpush3.bf16.msra.mxu1 %v6855_v44  ;;  %518 = vperm.xlu0 %6790, %v448_v46   ;;  %v8185_v41 = vld [vmem:[#allocation19] ss:$0 sm:$0xff] }
 0x4d5   :  { %1792 = vmatmul.mubr.bf16.gmra.mrb[64].mxu0 %v1622_v39  ;;  %v437_v39 = vld [vmem:[%s9322_s20 + $0x10] sm:$0xff] }
 0x4d6   :  { %1799 = vmatprep.mubr.bf16.mxu0 %v1625_v0  ;;  %v6856_v0 = vld [vmem:[#allocation20 + $0x28] sm:$0xff]  }
 0x4d7   :  { %6424 = vmatprep.subr.bf16.mxu1 %v6856_v0 }
 0x4d8   :  { %6425 = vmatpush3.bf16.msra.mxu1 %v6856_v0 }
 0x4dd   :  { %1800 = vmatmul.mubr.bf16.gmra.mrb[68].mxu0 %v1624_v6  ;;  %v6857_v6 = vld [vmem:[#allocation20 + $0x30] sm:$0xff]  }
 0x4de   :  { %1807 = vmatprep.mubr.bf16.mxu0 %v1627_v51  ;;  %6426 = vmatprep.subr.bf16.mxu1 %v6857_v6  ;;  %v438_v51 = vld [vmem:[%s9322_s20 + $0x18] sm:$0xff] }
 0x4df   :  { %6427 = vmatpush3.bf16.msra.mxu1 %v6857_v6 }
 0x4e5   :  { %1808 = vmatmul.mubr.bf16.gmra.mrb[72].mxu0 %v1626_v53  ;;  %v449_v53 = vld [vmem:[%s9322_s20 + $0x70] sm:$0xff] }
 0x4e6   :  { %1815 = vmatprep.mubr.bf16.mxu0 %v1629_v36  ;;  %v444_v36 = vld [vmem:[%s9322_s20 + $0x48] sm:$0xff]  ;;  %523 = vperm.xlu0 %6790, %v449_v53  }
 0x4e7   :  { %498 = vperm.xlu1 %6791, %v444_v36  }
 0x4ea   :  { %528 = vperm.xlu0 %6790, %v450_v61  }
 0x4eb   :  { %463 = vperm.xlu1 %6791, %v437_v39  }
 0x4ed   :  { %1816 = vmatmul.mubr.bf16.gmra.mrb[76].mxu0 %v1628_v35  ;;  %v6858_v35 = vld [vmem:[#allocation20 + $0x38] sm:$0xff]  }
 0x4ee   :  { %1823 = vmatprep.mubr.bf16.mxu0 %v1631_v7  ;;  %6428 = vmatprep.subr.bf16.mxu1 %v6858_v35  ;;  %v557_v7 = vld [vmem:[%s9323_s1] sm:$0xff] }
 0x4ef   :  { %6429 = vmatpush3.bf16.msra.mxu1 %v6858_v35  ;;  %503 = vperm.xlu1 %6791, %v445_v45  }
 0x4f0   :  { %6446 = vmatprep.subr.bf16.mxu1 %v9321_v38  ;;  %565 = vperm.xlu0 %6790, %v558_v56  }
 0x4f3   :  { %453 = vperm.xlu1 %6791, %v435_v31  }
 0x4f5   :  { %1824 = vmatmul.mubr.bf16.gmra.mrb[80].mxu0 %v1630_v40 }
 0x4f6   :  { %6482 = vmatprep.mubr.msk.bf16.mxu0 %vm9286_vm2, %v9321_v38 }
 0x4f7   :  { %468 = vperm.xlu1 %6791, %v438_v51  }
 0x4fb   :  { %493 = vperm.xlu1 %6791, %v443_v55  }
 0x4ff   :  { %508 = vperm.xlu1 %6791, %v446_v37  }
 0x503   :  { %473 = vperm.xlu1 %6791, %v439_v15  }
 0x507   :  { %478 = vperm.xlu1 %6791, %v440_v5  }
 0x50b   :  { %483 = vperm.xlu1 %6791, %v441_v32  }
 0x50f   :  { %488 = vperm.xlu1 %6791, %v442_v26   ;;  %v6859_v26 = vld [vmem:[#allocation22] sm:$0xff]  }
 0x513   :  { %561 = vperm.xlu1 %6791, %v557_v7  }
 0x590   :  { %v6056_v40 = vpop.f32.mrb[52].mxu0 }
 0x591   :  { %v6057_v42 = vpop.f32.mrb[53].mxu0 }
 0x592   :  { %v6058_v43 = vadd.f32 %v6057_v42, %v6056_v40  ;;  %v6059_v44 = vpop.f32.mrb[54].mxu0 }
 0x593   :  { %v6060_v0 = vpop.f32.mrb[55].mxu0 }
 0x594   :  { %v1770_v6 = vadd.f32 %v6058_v43, %v8185_v41  ;;  %v6061_v35 = vadd.f32 %v6060_v0, %v6059_v44 }
 0x596   :  { %v1773_v36 = vadd.f32 %v6061_v35, %v8185_v41  ;;  %v1832_v39 = vmax.f32 %v1770_v6, 0.0  ;;  %v6860_v6 = vld [vmem:[#allocation22 + $0x8] sm:$0xff]  }
 0x598   :  { %v1833_v45 = vmax.f32 %v1773_v36, 0.0  ;;  %v6062_v48 = vpop.f32.mrb[56].mxu0 }
 0x599   :  { %v6063_v49 = vpop.f32.mrb[57].mxu0 }
 0x59a   :  { %v6064_v31 = vadd.f32 %v6063_v49, %v6062_v48  ;;  %v6065_v46 = vpop.f32.mrb[58].mxu0  ;;  %v1864_v51 = vpack.c.bf16 %v1833_v45, %v1832_v39  ;;  %v6861_v49 = vld [vmem:[#allocation22 + $0x10] sm:$0xff]  }
 0x59b   :  { %v6066_v53 = vpop.f32.mrb[59].mxu0 }
 0x59c   :  { %v1778_v55 = vadd.f32 %v6064_v31, %v8185_v41  ;;  %v6067_v61 = vadd.f32 %v6066_v53, %v6065_v46  ;;  %6430 = vmatprep.mubr.bf16.mxu1 %v1864_v51 }
 0x59e   :  { %v1781_v37 = vadd.f32 %v6067_v61, %v8185_v41  ;;  %v1834_v56 = vmax.f32 %v1778_v55, 0.0 }
 0x5a0   :  { %v1835_v15 = vmax.f32 %v1781_v37, 0.0  ;;  %v6068_v5 = vpop.f32.mrb[60].mxu0  ;;  %v6862_v37 = vld [vmem:[#allocation22 + $0x18] sm:$0xff]  }
 0x5a1   :  { %v6069_v32 = vpop.f32.mrb[61].mxu0 }
 0x5a2   :  { %v1865_v7 = vpack.c.bf16 %v1835_v15, %v1834_v56  ;;  %v6070_v40 = vadd.f32 %v6069_v32, %v6068_v5  ;;  %v6071_v42 = vpop.f32.mrb[62].mxu0 }
 0x5a3   :  { %v6072_v43 = vpop.f32.mrb[63].mxu0 }
 0x5a4   :  { %v1786_v44 = vadd.f32 %v6070_v40, %v8185_v41  ;;  %v6073_v0 = vadd.f32 %v6072_v43, %v6071_v42  ;;  %6431 = vmatmul.mubr.bf16.vlgmr.msra.gmra.mrb[48].mxu1 %v1865_v7  ;;  %v6863_v7 = vld [vmem:[#allocation22 + $0x20] sm:$0xff]  }
 0x5a5   :  { %6447 = vmatpush3.bf16.msra.mxu1 %v6859_v26 }
 0x5a6   :  { %v1789_v35 = vadd.f32 %v6073_v0, %v8185_v41  ;;  %6448 = vmatprep.subr.bf16.mxu1 %v9321_v38  ;;  %v1836_v36 = vmax.f32 %v1786_v44, 0.0 }
 0x5a8   :  { %v1837_v39 = vmax.f32 %v1789_v35, 0.0  ;;  %v6074_v45 = vpop.f32.mrb[64].mxu0  ;;  %v6864_v35 = vld [vmem:[#allocation22 + $0x28] sm:$0xff]  }
 0x5a9   :  { %v6075_v48 = vpop.f32.mrb[65].mxu0  ;;  %6449 = vmatpush3.bf16.msra.mxu1 %v6860_v6 }
 0x5aa   :  { %v6076_v31 = vadd.f32 %v6075_v48, %v6074_v45  ;;  %v6077_v46 = vpop.f32.mrb[66].mxu0  ;;  %v1866_v51 = vpack.c.bf16 %v1837_v39, %v1836_v36  ;;  %6450 = vmatprep.subr.bf16.mxu1 %v9321_v38 }
 0x5ab   :  { %v6078_v53 = vpop.f32.mrb[67].mxu0 }
 0x5ac   :  { %v1794_v55 = vadd.f32 %v6076_v31, %v8185_v41  ;;  %v6079_v61 = vadd.f32 %v6078_v53, %v6077_v46  ;;  %6434 = vmatprep.mubr.bf16.mxu1 %v1866_v51  ;;  %v6865_v31 = vld [vmem:[#allocation22 + $0x30] sm:$0xff]  }
 0x5ad   :  { %6451 = vmatpush3.bf16.msra.mxu1 %v6861_v49 }
 0x5ae   :  { %v1797_v56 = vadd.f32 %v6079_v61, %v8185_v41  ;;  %6452 = vmatprep.subr.bf16.mxu1 %v9321_v38  ;;  %v1838_v15 = vmax.f32 %v1794_v55, 0.0 }
 0x5b0   :  { %v1839_v5 = vmax.f32 %v1797_v56, 0.0  ;;  %v6080_v32 = vpop.f32.mrb[68].mxu0  ;;  %v6866_v56 = vld [vmem:[#allocation22 + $0x38] sm:$0xff]  }
 0x5b1   :  { %v6081_v26 = vpop.f32.mrb[69].mxu0  ;;  %6453 = vmatpush3.bf16.msra.mxu1 %v6862_v37 }
 0x5b2   :  { %v6082_v40 = vadd.f32 %v6081_v26, %v6080_v32  ;;  %v6083_v42 = vpop.f32.mrb[70].mxu0  ;;  %v1867_v43 = vpack.c.bf16 %v1839_v5, %v1838_v15  ;;  %6454 = vmatprep.subr.bf16.mxu1 %v9321_v38 }
 0x5b3   :  { %v6084_v44 = vpop.f32.mrb[71].mxu0 }
 0x5b4   :  { %v1802_v0 = vadd.f32 %v6082_v40, %v8185_v41  ;;  %v6085_v6 = vadd.f32 %v6084_v44, %v6083_v42  ;;  %6435 = vmatmul.mubr.bf16.gmra.mrb[52].mxu1 %v1867_v43 }
 0x5b5   :  { %6455 = vmatpush3.bf16.msra.mxu1 %v6863_v7 }
 0x5b6   :  { %v1805_v36 = vadd.f32 %v6085_v6, %v8185_v41  ;;  %6456 = vmatprep.subr.bf16.mxu1 %v9321_v38  ;;  %v1840_v39 = vmax.f32 %v1802_v0, 0.0 }
 0x5b8   :  { %v1841_v45 = vmax.f32 %v1805_v36, 0.0  ;;  %v6086_v48 = vpop.f32.mrb[72].mxu0 }
 0x5b9   :  { %v6087_v49 = vpop.f32.mrb[73].mxu0  ;;  %6457 = vmatpush3.bf16.msra.mxu1 %v6864_v35 }
 0x5ba   :  { %v6088_v46 = vadd.f32 %v6087_v49, %v6086_v48  ;;  %v6089_v51 = vpop.f32.mrb[74].mxu0  ;;  %v1868_v53 = vpack.c.bf16 %v1841_v45, %v1840_v39  ;;  %6458 = vmatprep.subr.bf16.mxu1 %v9321_v38 }
 0x5bb   :  { %v6090_v55 = vpop.f32.mrb[75].mxu0 }
 0x5bc   :  { %v1810_v61 = vadd.f32 %v6088_v46, %v8185_v41  ;;  %v6091_v37 = vadd.f32 %v6090_v55, %v6089_v51  ;;  %6438 = vmatprep.mubr.bf16.mxu1 %v1868_v53 }
 0x5bd   :  { %6459 = vmatpush3.bf16.msra.mxu1 %v6865_v31 }
 0x5be   :  { %v1813_v15 = vadd.f32 %v6091_v37, %v8185_v41  ;;  %6460 = vmatprep.subr.bf16.mxu1 %v9321_v38  ;;  %v1842_v5 = vmax.f32 %v1810_v61, 0.0 }
 0x5c0   :  { %v1843_v32 = vmax.f32 %v1813_v15, 0.0  ;;  %v6092_v26 = vpop.f32.mrb[76].mxu0 }
 0x5c1   :  { %v6093_v7 = vpop.f32.mrb[77].mxu0  ;;  %6461 = vmatpush3.bf16.msra.mxu1 %v6866_v56 }
 0x5c2   :  { %v6094_v40 = vadd.f32 %v6093_v7, %v6092_v26  ;;  %v6095_v42 = vpop.f32.mrb[78].mxu0  ;;  %v1869_v43 = vpack.c.bf16 %v1843_v32, %v1842_v5  ;;  %v9324_v5 = vmov 0   ;;  %v6867_v32 = vld [vmem:[#allocation23] sm:$0xff]   ;;  %v6868_v26 = vld [vmem:[#allocation23 + $0x8] sm:$0xff]   ;;  %v6870_v7 = vld [vmem:[#allocation23 + $0x18] sm:$0xff]  }
 0x5c3   :  { %v6096_v44 = vpop.f32.mrb[79].mxu0  ;;  %6467 = vmatpush3.bf16.msra.mxu0 %v6867_v32 }
 0x5c4   :  { %v1818_v0 = vadd.f32 %v6094_v40, %v8185_v41  ;;  %v6097_v6 = vadd.f32 %v6096_v44, %v6095_v42  ;;  %6439 = vmatmul.mubr.bf16.gmra.mrb[56].mxu1 %v1869_v43  ;;  %6468 = vmatprep.subr.bf16.mxu0 %v9321_v38  ;;  %v6872_v40 = vld [vmem:[#allocation23 + $0x28] sm:$0xff]   ;;  %v6873_v42 = vld [vmem:[#allocation23 + $0x30] sm:$0xff]   ;;  %v6874_v43 = vld [vmem:[#allocation23 + $0x38] sm:$0xff]  }
 0x5c5   :  { %v547_v44 = vld [vmem:[%s9325_s7] sm:$0xff] }
 0x5c6   :  { %v1821_v35 = vadd.f32 %v6097_v6, %v8185_v41  ;;  %v1844_v36 = vmax.f32 %v1818_v0, 0.0  ;;  %v548_v0 = vld [vmem:[%s9325_s7 + $0x8] sm:$0xff]  ;;  %551 = vperm.xlu1 %6791, %v547_v44  }
 0x5c7   :  { %6469 = vmatpush3.bf16.msra.mxu0 %v6868_v26  ;;  %555 = vperm.xlu0 %6790, %v548_v0   ;;  %v6875_v6 = vld [vmem:[%s9326_s14] ss:$12 sps:$4 sm:$0xff]  }
 0x5c8   :  { %v1845_v39 = vmax.f32 %v1821_v35, 0.0  ;;  %v6098_v45 = vpop.f32.mrb[80].mxu0  ;;  %6470 = vmatprep.subr.bf16.mxu0 %v9321_v38  ;;  %v6877_v35 = vld [vmem:[%s9326_s14 + $0x4] ss:$12 sps:$4 sm:$0xff]  }
 0x5c9   :  { %v6099_v48 = vpop.f32.mrb[81].mxu0  ;;  %2660 = vmatprep.subr.bf16.mxu1 %v6877_v35 }
 0x5ca   :  { %v6100_v49 = vadd.f32 %v6099_v48, %v6098_v45  ;;  %v6101_v31 = vpop.f32.mrb[82].mxu0  ;;  %v1870_v46 = vpack.c.bf16 %v1845_v39, %v1844_v36  ;;  %v6881_v36 = vld [vmem:[%s9326_s14 + $0x1c] ss:$12 sps:$4 sm:$0xff]   ;;  %v8227_v39 = vpop.permute.xlu1 %498  ;;  %v6879_v45 = vld [vmem:[%s9326_s14 + $0x18] ss:$12 sps:$4 sm:$0xff]  }
 0x5cb   :  { %v6102_v51 = vpop.f32.mrb[83].mxu0  ;;  %v6885_v48 = vld [vmem:[%s9326_s14 + $0x34] ss:$12 sps:$4 sm:$0xff]   ;;  %vm9253_vm0 = vcmp.gt.f32.partialorder %v8227_v39, 0.5 }
 0x5cc   :  { %v1826_v53 = vadd.f32 %v6100_v49, %v8185_v41  ;;  %v6103_v55 = vadd.f32 %v6102_v51, %v6101_v31  ;;  %6442 = vmatprep.mubr.bf16.mxu1 %v1870_v46  ;;  %v6883_v49 = vld [vmem:[%s9326_s14 + $0x30] ss:$12 sps:$4 sm:$0xff]   ;;  %v6889_v46 = vld [vmem:[%s9326_s14 + $0x4c] ss:$12 sps:$4 sm:$0xff]   ;;  %v6887_v51 = vld [vmem:[%s9326_s14 + $0x48] ss:$12 sps:$4 sm:$0xff]  }
 0x5ce   :  { %v1829_v61 = vadd.f32 %v6103_v55, %v8185_v41  ;;  %v1846_v37 = vmax.f32 %v1826_v53, 0.0  ;;  %v6869_v41 = vld [vmem:[#allocation23 + $0x10] sm:$0xff]   ;;  %v8232_v31 = vpop.permute.xlu1 %463 }
 0x5cf   :  { %6471 = vmatpush3.bf16.msra.mxu0 %v6869_v41  ;;  %9327 = vst [vmem:[#allocation67_spill] sm:$0xff] %v8232_v31  ;;  %v6893_v53 = vld [vmem:[%s9326_s14 + $0x64] ss:$12 sps:$4 sm:$0xff]   ;;  %vm533_vm5 = vcmp.gt.f32.partialorder %v8232_v31, 0.5 }
 0x5d0   :  { %v1847_v56 = vmax.f32 %v1829_v61, 0.0  ;;  %6472 = vmatprep.subr.bf16.mxu0 %v9321_v38  ;;  %v6891_v61 = vld [vmem:[%s9326_s14 + $0x60] ss:$12 sps:$4 sm:$0xff]  }
 0x5d2   :  { %v1871_v15 = vpack.c.bf16 %v1847_v56, %v1846_v37  ;;  %v8237_v55 = vpop.permute.xlu1 %503  ;;  %v6897_v37 = vld [vmem:[%s9326_s14 + $0x7c] ss:$12 sps:$4 sm:$0xff]   ;;  %v6895_v56 = vld [vmem:[%s9326_s14 + $0x78] ss:$12 sps:$4 sm:$0xff]  }
 0x5d3   :  { %6473 = vmatpush3.bf16.msra.mxu0 %v6870_v7  ;;  %vm9256_vm1 = vcmp.gt.f32.partialorder %v8237_v55, 0.5 }
 0x5d4   :  { %6443 = vmatmul.mubr.bf16.gmra.mrb[60].mxu1 %v1871_v15  ;;  %6474 = vmatprep.subr.bf16.mxu0 %v9321_v38 }
 0x5d5   :  { %6462 = vmatprep.mubr.msk.bf16.mxu1 %vm9286_vm2, %v9321_v38 }
 0x5d6   :  { %v8242_v15 = vpop.permute.xlu1 %453 }
 0x5d7   :  { %9329 = vst [vmem:[#allocation68_spill] sm:$0xff] %v8242_v15  ;;  %vm531_vm6 = vcmp.gt.f32.partialorder %v8242_v15, 0.5 }
 0x5da   :  { %v8244_v32 = vpop.permute.xlu1 %468 }
 0x5db   :  { %9330 = vst [vmem:[#allocation69_spill] sm:$0xff] %v8244_v32  ;;  %vm534_vm7 = vcmp.gt.f32.partialorder %v8244_v32, 0.5 }
 0x5dc   :  { %6463 = vmatmul.mubr.bf16.vlgmr.msra.gmra.mrb[64].mxu1 %v8113_v54  ;;  %v6871_v54 = vld [vmem:[#allocation23 + $0x20] sm:$0xff]  }
 0x5dd   :  { %2692 = vmatprep.mubr.bf16.mxu1 %v9324_v5  ;;  %6475 = vmatpush3.bf16.msra.mxu0 %v6871_v54 }
 0x5de   :  { %6476 = vmatprep.subr.bf16.mxu0 %v9321_v38  ;;  %2661 = vmatpush1.bf16.msra.mxu1 %v6875_v6  ;;  %v8246_v26 = vpop.permute.xlu1 %493 }
 0x5df   :  { %2662 = vmatprep.subr.bf16.mxu1 %v6881_v36  ;;  %vm9255_vm3 = vcmp.gt.f32.partialorder %v8246_v26, 0.5 }
 0x5e1   :  { %6477 = vmatpush3.bf16.msra.mxu0 %v6872_v40  ;;  %v8254_v40 = vld [vmem:[#allocation17] ss:$0 sm:$0xff] }
 0x5e2   :  { %6478 = vmatprep.subr.bf16.mxu0 %v9321_v38  ;;  %2663 = vmatpush1.bf16.msra.mxu1 %v6879_v45  ;;  %v8248_v41 = vpop.permute.xlu1 %508  ;;  %v924_v0 = vadd.f32 %v8045_v57, %v8254_v40  ;;  %v916_v36 = vadd.f32 %v8254_v40, %v8047_v58 }
 0x5e3   :  { %2664 = vmatprep.subr.bf16.mxu1 %v6885_v48 }
 0x5e5   :  { %6479 = vmatpush3.bf16.msra.mxu0 %v6873_v42  ;;  %v8257_v42 = vld [vmem:[%s9328_s10] ss:$0 sm:$0xff] }
 0x5e6   :  { %6480 = vmatprep.subr.bf16.mxu0 %v9321_v38  ;;  %2665 = vmatpush1.bf16.msra.mxu1 %v6883_v49  ;;  %v8250_v7 = vpop.permute.xlu1 %473  ;;  %v8268_v49 = vpop.permute.xlu0 %458 }
 0x5e7   :  { %2666 = vmatprep.subr.bf16.mxu1 %v6889_v46  ;;  %9332 = vst [vmem:[#allocation71_spill] sm:$0xff] %v8268_v49  ;;  %v927_v46 = vadd.f32 %v8049_v59, %v8254_v40  ;;  %vm9252_vm8 = vcmp.gt.f32.partialorder %v8268_v49, 0.5  ;;  %vm9248_vm9 = vcmp.gt.f32.partialorder %v8250_v7, 0.5 }
 0x5e9   :  { %6481 = vmatpush3.bf16.msra.mxu0 %v6874_v43 }
 0x5ea   :  { %6486 = vmatprep.subr.bf16.mxu0 %v9321_v38  ;;  %2667 = vmatpush1.bf16.msra.mxu1 %v6887_v51  ;;  %v8252_v54 = vpop.permute.xlu1 %478 }
 0x5eb   :  { %2668 = vmatprep.subr.bf16.mxu1 %v6893_v53  ;;  %9331 = vst [vmem:[#allocation70_spill] sm:$0xff] %v8252_v54  ;;  %vm9246_vm10 = vcmp.gt.f32.partialorder %v8252_v54, 0.5 }
 0x5ee   :  { %2669 = vmatpush1.bf16.msra.mxu1 %v6891_v61  ;;  %v8259_v44 = vpop.permute.xlu1 %483  ;;  %v919_v61 = vadd.f32 %v8254_v40, %v8051_v60 }
 0x5ef   :  { %2670 = vmatprep.subr.bf16.mxu1 %v6897_v37  ;;  %vm9249_vm11 = vcmp.gt.f32.partialorder %v8259_v44, 0.5 }
 0x5f2   :  { %2671 = vmatpush1.bf16.msra.mxu1 %v6895_v56 }
 0x677   :  { %v6432_v43 = vpop.f32.mrb[48].mxu1 }
 0x678   :  { %v1970_v6 = vadd.f32 %v6432_v43, %v8257_v42  ;;  %v1961_v35 = vpop.f32.mrb[49].mxu1 }
 0x679   :  { %v1962_v45 = vadd.f32 %v8257_v42, %v1961_v35  ;;  %v6433_v48 = vpop.f32.mrb[50].mxu1  ;;  %v8283_v35 = vpop.permute.xlu1 %488 }
 0x67a   :  { %v2026_v51 = vmul.f32 %v1970_v6, %v924_v0  ;;  %v1973_v57 = vadd.f32 %v6433_v48, %v8257_v42  ;;  %v1964_v53 = vpop.f32.mrb[51].mxu1  ;;  %9333 = vst [vmem:[#allocation72_spill] sm:$0xff] %v8283_v35  ;;  %vm9247_vm12 = vcmp.gt.f32.partialorder %v8283_v35, 0.5 }
 0x67b   :  { %v2024_v58 = vmul.f32 %v1962_v45, %v916_v36  ;;  %v1965_v37 = vadd.f32 %v8257_v42, %v1964_v53 }
 0x67c   :  { %v2042_v56 = vsel %vm533_vm5, %v2026_v51, -1e+30  ;;  %v2027_v43 = vmul.f32 %v1973_v57, %v927_v46 }
 0x67d   :  { %v2068_v59 = vrot.slane %v2042_v56, 4  ;;  %v2040_v0 = vsel %vm531_vm6, %v2024_v58, -1e+30  ;;  %v2025_v6 = vmul.f32 %v1965_v37, %v919_v61  ;;  %v8289_v61 = vpop.permute.xlu1 %561  ;;  %v940_v37 = vadd.f32 %v8053_v62, %v8254_v40 }
 0x67e   :  { %v2056_v48 = vrot.slane %v2040_v0, 4  ;;  %v2043_v60 = vsel %vm534_vm7, %v2027_v43, -1e+30  ;;  %9334 = vst [vmem:[#allocation73_spill] sm:$0xff] %v8289_v61  ;;  %v9342_v54 = vrot.slane %v8289_v61, 5 }
 0x67f   :  { %v2069_v36 = vmax.f32 %v2042_v56, %v2068_v59  ;;  %v2074_v45 = vrot.slane %v2043_v60, 4  ;;  %v2041_v53 = vsel %vm9252_vm8, %v2025_v6, -1e+30  ;;  %v932_v56 = vadd.f32 %v8254_v40, %v8055_v63 }
 0x680   :  { %v2057_v51 = vmax.f32 %v2040_v0, %v2056_v48  ;;  %v2062_v46 = vrot.slane %v2041_v53, 4  ;;  %v943_v0 = vadd.f32 %v8057_v1, %v8254_v40  ;;  %v935_v6 = vadd.f32 %v8254_v40, %v8059_v2 }
 0x681   :  { %v2070_v57 = vrot.slane %v2069_v36, 2  ;;  %v2075_v31 = vmax.f32 %v2043_v60, %v2074_v45  ;;  %v9335_v1 = vrot.slane %v8289_v61, 2  ;;  %vm9288_vm8 = vcmask 1047559  }
 0x682   :  { %v2058_v34 = vrot.slane %v2057_v51, 2  ;;  %v2063_v33 = vmax.f32 %v2041_v53, %v2062_v46 }
 0x683   :  { %v2071_v15 = vmax.f32 %v2069_v36, %v2070_v57  ;;  %v2076_v58 = vrot.slane %v2075_v31, 2 }
 0x684   :  { %v2059_v43 = vmax.f32 %v2057_v51, %v2058_v34  ;;  %v2064_v59 = vrot.slane %v2063_v33, 2 }
 0x685   :  { %v2072_v48 = vrot.slane %v2071_v15, 1  ;;  %v2077_v60 = vmax.f32 %v2075_v31, %v2076_v58 }
 0x686   :  { %v2060_v36 = vrot.slane %v2059_v43, 1  ;;  %v2065_v45 = vmax.f32 %v2063_v33, %v2064_v59 }
 0x687   :  { %v2073_v62 = vmax.f32 %v2071_v15, %v2072_v48  ;;  %v2078_v46 = vrot.slane %v2077_v60, 1  ;;  %v6436_v63 = vpop.f32.mrb[52].mxu1 }
 0x688   :  { %v2066_v51 = vrot.slane %v2065_v45, 1  ;;  %v1986_v2 = vadd.f32 %v6436_v63, %v8257_v42  ;;  %v1977_v31 = vpop.f32.mrb[53].mxu1  ;;  %v2061_v58 = vmax.f32 %v2059_v43, %v2060_v36  ;;  %v9337_v43 = vrot.slane %v8289_v61, 1 }
 0x689   :  { %v2079_v57 = vmax.f32 %v2077_v60, %v2078_v46  ;;  %v1978_v33 = vadd.f32 %v8257_v42, %v1977_v31  ;;  %v6437_v15 = vpop.f32.mrb[54].mxu1  ;;  %v2184_v63 = vmul.f32 %v9335_v1, %v2073_v62  ;;  %v8314_v31 = vpop.permute.xlu0 %513 }
 0x68a   :  { %v2067_v59 = vmax.f32 %v2065_v45, %v2066_v51  ;;  %v2030_v48 = vmul.f32 %v1986_v2, %v940_v37  ;;  %v1989_v34 = vadd.f32 %v6437_v15, %v8257_v42  ;;  %v1980_v53 = vpop.f32.mrb[55].mxu1  ;;  %9336 = vst [vmem:[#allocation74_spill] sm:$0xff] %v8314_v31  ;;  %v9338_v37 = vrot.slane %v8289_v61, 3 }
 0x68b   :  { %v2028_v49 = vmul.f32 %v1978_v33, %v932_v56  ;;  %v1981_v32 = vadd.f32 %v8257_v42, %v1980_v53 }
 0x68c   :  { %v2046_v60 = vsel %vm9249_vm11, %v2030_v48, -1e+30  ;;  %v2031_v46 = vmul.f32 %v1989_v34, %v943_v0  ;;  %v2183_v36 = vmul.f32 %v9337_v43, %v2067_v59  ;;  %v2185_v45 = vmul.f32 %v9338_v37, %v2079_v57 }
 0x68d   :  { %v2092_v51 = vrot.slane %v2046_v60, 4  ;;  %v2044_v56 = vsel %vm9248_vm9, %v2028_v49, -1e+30  ;;  %v2029_v53 = vmul.f32 %v1981_v32, %v935_v6  ;;  %v2182_v0 = vmul.f32 %v2061_v58, %v8289_v61 }
 0x68e   :  { %v2080_v62 = vrot.slane %v2044_v56, 4  ;;  %v2047_v1 = vsel %vm9247_vm12, %v2031_v46, -1e+30  ;;  %v2441_v34 = vrot.slane %v2183_v36, 7  ;;  %v2444_v59 = vrot.slane %v2184_v63, 6 }
 0x68f   :  { %v2093_v2 = vmax.f32 %v2046_v60, %v2092_v51  ;;  %v2098_v33 = vrot.slane %v2047_v1, 4  ;;  %v2045_v15 = vsel %vm9246_vm10, %v2029_v53, -1e+30  ;;  %v2447_v49 = vrot.slane %v2185_v45, 5  ;;  %v8333_v51 = vpop.permute.xlu0 %518 }
 0x690   :  { %v2081_v57 = vmax.f32 %v2044_v56, %v2080_v62  ;;  %v2086_v48 = vrot.slane %v2045_v15, 4  ;;  %v2443_v43 = vsel %vm2442_vm13, %v2441_v34, %v2182_v0  ;;  %v956_v32 = vadd.f32 %v8061_v3, %v8254_v40  ;;  %9339 = vst [vmem:[#allocation75_spill] sm:$0xff] %v8333_v51 }
 0x691   :  { %v2094_v6 = vrot.slane %v2093_v2, 2  ;;  %v2099_v37 = vmax.f32 %v2047_v1, %v2098_v33  ;;  %v2446_v46 = vsel %vm2445_vm14, %v2444_v59, %v2443_v43  ;;  %v948_v58 = vadd.f32 %v8254_v40, %v8063_v4 }
 0x692   :  { %v2082_v60 = vrot.slane %v2081_v57, 2  ;;  %v2087_v36 = vmax.f32 %v2045_v15, %v2086_v48  ;;  %v2449_v63 = vsel %vm2448_vm15, %v2447_v49, %v2446_v46  ;;  %v959_v56 = vadd.f32 %v8067_v8, %v8254_v40 }
 0x693   :  { %v951_v45 = vadd.f32 %v8254_v40, %v8069_v9  ;;  %v2095_v3 = vmax.f32 %v2093_v2, %v2094_v6  ;;  %v2100_v53 = vrot.slane %v2099_v37, 2  ;;  %vm9254_vm10 = vcmp.gt.f32.partialorder %v8248_v41, 0.5 }
 0x694   :  { %v2083_v62 = vmax.f32 %v2081_v57, %v2082_v60  ;;  %v2088_v4 = vrot.slane %v2087_v36, 2  ;;  %v9265_v33 = vrot.slane %v8289_v61, 4  ;;  %v8349_v60 = vpop.permute.xlu0 %523  ;;  %vm2451_vm12 = vcmask 1044484  }
 0x695   :  { %v2096_v1 = vrot.slane %v2095_v3, 1  ;;  %v2101_v0 = vmax.f32 %v2099_v37, %v2100_v53  ;;  %vm2454_vm9 = vcmask 1045509   ;;  %vm2457_vm11 = vcmask 1046534  }
 0x696   :  { %v2084_v8 = vrot.slane %v2083_v62, 1  ;;  %v2089_v9 = vmax.f32 %v2087_v36, %v2088_v4 }
 0x697   :  { %v2097_v2 = vmax.f32 %v2095_v3, %v2096_v1  ;;  %v2102_v15 = vrot.slane %v2101_v0, 1  ;;  %v6440_v48 = vpop.f32.mrb[56].mxu1 }
 0x698   :  { %v2085_v43 = vmax.f32 %v2083_v62, %v2084_v8  ;;  %v2090_v49 = vrot.slane %v2089_v9, 1  ;;  %v2002_v6 = vadd.f32 %v6440_v48, %v8257_v42  ;;  %v1993_v46 = vpop.f32.mrb[57].mxu1  ;;  %v9340_v8 = vrot.slane %v8289_v61, 6 }
 0x699   :  { %v2103_v37 = vmax.f32 %v2101_v0, %v2102_v15  ;;  %v1994_v53 = vadd.f32 %v8257_v42, %v1993_v46  ;;  %v6441_v34 = vpop.f32.mrb[58].mxu1  ;;  %v9341_v0 = vrot.slane %v8289_v61, 7 }
 0x69a   :  { %v2186_v36 = vmul.f32 %v9265_v33, %v2085_v43  ;;  %v2091_v3 = vmax.f32 %v2089_v9, %v2090_v49  ;;  %v2034_v4 = vmul.f32 %v2002_v6, %v956_v32  ;;  %v2005_v62 = vadd.f32 %v6441_v34, %v8257_v42  ;;  %v1996_v1 = vpop.f32.mrb[59].mxu1 }
 0x69b   :  { %v2188_v48 = vmul.f32 %v9340_v8, %v2097_v2  ;;  %v2032_v59 = vmul.f32 %v1994_v53, %v948_v58  ;;  %v1997_v57 = vadd.f32 %v8257_v42, %v1996_v1  ;;  %v2189_v15 = vmul.f32 %v9341_v0, %v2103_v37  ;;  %v8368_v37 = vpop.permute.xlu0 %528 }
 0x69c   :  { %v2450_v46 = vrot.slane %v2186_v36, 4  ;;  %v2187_v35 = vmul.f32 %v9342_v54, %v2091_v3  ;;  %v2050_v9 = vsel %vm9256_vm1, %v2034_v4, -1e+30  ;;  %v2035_v32 = vmul.f32 %v2005_v62, %v959_v56  ;;  %9343 = vst [vmem:[#allocation76_spill] sm:$0xff] %v8368_v37 }
 0x69d   :  { %v2116_v43 = vrot.slane %v2050_v9, 4  ;;  %v2048_v34 = vsel %vm9255_vm3, %v2032_v59, -1e+30  ;;  %v2033_v49 = vmul.f32 %v1997_v57, %v951_v45  ;;  %v2456_v54 = vrot.slane %v2188_v48, 2 }
 0x69e   :  { %v2453_v58 = vrot.slane %v2187_v35, 3  ;;  %v2104_v2 = vrot.slane %v2048_v34, 4  ;;  %v2051_v6 = vsel %vm9254_vm10, %v2035_v32, -1e+30  ;;  %v2452_v53 = vsel %vm2451_vm12, %v2450_v46, %v2449_v63 }
 0x69f   :  { %v2117_v36 = vmax.f32 %v2050_v9, %v2116_v43  ;;  %v2122_v3 = vrot.slane %v2051_v6, 4  ;;  %v2049_v56 = vsel %vm9253_vm0, %v2033_v49, -1e+30  ;;  %v2459_v59 = vrot.slane %v2189_v15, 1  ;;  %v8378_v43 = vpop.permute.xlu0 %565 }
 0x6a0   :  { %v2105_v4 = vmax.f32 %v2048_v34, %v2104_v2  ;;  %v2110_v62 = vrot.slane %v2049_v56, 4  ;;  %v2455_v45 = vsel %vm2454_vm9, %v2453_v58, %v2452_v53  ;;  %9344 = vst [vmem:[#allocation77_spill] sm:$0xff] %v8378_v43  ;;  %v972_v34 = vadd.f32 %v8073_v10, %v8254_v40 }
 0x6a1   :  { %v2118_v35 = vrot.slane %v2117_v36, 2  ;;  %v2123_v57 = vmax.f32 %v2051_v6, %v2122_v3  ;;  %v2458_v1 = vsel %vm2457_vm11, %v2456_v54, %v2455_v45  ;;  %v964_v58 = vadd.f32 %v8254_v40, %v8075_v11 }
 0x6a2   :  { %v2106_v8 = vrot.slane %v2105_v4, 2  ;;  %v2111_v0 = vmax.f32 %v2049_v56, %v2110_v62  ;;  %v8376_v32 = vsel %vm9288_vm8, %v2459_v59, %v2458_v1  ;;  %v975_v2 = vadd.f32 %v8077_v12, %v8254_v40 }
 0x6a3   :  { %v2119_v63 = vmax.f32 %v2117_v36, %v2118_v35  ;;  %v2124_v48 = vrot.slane %v2123_v57, 2  ;;  %v967_v54 = vadd.f32 %v8254_v40, %v8079_v13  ;;  %vm543_vm0 = vcmp.gt.f32.partialorder %v8314_v31, 0.5 }
 0x6a4   :  { %v2107_v46 = vmax.f32 %v2105_v4, %v2106_v8  ;;  %v2112_v9 = vrot.slane %v2111_v0, 2  ;;  %v9264_v4 = vrot.slane %v8378_v43, 2  ;;  %v9257_v62 = vrot.slane %v8378_v43, 1 }
 0x6a5   :  { %v2120_v49 = vrot.slane %v2119_v63, 1  ;;  %v2125_v15 = vmax.f32 %v2123_v57, %v2124_v48  ;;  %vm545_vm10 = vcmp.gt.f32.partialorder %v8349_v60, 0.5  ;;  %v9258_v13 = vrot.slane %v8378_v43, 3 }
 0x6a6   :  { %v2108_v6 = vrot.slane %v2107_v46, 1  ;;  %v2113_v53 = vmax.f32 %v2111_v0, %v2112_v9  ;;  %vm546_vm3 = vcmp.gt.f32.partialorder %v8368_v37, 0.5  ;;  %vm544_vm1 = vcmp.gt.f32.partialorder %v8333_v51, 0.5 }
 0x6a7   :  { %v2121_v36 = vmax.f32 %v2119_v63, %v2120_v49  ;;  %v2126_v3 = vrot.slane %v2125_v15, 1  ;;  %v6444_v56 = vpop.f32.mrb[60].mxu1 }
 0x6a8   :  { %v2114_v10 = vrot.slane %v2113_v53, 1  ;;  %v2018_v11 = vadd.f32 %v6444_v56, %v8257_v42  ;;  %v2009_v45 = vpop.f32.mrb[61].mxu1  ;;  %v2109_v40 = vmax.f32 %v2107_v46, %v2108_v6 }
 0x6a9   :  { %v2127_v59 = vmax.f32 %v2125_v15, %v2126_v3  ;;  %v2010_v12 = vadd.f32 %v8257_v42, %v2009_v45  ;;  %v6445_v35 = vpop.f32.mrb[62].mxu1  ;;  %v2192_v9 = vmul.f32 %v9264_v4, %v2121_v36 }
 0x6aa   :  { %v2115_v57 = vmax.f32 %v2113_v53, %v2114_v10  ;;  %v2038_v1 = vmul.f32 %v2018_v11, %v972_v34  ;;  %v2021_v8 = vadd.f32 %v6445_v35, %v8257_v42  ;;  %v2012_v0 = vpop.f32.mrb[63].mxu1  ;;  %v2190_v56 = vmul.f32 %v2109_v40, %v8378_v43 }
 0x6ab   :  { %v2036_v63 = vmul.f32 %v2010_v12, %v964_v58  ;;  %v2013_v48 = vadd.f32 %v8257_v42, %v2012_v0  ;;  %v5747_v58 = vld [vmem:[%s9345_s27] ss:$0 sm:$0xff]  ;;  %v2193_v42 = vmul.f32 %v9258_v13, %v2127_v59  ;;  %v2464_v35 = vrot.slane %v2192_v9, 6 }
 0x6ac   :  { %v2054_v49 = vsel %vm545_vm10, %v2038_v1, -1e+30  ;;  %v2039_v46 = vmul.f32 %v2021_v8, %v975_v2  ;;  %v2191_v34 = vmul.f32 %v9257_v62, %v2115_v57 }
 0x6ad   :  { %v2140_v15 = vrot.slane %v2054_v49, 4  ;;  %v2052_v6 = vsel %vm543_vm0, %v2036_v63, -1e+30  ;;  %v2037_v53 = vmul.f32 %v2013_v48, %v967_v54 }
 0x6ae   :  { %v2128_v3 = vrot.slane %v2052_v6, 4  ;;  %v2055_v36 = vsel %vm546_vm3, %v2039_v46, -1e+30  ;;  %v2462_v10 = vrot.slane %v2191_v34, 7  ;;  %v2466_v46 = vrot.slane %v2193_v42, 5 }
 0x6af   :  { %v2141_v2 = vmax.f32 %v2054_v49, %v2140_v15  ;;  %v2146_v11 = vrot.slane %v2055_v36, 4  ;;  %v2053_v45 = vsel %vm544_vm1, %v2037_v53, -1e+30  ;;  %v2303_v12 = vpop.f32.mrb[64].mxu1 }
 0x6b0   :  { %v2129_v57 = vmax.f32 %v2052_v6, %v2128_v3  ;;  %v2134_v54 = vrot.slane %v2053_v45, 4  ;;  %v2304_v1 = vadd.f32 %v5747_v58, %v2303_v12  ;;  %v6464_v8 = vpop.f32.mrb[65].mxu1  ;;  %v2463_v59 = vsel %vm2442_vm13, %v2462_v10, %v2190_v56 }
 0x6b1   :  { %v2142_v0 = vrot.slane %v2141_v2, 2  ;;  %v2147_v63 = vmax.f32 %v2055_v36, %v2146_v11  ;;  %v2306_v48 = vpop.f32.mrb[66].mxu1  ;;  %v2465_v40 = vsel %vm2445_vm14, %v2464_v35, %v2463_v59  ;;  %v6878_v36 = vld [vmem:[%s9326_s14 + $0x8] ss:$12 sps:$4 sm:$0xff]   ;;  %v9262_v35 = vrot.slane %v8378_v43, 4 }
 0x6b2   :  { %v2130_v49 = vrot.slane %v2129_v57, 2  ;;  %v2135_v34 = vmax.f32 %v2053_v45, %v2134_v54  ;;  %v2307_v15 = vadd.f32 %v5747_v58, %v2306_v48  ;;  %v6465_v62 = vpop.f32.mrb[67].mxu1  ;;  %v2467_v9 = vsel %vm2448_vm15, %v2466_v46, %v2465_v40 }
 0x6b3   :  { %v2143_v53 = vmax.f32 %v2141_v2, %v2142_v0  ;;  %v2148_v13 = vrot.slane %v2147_v63, 2  ;;  %v2310_v12 = vmax.f32 %v2304_v1, 0.0  ;;  %v9263_v62 = vrot.slane %v8378_v43, 6  ;;  %v6882_v0 = vld [vmem:[%s9326_s14 + $0x20] ss:$12 sps:$4 sm:$0xff]  }
 0x6b4   :  { %v2131_v6 = vmax.f32 %v2129_v57, %v2130_v49  ;;  %v2136_v3 = vrot.slane %v2135_v34, 2  ;;  %v2311_v8 = vmax.f32 %v2307_v15, 0.0  ;;  %v9260_v57 = vrot.slane %v8378_v43, 5  ;;  %v6886_v15 = vld [vmem:[%s9326_s14 + $0x38] ss:$12 sps:$4 sm:$0xff]  }
 0x6b5   :  { %v2144_v56 = vrot.slane %v2143_v53, 1  ;;  %v2149_v10 = vmax.f32 %v2147_v63, %v2148_v13  ;;  %v9261_v1 = vrot.slane %v8378_v43, 7 }
 0x6b6   :  { %v2132_v11 = vrot.slane %v2131_v6, 1  ;;  %v2137_v42 = vmax.f32 %v2135_v34, %v2136_v3  ;;  %v2328_v59 = vpack.c.bf16 %v2311_v8, %v2310_v12 }
 0x6b7   :  { %v2145_v45 = vmax.f32 %v2143_v53, %v2144_v56  ;;  %v2150_v58 = vrot.slane %v2149_v10, 1  ;;  %v6890_v56 = vld [vmem:[%s9326_s14 + $0x50] ss:$12 sps:$4 sm:$0xff]  }
 0x6b8   :  { %v2133_v2 = vmax.f32 %v2131_v6, %v2132_v11  ;;  %v2138_v54 = vrot.slane %v2137_v42, 1  ;;  %6483 = vmatmul.mubr.bf16.vlgmr.msra.gmra.mrb[84].mxu0 %v2328_v59  ;;  %v6894_v11 = vld [vmem:[%s9326_s14 + $0x68] ss:$12 sps:$4 sm:$0xff]   ;;  %v6899_v59 = vld [vmem:[%s9326_s14 + $0x90] ss:$12 sps:$4 sm:$0xff]  }
 0x6b9   :  { %v2151_v13 = vmax.f32 %v2149_v10, %v2150_v58  ;;  %6487 = vmatpush3.bf16.msra.mxu0 %v6878_v36  ;;  %6502 = vmatprep.mubr.msk.bf16.mxu0 %vm9286_vm2, %v9321_v38  ;;  %v2196_v40 = vmul.f32 %v9263_v62, %v2145_v45  ;;  %v6902_v45 = vld [vmem:[%s9326_s14 + $0x98] ss:$12 sps:$4 sm:$0xff]  }
 0x6ba   :  { %v2194_v63 = vmul.f32 %v9262_v35, %v2133_v2  ;;  %v2139_v48 = vmax.f32 %v2137_v42, %v2138_v54  ;;  %6488 = vmatprep.subr.bf16.mxu0 %v9321_v38  ;;  %v6901_v42 = vld [vmem:[%s9326_s14 + $0x94] ss:$12 sps:$4 sm:$0xff]   ;;  %v6905_v58 = vld [vmem:[%s9326_s14 + $0xac] ss:$12 sps:$4 sm:$0xff]   ;;  %v6906_v54 = vld [vmem:[%s9326_s14 + $0xb0] ss:$12 sps:$4 sm:$0xff]  }
 0x6bb   :  { %v2197_v34 = vmul.f32 %v9261_v1, %v2151_v13  ;;  %v2472_v3 = vrot.slane %v2196_v40, 2  ;;  %2672 = vmatprep.subr.bf16.mxu1 %v6901_v42  ;;  %v6903_v2 = vld [vmem:[%s9326_s14 + $0xa8] ss:$12 sps:$4 sm:$0xff]   ;;  %v5756_v13 = vld [vmem:[%s9346_s15] ss:$0 sm:$0xff] }
 0x6bc   :  { %v2468_v46 = vrot.slane %v2194_v63, 4  ;;  %v2195_v49 = vmul.f32 %v9260_v57, %v2139_v48  ;;  %2673 = vmatpush1.bf16.msra.mxu1 %v6899_v59  ;;  %v2478_v48 = vadd.f32 %v8376_v32, %v8027_v47  ;;  %v9259_v47 = vsub.s32 2, %v7973_v27  ;;  %v2515_v32 = vld [vmem:[%s9347_s16] sm:$0x7] }
 0x6bd   :  { %6489 = vmatpush3.bf16.msra.mxu0 %v6882_v0  ;;  %v2474_v8 = vrot.slane %v2197_v34, 1  ;;  %2674 = vmatprep.subr.bf16.mxu1 %v6905_v58 }
 0x6be   :  { %v2470_v53 = vrot.slane %v2195_v49, 3  ;;  %6490 = vmatprep.subr.bf16.mxu0 %v9321_v38  ;;  %v2469_v6 = vsel %vm2451_vm12, %v2468_v46, %v2467_v9  ;;  %v6898_v9 = vld [vmem:[%s9326_s14 + $0x80] ss:$12 sps:$4 sm:$0xff]  }
 0x6c0   :  { %v2471_v12 = vsel %vm2454_vm9, %v2470_v53, %v2469_v6  ;;  %2675 = vmatpush1.bf16.msra.mxu1 %v6903_v2 }
 0x6c1   :  { %6491 = vmatpush3.bf16.msra.mxu0 %v6886_v15  ;;  %v2473_v10 = vsel %vm2457_vm11, %v2472_v3, %v2471_v12  ;;  %v8465_v12 = vld [vmem:[%s9315_s28] sm:$0xff]  }
 0x6c2   :  { %6492 = vmatprep.subr.bf16.mxu0 %v9321_v38  ;;  %v2475_v36 = vsel %vm9288_vm8, %v2474_v8, %v2473_v10  ;;  %v2528_v8 = vrot.slane %v2515_v32, %v9259_v47 }
 0x6c3   :  { %v2479_v15 = vadd.f32 %v2475_v36, %v8031_v50  ;;  %v2520_v50 = vrot.slane %v2515_v32, %v7976_v28  ;;  %v2524_v36 = vrot.slane %v2515_v32, %v7979_v30  ;;  %v7118_v32 = vld [vmem:[%s9315_s28 + $0x10] sm:$0xff]  }
 0x6c5   :  { %6493 = vmatpush3.bf16.msra.mxu0 %v6890_v56 }
 0x6c6   :  { %6494 = vmatprep.subr.bf16.mxu0 %v9321_v38 }
 0x6c9   :  { %6495 = vmatpush3.bf16.msra.mxu0 %v6894_v11 }
 0x6ca   :  { %6496 = vmatprep.subr.bf16.mxu0 %v9321_v38 }
 0x6cd   :  { %6497 = vmatpush3.bf16.msra.mxu0 %v6898_v9 }
 0x6ce   :  { %6498 = vmatprep.subr.bf16.mxu0 %v9321_v38 }
 0x6d1   :  { %6499 = vmatpush3.bf16.msra.mxu0 %v6902_v45 }
 0x6d2   :  { %6500 = vmatprep.subr.bf16.mxu0 %v9321_v38 }
 0x6d5   :  { %6501 = vmatpush3.bf16.msra.mxu0 %v6906_v54 }
 0x78b   :  { %v2418_v0 = vpop.f32.mrb[84].mxu0 }
 0x78c   :  { %v2419_v63 = vadd.f32 %v5756_v13, %v2418_v0  ;;  %v6484_v40 = vpop.f32.mrb[85].mxu0 }
 0x78d   :  { %v2421_v46 = vpop.f32.mrb[86].mxu0 }
 0x78e   :  { %v2480_v49 = vadd.f32 %v2478_v48, %v2419_v63  ;;  %v2422_v34 = vadd.f32 %v5756_v13, %v2421_v46  ;;  %v6485_v53 = vpop.f32.mrb[87].mxu0 }
 0x78f   :  { %v7117_v53 = vld [vmem:[%s9315_s28 + $0x8] sm:$0xff]  }
 0x790   :  { %v2481_v6 = vadd.f32 %v2479_v15, %v2422_v34  ;;  %v6907_v34 = vld [vmem:[#allocation25] sm:$0xff]   ;;  %v7116_v15 = vld [vmem:[%s9314_s4] sm:$0xff]  }
 0x792   :  { %v8459_v3 = vpack.c.bf16 %v2481_v6, %v2480_v49  ;;  %v6908_v6 = vld [vmem:[#allocation25 + $0x8] sm:$0xff]  }
 0x794   :  { %2693 = vmatmul.mubr.bf16.vlgmr.msra.gmra.mrb[68].mxu1 %v8459_v3  ;;  %6503 = vmatmul.mubr.bf16.vlgmr.msra.gmra.mrb[88].mxu0 %v8459_v3 }
 0x795   :  { %2779 = vmatprep.mubr.bf16.mxu1 %v9324_v5  ;;  %6508 = vmatprep.mubr.msk.bf16.mxu0 %vm1301_vm4, %v8465_v12 }
 0x867   :  { %v2694_v56 = vpop.f32.mrb[68].mxu1  ;;  %v2737_v10 = vpop.f32.mrb[88].mxu0 }
 0x868   :  { %v2696_v11 = vpop.f32.mrb[69].mxu1  ;;  %v6504_v9 = vpop.f32.mrb[89].mxu0  ;;  %v2695_v45 = vadd.f32 %v2694_v56, %v2520_v50  ;;  %v2738_v58 = vadd.f32 %v2737_v10, %v2528_v8  ;;  %v7120_v56 = vld [vmem:[%s9315_s28 + $0x18] sm:$0xff]   ;;  %v6910_v10 = vld [vmem:[#allocation25 + $0x18] sm:$0xff]  }
 0x869   :  { %v2698_v42 = vpop.f32.mrb[70].mxu1  ;;  %v2740_v59 = vpop.f32.mrb[90].mxu0  ;;  %v2697_v63 = vadd.f32 %v2696_v11, %v2524_v36  ;;  %v6911_v11 = vld [vmem:[#allocation25 + $0x20] sm:$0xff]  }
 0x86a   :  { %v2699_v2 = vadd.f32 %v2698_v42, %v2520_v50  ;;  %v2741_v54 = vadd.f32 %v2740_v59, %v2528_v8  ;;  %v2700_v13 = vpop.f32.mrb[71].mxu1  ;;  %v6505_v0 = vpop.f32.mrb[91].mxu0  ;;  %v6909_v50 = vld [vmem:[#allocation25 + $0x10] sm:$0xff]   ;;  %v7119_v8 = vld [vmem:[%s9314_s4 + $0x8] sm:$0xff]   ;;  %v7122_v9 = vld [vmem:[%s9314_s4 + $0x10] sm:$0xff]  }
 0x86b   :  { %v2701_v48 = vadd.f32 %v2700_v13, %v2524_v36  ;;  %v7121_v36 = vld [vmem:[%s9315_s28 + $0x20] sm:$0xff]   ;;  %v7123_v42 = vld [vmem:[%s9315_s28 + $0x28] sm:$0xff]   ;;  %v6912_v59 = vld [vmem:[#allocation25 + $0x28] sm:$0xff]  }
 0x86c   :  { %v2744_v40 = vpack.c.bf16 %v2699_v2, %v2695_v45  ;;  %v2746_v46 = vpack.c.bf16 %v2741_v54, %v2738_v58  ;;  %v7124_v45 = vld [vmem:[%s9315_s28 + $0x30] sm:$0xff]   ;;  %v6913_v58 = vld [vmem:[#allocation25 + $0x30] sm:$0xff]   ;;  %v6914_v13 = vld [vmem:[#allocation25 + $0x38] sm:$0xff]  }
 0x86d   :  { %v2745_v49 = vpack.c.bf16 %v2701_v48, %v2697_v63  ;;  %v7125_v2 = vld [vmem:[%s9314_s4 + $0x18] sm:$0xff]   ;;  %v7127_v0 = vld [vmem:[%s9314_s4 + $0x20] sm:$0xff]   ;;  %v7128_v63 = vld [vmem:[%s9314_s4 + $0x28] sm:$0xff]  }
 0x86e   :  { %2747 = vmatprep.subr.bf16.mxu1 %v2746_v46  ;;  %6506 = vmatprep.subr.bf16.mxu0 %v2744_v40  ;;  %v7126_v54 = vld [vmem:[%s9315_s28 + $0x38] sm:$0xff]   ;;  %v7129_v48 = vld [vmem:[%s9314_s4 + $0x30] sm:$0xff]  }
 0x86f   :  { %2748 = vmatpush1.bf16.msra.mxu1 %v2745_v49  ;;  %6507 = vmatpush3.bf16.msra.mxu0 %v2744_v40  ;;  %v7130_v40 = vld [vmem:[%s9314_s4 + $0x38] sm:$0xff]  }
 0x870   :  { %6524 = vmatprep.subr.bf16.mxu0 %v9321_v38 }
 0x872   :  { %5789 = vmatmul.mubr.msk.bf16.vlgmr.msra.gmra.mrb[72].mxu1 %vm1301_vm4, %v7116_v15  ;;  %6509 = vmatmul.mubr.msk.bf16.vlgmr.msra.gmra.mrb[92].mxu0 %vm1301_vm4, %v7117_v53 }
 0x873   :  { %6525 = vmatpush3.bf16.msra.mxu0 %v6907_v34  ;;  %2789 = vmatprep.mubr.bf16.mxu1 %v9324_v5 }
 0x874   :  { %6526 = vmatprep.subr.bf16.mxu0 %v9321_v38  ;;  %6512 = vmatprep.mubr.msk.bf16.mxu0 %vm1301_vm4, %v7118_v32 }
 0x877   :  { %6527 = vmatpush3.bf16.msra.mxu0 %v6908_v6 }
 0x878   :  { %6528 = vmatprep.subr.bf16.mxu0 %v9321_v38 }
 0x87a   :  { %5790 = vmatmul.mubr.msk.bf16.gmra.mrb[76].mxu1 %vm1301_vm4, %v7119_v8  ;;  %6513 = vmatmul.mubr.msk.bf16.gmra.mrb[96].mxu0 %vm1301_vm4, %v7120_v56 }
 0x87b   :  { %6529 = vmatpush3.bf16.msra.mxu0 %v6909_v50  ;;  %2799 = vmatprep.mubr.bf16.mxu1 %v9324_v5 }
 0x87c   :  { %6530 = vmatprep.subr.bf16.mxu0 %v9321_v38  ;;  %6516 = vmatprep.mubr.msk.bf16.mxu0 %vm1301_vm4, %v7121_v36 }
 0x87f   :  { %6531 = vmatpush3.bf16.msra.mxu0 %v6910_v10 }
 0x880   :  { %6532 = vmatprep.subr.bf16.mxu0 %v9321_v38 }
 0x882   :  { %5791 = vmatmul.mubr.msk.bf16.gmra.mrb[80].mxu1 %vm1301_vm4, %v7122_v9  ;;  %6517 = vmatmul.mubr.msk.bf16.gmra.mrb[100].mxu0 %vm1301_vm4, %v7123_v42 }
 0x883   :  { %6533 = vmatpush3.bf16.msra.mxu0 %v6911_v11  ;;  %2809 = vmatprep.mubr.bf16.mxu1 %v9324_v5 }
 0x884   :  { %6534 = vmatprep.subr.bf16.mxu0 %v9321_v38  ;;  %6520 = vmatprep.mubr.msk.bf16.mxu0 %vm1301_vm4, %v7124_v45 }
 0x887   :  { %6535 = vmatpush3.bf16.msra.mxu0 %v6912_v59 }
 0x888   :  { %6536 = vmatprep.subr.bf16.mxu0 %v9321_v38 }
 0x88a   :  { %5792 = vmatmul.mubr.msk.bf16.gmra.mrb[84].mxu1 %vm1301_vm4, %v7125_v2  ;;  %6521 = vmatmul.mubr.msk.bf16.gmra.mrb[104].mxu0 %vm1301_vm4, %v7126_v54 }
 0x88b   :  { %6537 = vmatpush3.bf16.msra.mxu0 %v6913_v58  ;;  %2819 = vmatprep.mubr.bf16.mxu1 %v9324_v5 }
 0x88c   :  { %6538 = vmatprep.subr.bf16.mxu0 %v9321_v38  ;;  %6540 = vmatprep.mubr.msk.bf16.mxu0 %vm9286_vm2, %v9321_v38 }
 0x88f   :  { %6539 = vmatpush3.bf16.msra.mxu0 %v6914_v13 }
 0x892   :  { %5793 = vmatmul.mubr.msk.bf16.gmra.mrb[88].mxu1 %vm1301_vm4, %v7127_v0  ;;  %6541 = vmatmul.mubr.bf16.vlgmr.msra.gmra.mrb[108].mxu0 %v8459_v3 }
 0x893   :  { %2829 = vmatprep.mubr.bf16.mxu1 %v9324_v5  ;;  %6546 = vmatprep.mubr.msk.bf16.mxu0 %vm1301_vm4, %v7116_v15 }
 0x89a   :  { %5794 = vmatmul.mubr.msk.bf16.gmra.mrb[92].mxu1 %vm1301_vm4, %v7128_v63 }
 0x89b   :  { %2839 = vmatprep.mubr.bf16.mxu1 %v9324_v5 }
 0x8a2   :  { %5795 = vmatmul.mubr.msk.bf16.gmra.mrb[96].mxu1 %vm1301_vm4, %v7129_v48 }
 0x8a3   :  { %2849 = vmatprep.mubr.bf16.mxu1 %v9324_v5 }
 0x8aa   :  { %5796 = vmatmul.mubr.msk.bf16.gmra.mrb[100].mxu1 %vm1301_vm4, %v7130_v40 }
 0x8ab   :  { %6564 = vmatprep.mubr.msk.bf16.mxu1 %vm1301_vm4, %v8465_v12 }
 0x945   :  { %v2781_v3 = vpop.f32.mrb[72].mxu1  ;;  %v6510_v46 = vpop.f32.mrb[92].mxu0 }
 0x946   :  { %v8526_v49 = vpop.f32.mrb[73].mxu1  ;;  %v2894_v34 = vpop.f32.mrb[93].mxu0 }
 0x947   :  { %v2895_v15 = vadd.f32 %v2894_v34, %v2781_v3  ;;  %v2785_v53 = vpop.f32.mrb[74].mxu1  ;;  %v6511_v6 = vpop.f32.mrb[94].mxu0 }
 0x948   :  { %v8528_v32 = vpop.f32.mrb[75].mxu1  ;;  %v2897_v50 = vpop.f32.mrb[95].mxu0 }
 0x949   :  { %v5805_v8 = vmul.f32 -1.442695, %v2895_v15  ;;  %v2898_v56 = vadd.f32 %v2897_v50, %v2785_v53 }
 0x94b   :  { %7031 = vpow2.f32 %v5805_v8  ;;  %v5806_v10 = vmul.f32 -1.442695, %v2898_v56 }
 0x94d   :  { %7033 = vpow2.f32 %v5806_v10  ;;  %v2791_v36 = vpop.f32.mrb[76].mxu1  ;;  %v6514_v11 = vpop.f32.mrb[96].mxu0 }
 0x94e   :  { %v2903_v9 = vadd.f32 %v6510_v46, %v2791_v36  ;;  %v8530_v12 = vpop.f32.mrb[77].mxu1  ;;  %v2910_v42 = vpop.f32.mrb[97].mxu0 }
 0x94f   :  { %v2795_v59 = vpop.f32.mrb[78].mxu1  ;;  %v6515_v45 = vpop.f32.mrb[98].mxu0 }
 0x950   :  { %v5807_v58 = vmul.f32 -1.442695, %v2903_v9  ;;  %v2906_v2 = vadd.f32 %v6511_v6, %v2795_v59  ;;  %v8532_v54 = vpop.f32.mrb[79].mxu1  ;;  %v2913_v13 = vpop.f32.mrb[99].mxu0 }
 0x952   :  { %7035 = vpow2.f32 %v5807_v58  ;;  %v5808_v0 = vmul.f32 -1.442695, %v2906_v2 }
 0x954   :  { %7037 = vpow2.f32 %v5808_v0 }
 0x955   :  { %v7032_v63 = vpop.eup %7031  ;;  %v2801_v48 = vpop.f32.mrb[80].mxu1 }
 0x956   :  { %v8534_v40 = vpop.f32.mrb[100].mxu0  ;;  %v3005_v3 = vadd.f32 1.0, %v7032_v63  ;;  %v2911_v34 = vadd.f32 %v2910_v42, %v2801_v48  ;;  %v8536_v46 = vpop.f32.mrb[81].mxu1 }
 0x957   :  { %v2926_v15 = vpop.f32.mrb[101].mxu0  ;;  %v7034_v53 = vpop.eup %7033 }
 0x958   :  { %v2805_v50 = vpop.f32.mrb[82].mxu1  ;;  %v8538_v8 = vpop.f32.mrb[102].mxu0  ;;  %7039 = vrcp.f32 %v3005_v3  ;;  %v3006_v6 = vadd.f32 1.0, %v7034_v53  ;;  %v5809_v56 = vmul.f32 -1.442695, %v2911_v34 }
 0x959   :  { %v2914_v10 = vadd.f32 %v2913_v13, %v2805_v50  ;;  %v8540_v36 = vpop.f32.mrb[83].mxu1  ;;  %v2929_v9 = vpop.f32.mrb[103].mxu0 }
 0x95a   :  { %7041 = vrcp.f32 %v3006_v6 }
 0x95b   :  { %v5810_v59 = vmul.f32 -1.442695, %v2914_v10  ;;  %7043 = vpow2.f32 %v5809_v56 }
 0x95c   :  { %v7036_v58 = vpop.eup %7035 }
 0x95d   :  { %7045 = vpow2.f32 %v5810_v59  ;;  %v3007_v42 = vadd.f32 1.0, %v7036_v58  ;;  %v2811_v2 = vpop.f32.mrb[84].mxu1  ;;  %v8542_v0 = vpop.f32.mrb[104].mxu0 }
 0x95e   :  { %v7038_v63 = vpop.eup %7037  ;;  %v2919_v48 = vadd.f32 %v6514_v11, %v2811_v2  ;;  %v8544_v47 = vpop.f32.mrb[85].mxu1 }
 0x95f   :  { %v8546_v3 = vpop.f32.mrb[105].mxu0  ;;  %7047 = vrcp.f32 %v3007_v42  ;;  %v3008_v13 = vadd.f32 1.0, %v7038_v63  ;;  %v2815_v34 = vpop.f32.mrb[86].mxu1 }
 0x960   :  { %v8548_v53 = vpop.f32.mrb[106].mxu0  ;;  %v5811_v50 = vmul.f32 -1.442695, %v2919_v48  ;;  %v2922_v6 = vadd.f32 %v6515_v45, %v2815_v34  ;;  %v8550_v56 = vpop.f32.mrb[87].mxu1 }
 0x961   :  { %v8552_v10 = vpop.f32.mrb[107].mxu0  ;;  %7049 = vrcp.f32 %v3008_v13  ;;  %v8554_v11 = vpop.permute.xlu1 %551 }
 0x962   :  { %v7040_v59 = vpop.eup %7039  ;;  %7051 = vpow2.f32 %v5811_v50  ;;  %v5812_v58 = vmul.f32 -1.442695, %v2922_v6 }
 0x963   :  { %v3053_v2 = vmul.f32 %v7040_v59, %v8526_v49 }
 0x964   :  { %v7042_v57 = vpop.eup %7041  ;;  %7053 = vpow2.f32 %v5812_v58 }
 0x965   :  { %v7044_v42 = vpop.eup %7043  ;;  %v3069_v63 = vrot.slane %v3053_v2, 4  ;;  %v3054_v1 = vmul.f32 %v7042_v57, %v8528_v32  ;;  %v2821_v48 = vpop.f32.mrb[88].mxu1 }
 0x966   :  { %v8558_v45 = vpop.f32.mrb[108].mxu0  ;;  %v3009_v13 = vadd.f32 1.0, %v7044_v42  ;;  %v2927_v62 = vadd.f32 %v2926_v15, %v2821_v48  ;;  %v8561_v50 = vpop.f32.mrb[89].mxu1 }
 0x967   :  { %v7046_v34 = vpop.eup %7045  ;;  %v6542_v6 = vpop.f32.mrb[109].mxu0  ;;  %v3070_v4 = vadd.f32 %v3069_v63, %v3053_v2  ;;  %v3075_v33 = vrot.slane %v3054_v1, 4 }
 0x968   :  { %v3010_v59 = vadd.f32 1.0, %v7046_v34  ;;  %v2825_v58 = vpop.f32.mrb[90].mxu1  ;;  %v8564_v27 = vpop.f32.mrb[110].mxu0  ;;  %7055 = vrcp.f32 %v3009_v13  ;;  %v5813_v32 = vmul.f32 -1.442695, %v2927_v62 }
 0x969   :  { %v2930_v28 = vadd.f32 %v2929_v9, %v2825_v58  ;;  %v8567_v30 = vpop.f32.mrb[91].mxu1  ;;  %v6543_v42 = vpop.f32.mrb[111].mxu0  ;;  %v3071_v48 = vrot.slane %v3070_v4, 2  ;;  %v3076_v35 = vadd.f32 %v3075_v33, %v3054_v1  ;;  %v3318_v1 = vrot.slane %v8558_v45, 1 }
 0x96a   :  { %v7048_v15 = vpop.eup %7047  ;;  %7057 = vrcp.f32 %v3010_v59 }
 0x96b   :  { %v3055_v63 = vmul.f32 %v7048_v15, %v8530_v12  ;;  %7059 = vpow2.f32 %v5813_v32  ;;  %v5814_v6 = vmul.f32 -1.442695, %v2930_v28  ;;  %v7050_v49 = vpop.eup %7049  ;;  %v3072_v57 = vadd.f32 %v3071_v48, %v3070_v4 }
 0x96c   :  { %v3077_v13 = vrot.slane %v3076_v35, 2  ;;  %v7052_v58 = vpop.eup %7051  ;;  %v3056_v33 = vmul.f32 %v7050_v49, %v8532_v54 }
 0x96d   :  { %v3081_v42 = vrot.slane %v3055_v63, 4  ;;  %7061 = vpow2.f32 %v5814_v6  ;;  %v3073_v59 = vrot.slane %v3072_v57, 1  ;;  %v3011_v15 = vadd.f32 1.0, %v7052_v58  ;;  %v2831_v28 = vpop.f32.mrb[92].mxu1 }
 0x96e   :  { %v3078_v12 = vadd.f32 %v3077_v13, %v3076_v35  ;;  %v7054_v34 = vpop.eup %7053  ;;  %v3087_v48 = vrot.slane %v3056_v33, 4  ;;  %v2935_v9 = vadd.f32 %v8534_v40, %v2831_v28  ;;  %v8579_v2 = vpop.f32.mrb[93].mxu1  ;;  %v8593_v40 = vld [vmem:[%s9348_s21] ss:$0 sm:$0xff] }
 0x96f   :  { %v3082_v4 = vadd.f32 %v3081_v42, %v3055_v63  ;;  %v3074_v43 = vadd.f32 %v3073_v59, %v3072_v57  ;;  %7063 = vrcp.f32 %v3011_v15  ;;  %v3012_v49 = vadd.f32 1.0, %v7054_v34  ;;  %v2835_v6 = vpop.f32.mrb[94].mxu1 }
 0x970   :  { %v3079_v54 = vrot.slane %v3078_v12, 1  ;;  %v3088_v35 = vadd.f32 %v3087_v48, %v3056_v33  ;;  %v5815_v13 = vmul.f32 -1.442695, %v2935_v9  ;;  %v2938_v58 = vadd.f32 %v8538_v8, %v2835_v6  ;;  %v8582_v32 = vpop.f32.mrb[95].mxu1 }
 0x971   :  { %v3083_v61 = vrot.slane %v3082_v4, 2  ;;  %7065 = vrcp.f32 %v3012_v49  ;;  %v3195_v42 = vmul.f32 %v3074_v43, %v8554_v11  ;;  %v9349_v9 = vrot.slane %v8554_v11, 1 }
 0x972   :  { %v3080_v63 = vadd.f32 %v3079_v54, %v3078_v12  ;;  %v7056_v28 = vpop.eup %7055  ;;  %v3089_v59 = vrot.slane %v3088_v35, 2  ;;  %7067 = vpow2.f32 %v5815_v13  ;;  %v5816_v34 = vmul.f32 -1.442695, %v2938_v58 }
 0x973   :  { %v3084_v57 = vadd.f32 %v3083_v61, %v3082_v4  ;;  %v3057_v33 = vmul.f32 %v7056_v28, %v8536_v46  ;;  %v3348_v48 = vadd.f32 %v8558_v45, %v3195_v42 }
 0x974   :  { %v7058_v15 = vpop.eup %7057  ;;  %v3196_v8 = vmul.f32 %v9349_v9, %v3080_v63  ;;  %v3090_v49 = vadd.f32 %v3089_v59, %v3088_v35  ;;  %7069 = vpow2.f32 %v5816_v34 }
 0x975   :  { %v7060_v54 = vpop.eup %7059  ;;  %v3085_v43 = vrot.slane %v3084_v57, 1  ;;  %v3058_v6 = vmul.f32 %v7058_v15, %v8540_v36  ;;  %v3093_v61 = vrot.slane %v3057_v33, 4  ;;  %v2841_v58 = vpop.f32.mrb[96].mxu1  ;;  %v8600_v34 = vadd.f32 %v8593_v40, %v3348_v48 }
 0x976   :  { %v3013_v4 = vadd.f32 1.0, %v7060_v54  ;;  %v3349_v13 = vadd.f32 %v3318_v1, %v3196_v8  ;;  %v3091_v9 = vrot.slane %v3090_v49, 1  ;;  %v2943_v12 = vadd.f32 %v8546_v3, %v2841_v58  ;;  %v8597_v62 = vpop.f32.mrb[97].mxu1 }
 0x977   :  { %v7062_v28 = vpop.eup %7061  ;;  %v3086_v63 = vadd.f32 %v3085_v43, %v3084_v57  ;;  %v3099_v42 = vrot.slane %v3058_v6, 4  ;;  %v3094_v35 = vadd.f32 %v3093_v61, %v3057_v33  ;;  %v2845_v59 = vpop.f32.mrb[98].mxu1  ;;  %v9350_v1 = vrot.slane %v8554_v11, 2 }
 0x978   :  { %7071 = vrcp.f32 %v3013_v4  ;;  %v3014_v36 = vadd.f32 1.0, %v7062_v28  ;;  %v3092_v8 = vadd.f32 %v3091_v9, %v3090_v49  ;;  %v5817_v46 = vmul.f32 -1.442695, %v2943_v12  ;;  %v8604_v57 = vpop.f32.mrb[99].mxu1 }
 0x979   :  { %v3197_v15 = vmul.f32 %v9350_v1, %v3086_v63  ;;  %v3100_v54 = vadd.f32 %v3099_v42, %v3058_v6  ;;  %v7064_v43 = vpop.eup %7063  ;;  %v3095_v51 = vrot.slane %v3094_v35, 2  ;;  %v2946_v3 = vadd.f32 %v8552_v10, %v2845_v59 }
 0x97a   :  { %7073 = vrcp.f32 %v3014_v36  ;;  %v8608_v33 = vadd.f32 %v8593_v40, %v3349_v13  ;;  %v9351_v61 = vrot.slane %v8554_v11, 3  ;;  %v3059_v58 = vmul.f32 %v7064_v43, %v8544_v47 }
 0x97b   :  { %v3101_v4 = vrot.slane %v3100_v54, 2  ;;  %v9352_v49 = vrot.slane %v8558_v45, 2  ;;  %v7066_v12 = vpop.eup %7065  ;;  %v3096_v28 = vadd.f32 %v3095_v51, %v3094_v35  ;;  %7075 = vpow2.f32 %v5817_v46 }
 0x97c   :  { %v3198_v48 = vmul.f32 %v9351_v61, %v3092_v8  ;;  %v5818_v63 = vmul.f32 -1.442695, %v2946_v3  ;;  %v3403_v9 = vrot.slane %v8608_v33, 7  ;;  %v7068_v42 = vpop.eup %7067  ;;  %v3105_v36 = vrot.slane %v3059_v58, 4 }
 0x97d   :  { %v3350_v6 = vadd.f32 %v9352_v49, %v3197_v15  ;;  %v3102_v10 = vadd.f32 %v3101_v4, %v3100_v54  ;;  %v3060_v13 = vmul.f32 %v7066_v12, %v8550_v56  ;;  %v9353_v59 = vrot.slane %v8558_v45, 3  ;;  %v2851_v47 = vpop.f32.mrb[100].mxu1 }
 0x97e   :  { %v3097_v8 = vrot.slane %v3096_v28, 1  ;;  %v3015_v61 = vadd.f32 1.0, %v7068_v42  ;;  %7077 = vpow2.f32 %v5818_v63  ;;  %v7070_v51 = vpop.eup %7069  ;;  %v3106_v35 = vadd.f32 %v3105_v36, %v3059_v58  ;;  %v8623_v54 = vpop.f32.mrb[101].mxu1 }
 0x97f   :  { %v3351_v1 = vadd.f32 %v9353_v59, %v3198_v48  ;;  %v8620_v15 = vadd.f32 %v8593_v40, %v3350_v6  ;;  %v3103_v46 = vrot.slane %v3102_v10, 1  ;;  %v3111_v43 = vrot.slane %v3060_v13, 4  ;;  %v2855_v49 = vpop.f32.mrb[102].mxu1 }
 0x980   :  { %v2951_v3 = vadd.f32 %v8542_v0, %v2851_v47  ;;  %v3098_v4 = vadd.f32 %v3097_v8, %v3096_v28  ;;  %7079 = vrcp.f32 %v3015_v61  ;;  %v3016_v56 = vadd.f32 1.0, %v7070_v51  ;;  %v8628_v59 = vpop.f32.mrb[103].mxu1 }
 0x981   :  { %v8626_v48 = vadd.f32 %v8593_v40, %v3351_v1  ;;  %v3104_v12 = vadd.f32 %v3103_v46, %v3102_v10  ;;  %v3107_v63 = vrot.slane %v3106_v35, 2  ;;  %v3112_v42 = vadd.f32 %v3111_v43, %v3060_v13 }
 0x982   :  { %v5819_v6 = vmul.f32 -1.442695, %v2951_v3  ;;  %v7072_v37 = vpop.eup %7071  ;;  %v9354_v58 = vrot.slane %v8554_v11, 4  ;;  %7081 = vrcp.f32 %v3016_v56  ;;  %v2954_v0 = vadd.f32 %v8548_v53, %v2855_v49 }
 0x983   :  { %v3404_v28 = vsel %vm2442_vm13, %v3403_v9, %v8600_v34  ;;  %v9355_v8 = vrot.slane %v8554_v11, 5  ;;  %v3108_v61 = vadd.f32 %v3107_v63, %v3106_v35  ;;  %v3113_v10 = vrot.slane %v3112_v42, 2 }
 0x984   :  { %v3199_v36 = vmul.f32 %v9354_v58, %v3098_v4  ;;  %v3061_v13 = vmul.f32 %v7072_v37, %v8561_v50  ;;  %v7074_v47 = vpop.eup %7073  ;;  %7083 = vpow2.f32 %v5819_v6  ;;  %v5820_v51 = vmul.f32 -1.442695, %v2954_v0 }
 0x985   :  { %v3200_v1 = vmul.f32 %v9355_v8, %v3104_v12  ;;  %v9356_v46 = vrot.slane %v8558_v45, 4  ;;  %v3405_v3 = vrot.slane %v8620_v15, 6  ;;  %v3109_v4 = vrot.slane %v3108_v61, 1  ;;  %v7076_v49 = vpop.eup %7075 }
 0x986   :  { %v3114_v53 = vadd.f32 %v3113_v10, %v3112_v42  ;;  %v3117_v56 = vrot.slane %v3061_v13, 4  ;;  %v3062_v9 = vmul.f32 %v7074_v47, %v8567_v30  ;;  %7085 = vpow2.f32 %v5820_v51 }
 0x987   :  { %v3352_v43 = vadd.f32 %v9356_v46, %v3199_v36  ;;  %v9357_v35 = vrot.slane %v8558_v45, 5  ;;  %v3406_v50 = vsel %vm2445_vm14, %v3405_v3, %v3404_v28  ;;  %v3110_v63 = vadd.f32 %v3109_v4, %v3108_v61  ;;  %v8657_v4 = vpop.permute.xlu0 %555 }
 0x988   :  { %v3115_v6 = vrot.slane %v3114_v53, 1  ;;  %v3118_v58 = vadd.f32 %v3117_v56, %v3061_v13  ;;  %v3123_v36 = vrot.slane %v3062_v9, 4  ;;  %v7078_v0 = vpop.eup %7077  ;;  %v3017_v8 = vadd.f32 1.0, %v7076_v49 }
 0x989   :  { %v3353_v12 = vadd.f32 %v9357_v35, %v3200_v1  ;;  %v8645_v37 = vadd.f32 %v8593_v40, %v3352_v43  ;;  %v3407_v30 = vrot.slane %v8626_v48, 5  ;;  %v9360_v1 = vrot.slane %v8554_v11, 6 }
 0x98a   :  { %v3116_v51 = vadd.f32 %v3115_v6, %v3114_v53  ;;  %v3119_v46 = vrot.slane %v3118_v58, 2  ;;  %v3124_v43 = vadd.f32 %v3123_v36, %v3062_v9  ;;  %v7080_v28 = vpop.eup %7079  ;;  %7087 = vrcp.f32 %v3017_v8 }
 0x98b   :  { %9358 = vst [vmem:[#allocation78_spill] sm:$0xff] %v8645_v37  ;;  %v8649_v42 = vadd.f32 %v8593_v40, %v3353_v12  ;;  %v3409_v10 = vrot.slane %v8645_v37, 4  ;;  %v3201_v47 = vmul.f32 %v9360_v1, %v3110_v63  ;;  %v3018_v61 = vadd.f32 1.0, %v7078_v0 }
 0x98c   :  { %v3324_v13 = vrot.slane %v8558_v45, 7  ;;  %v3408_v3 = vsel %vm2448_vm15, %v3407_v30, %v3406_v50  ;;  %v9361_v56 = vrot.slane %v8554_v11, 7  ;;  %v3120_v35 = vadd.f32 %v3119_v46, %v3118_v58  ;;  %v7082_v63 = vpop.eup %7081 }
 0x98d   :  { %9359 = vst [vmem:[#allocation79_spill] sm:$0xff] %v8649_v42  ;;  %v3125_v12 = vrot.slane %v3124_v43, 2  ;;  %v3063_v31 = vmul.f32 %v7080_v28, %v8579_v2  ;;  %7089 = vrcp.f32 %v3018_v61  ;;  %v9362_v53 = vrot.slane %v8558_v45, 6 }
 0x98e   :  { %v3202_v49 = vmul.f32 %v9361_v56, %v3116_v51  ;;  %v3410_v6 = vsel %vm2451_vm12, %v3409_v10, %v3408_v3  ;;  %v3411_v36 = vrot.slane %v8649_v42, 3  ;;  %v3121_v0 = vrot.slane %v3120_v35, 1  ;;  %v7084_v11 = vpop.eup %7083 }
 0x98f   :  { %v3354_v9 = vadd.f32 %v9362_v53, %v3201_v47  ;;  %v3126_v50 = vadd.f32 %v3125_v12, %v3124_v43  ;;  %v3129_v8 = vrot.slane %v3063_v31, 4  ;;  %v3064_v30 = vmul.f32 %v7082_v63, %v8582_v32 }
 0x990   :  { %v3172_v58 = vrot.slane %v8657_v4, 1  ;;  %v3325_v1 = vrot.slane %v8564_v27, 1  ;;  %v3355_v2 = vadd.f32 %v3324_v13, %v3202_v49  ;;  %v3122_v45 = vadd.f32 %v3121_v0, %v3120_v35  ;;  %v7086_v28 = vpop.eup %7085 }
 0x991   :  { %v8670_v51 = vadd.f32 %v8593_v40, %v3354_v9  ;;  %v3127_v47 = vrot.slane %v3126_v50, 1  ;;  %v3130_v46 = vadd.f32 %v3129_v8, %v3063_v31  ;;  %v3135_v10 = vrot.slane %v3064_v30, 4 }
 0x992   :  { %v3019_v61 = vadd.f32 1.0, %v7084_v11  ;;  %v8673_v43 = vadd.f32 %v8593_v40, %v3355_v2  ;;  %v3412_v32 = vsel %vm2454_vm9, %v3411_v36, %v3410_v6  ;;  %v3203_v56 = vmul.f32 %v3122_v45, %v8657_v4 }
 0x993   :  { %v3413_v3 = vrot.slane %v8670_v51, 2  ;;  %v3128_v12 = vadd.f32 %v3127_v47, %v3126_v50  ;;  %v3131_v13 = vrot.slane %v3130_v46, 2  ;;  %v3136_v49 = vadd.f32 %v3135_v10, %v3064_v30 }
 0x994   :  { %9363 = vst [vmem:[#allocation80_spill] sm:$0xff] %v8673_v43  ;;  %7091 = vrcp.f32 %v3019_v61  ;;  %v3020_v63 = vadd.f32 1.0, %v7086_v28  ;;  %v3415_v31 = vrot.slane %v8673_v43, 1  ;;  %v8681_v53 = vadd.f32 %v8564_v27, %v3203_v56  ;;  %v7088_v6 = vpop.eup %7087 }
 0x995   :  { %v3414_v35 = vsel %vm2457_vm11, %v3413_v3, %v3412_v32  ;;  %v3204_v9 = vmul.f32 %v3172_v58, %v3128_v12  ;;  %v3132_v0 = vadd.f32 %v3131_v13, %v3130_v46  ;;  %v3137_v8 = vrot.slane %v3136_v49, 2 }
 0x996   :  { %7093 = vrcp.f32 %v3020_v63  ;;  %v3416_v36 = vsel %vm9288_vm8, %v3415_v31, %v3414_v35  ;;  %v3065_v30 = vmul.f32 %v7088_v6, %v8597_v62  ;;  %v3173_v10 = vrot.slane %v8657_v4, 2 }
 0x997   :  { %v3357_v11 = vadd.f32 %v3325_v1, %v3204_v9  ;;  %v3133_v50 = vrot.slane %v3132_v0, 1  ;;  %v3138_v2 = vadd.f32 %v3137_v8, %v3136_v49  ;;  %3433 = vadd.xlane.f32.xlu1 %v3416_v36  ;;  %v7090_v45 = vpop.eup %7089  ;;  %v3174_v58 = vrot.slane %v8657_v4, 3 }
 0x998   :  { %v3141_v61 = vrot.slane %v3065_v30, 4  ;;  %v3066_v46 = vmul.f32 %v7090_v45, %v8604_v57  ;;  %v3326_v3 = vrot.slane %v8564_v27, 2  ;;  %v3327_v62 = vrot.slane %v8564_v27, 3 }
 0x999   :  { %v3134_v47 = vadd.f32 %v3133_v50, %v3132_v0  ;;  %v3139_v28 = vrot.slane %v3138_v2, 1 }
 0x99a   :  { %v3142_v1 = vadd.f32 %v3141_v61, %v3065_v30  ;;  %v3147_v12 = vrot.slane %v3066_v46, 4  ;;  %v8694_v61 = vadd.f32 %v8593_v40, %v3357_v11 }
 0x99b   :  { %v3205_v32 = vmul.f32 %v3173_v10, %v3134_v47  ;;  %v3140_v56 = vadd.f32 %v3139_v28, %v3138_v2  ;;  %v3175_v47 = vrot.slane %v8657_v4, 4 }
 0x99c   :  { %v3143_v63 = vrot.slane %v3142_v1, 2  ;;  %v3148_v31 = vadd.f32 %v3147_v12, %v3066_v46  ;;  %9364 = vst [vmem:[#allocation81_spill] sm:$0xff] %v8694_v61 }
 0x99d   :  { %v3358_v13 = vadd.f32 %v3326_v3, %v3205_v32  ;;  %v3206_v49 = vmul.f32 %v3174_v58, %v3140_v56  ;;  %v3328_v58 = vrot.slane %v8564_v27, 4 }
 0x99e   :  { %v7092_v35 = vpop.eup %7091  ;;  %v3144_v0 = vadd.f32 %v3143_v63, %v3142_v1  ;;  %v3149_v36 = vrot.slane %v3148_v31, 2  ;;  %v3417_v63 = vrot.slane %v8694_v61, 7 }
 0x99f   :  { %v3359_v9 = vadd.f32 %v3327_v62, %v3206_v49  ;;  %v3067_v8 = vmul.f32 %v7092_v35, %v8623_v54  ;;  %v8698_v54 = vadd.f32 %v8593_v40, %v3358_v13 }
 0x9a0   :  { %v7094_v6 = vpop.eup %7093  ;;  %v3145_v57 = vrot.slane %v3144_v0, 1  ;;  %v3150_v2 = vadd.f32 %v3149_v36, %v3148_v31  ;;  %v3329_v31 = vrot.slane %v8564_v27, 5 }
 0x9a1   :  { %v3153_v50 = vrot.slane %v3067_v8, 4  ;;  %v3068_v45 = vmul.f32 %v7094_v6, %v8628_v59  ;;  %v3176_v59 = vrot.slane %v8657_v4, 5  ;;  %v8703_v11 = vadd.f32 %v8593_v40, %v3359_v9 }
 0x9a2   :  { %v3146_v30 = vadd.f32 %v3145_v57, %v3144_v0  ;;  %v3151_v46 = vrot.slane %v3150_v2, 1  ;;  %v3419_v6 = vrot.slane %v8698_v54, 6  ;;  %v8712_v57 = vadd.f32 %v8593_v40, %v8681_v53 }
 0x9a3   :  { %v3154_v10 = vadd.f32 %v3153_v50, %v3067_v8  ;;  %v3159_v28 = vrot.slane %v3068_v45, 4  ;;  %9365 = vst [vmem:[#allocation82_spill] sm:$0xff] %v8703_v11 }
 0x9a4   :  { %v3207_v32 = vmul.f32 %v3175_v47, %v3146_v30  ;;  %v3152_v1 = vadd.f32 %v3151_v46, %v3150_v2  ;;  %9367 = vst [vmem:[#allocation84_spill] sm:$0xff] %v8712_v57  ;;  %v3178_v2 = vrot.slane %v8657_v4, 7  ;;  %v3330_v47 = vrot.slane %v8564_v27, 6 }
 0x9a5   :  { %v3155_v3 = vrot.slane %v3154_v10, 2  ;;  %v3160_v56 = vadd.f32 %v3159_v28, %v3068_v45  ;;  %v3177_v45 = vrot.slane %v8657_v4, 6  ;;  %v3421_v28 = vrot.slane %v8703_v11, 5 }
 0x9a6   :  { %v3360_v12 = vadd.f32 %v3328_v58, %v3207_v32  ;;  %v3208_v35 = vmul.f32 %v3176_v59, %v3152_v1  ;;  %v3331_v4 = vrot.slane %v8564_v27, 7 }
 0x9a7   :  { %v3156_v49 = vadd.f32 %v3155_v3, %v3154_v10  ;;  %v3161_v62 = vrot.slane %v3160_v56, 2  ;;  %v3418_v10 = vsel %vm2442_vm13, %v3417_v63, %v8712_v57 }
 0x9a8   :  { %v8707_v13 = vadd.f32 %v8593_v40, %v3360_v12  ;;  %v3361_v36 = vadd.f32 %v3329_v31, %v3208_v35  ;;  %v3420_v53 = vsel %vm2445_vm14, %v3419_v6, %v3418_v10 }
 0x9a9   :  { %v3157_v0 = vrot.slane %v3156_v49, 1  ;;  %v3162_v8 = vadd.f32 %v3161_v62, %v3160_v56  ;;  %v3422_v1 = vsel %vm2448_vm15, %v3421_v28, %v3420_v53 }
 0x9aa   :  { %9366 = vst [vmem:[#allocation83_spill] sm:$0xff] %v8707_v13  ;;  %v8717_v30 = vadd.f32 %v8593_v40, %v3361_v36  ;;  %v3423_v32 = vrot.slane %v8707_v13, 4 }
 0x9ab   :  { %v3158_v50 = vadd.f32 %v3157_v0, %v3156_v49  ;;  %v3163_v9 = vrot.slane %v3162_v8, 1 }
 0x9ac   :  { %9368 = vst [vmem:[#allocation85_spill] sm:$0xff] %v8717_v30  ;;  %v3425_v59 = vrot.slane %v8717_v30, 3  ;;  %v3424_v62 = vsel %vm2451_vm12, %v3423_v32, %v3422_v1 }
 0x9ad   :  { %v3209_v58 = vmul.f32 %v3177_v45, %v3158_v50  ;;  %v3164_v46 = vadd.f32 %v3163_v9, %v3162_v8 }
 0x9ae   :  { %v3426_v31 = vsel %vm2454_vm9, %v3425_v59, %v3424_v62 }
 0x9af   :  { %v3362_v3 = vadd.f32 %v3330_v47, %v3209_v58  ;;  %v3210_v56 = vmul.f32 %v3178_v2, %v3164_v46 }
 0x9b1   :  { %v3363_v12 = vadd.f32 %v3331_v4, %v3210_v56  ;;  %v8729_v49 = vadd.f32 %v8593_v40, %v3362_v3 }
 0x9b3   :  { %9369 = vst [vmem:[#allocation86_spill] sm:$0xff] %v8729_v49  ;;  %v8733_v63 = vadd.f32 %v8593_v40, %v3363_v12  ;;  %v3427_v35 = vrot.slane %v8729_v49, 2 }
 0x9b5   :  { %9370 = vst [vmem:[#allocation87_spill] sm:$0xff] %v8733_v63  ;;  %v3428_v0 = vsel %vm2457_vm11, %v3427_v35, %v3426_v31  ;;  %v3429_v27 = vrot.slane %v8733_v63, 1 }
 0x9b7   :  { %v3430_v8 = vsel %vm9288_vm8, %v3429_v27, %v3428_v0 }
 0x9b8   :  { %3435 = vadd.xlane.f32.xlu0 %v3430_v8 }
 0xa24   :  { %v3434_v6 = vpop.xlane.xlu1 %3433 }
 0xa25   :  { %v3437_v36 = vmul.f32 0.03125, %v3434_v6 }
 0xa27   :  { %v3441_v50 = vrot.slane %v3437_v36, 1  ;;  %v3442_v45 = vrot.slane %v3437_v36, 2  ;;  %v3443_v9 = vrot.slane %v3437_v36, 3  ;;  %v3444_v2 = vrot.slane %v3437_v36, 4 }
 0xa28   :  { %v3445_v47 = vrot.slane %v3437_v36, 5  ;;  %v3446_v40 = vrot.slane %v3437_v36, 6  ;;  %v3447_v10 = vrot.slane %v3437_v36, 7  ;;  %v3471_v28 = vsub.f32 %v8600_v34, %v3437_v36 }
 0xa29   :  { %v3472_v58 = vsub.f32 %v8608_v33, %v3441_v50  ;;  %v3473_v46 = vsub.f32 %v8620_v15, %v3442_v45  ;;  %v3474_v53 = vsub.f32 %v8626_v48, %v3443_v9  ;;  %v3475_v32 = vsub.f32 %v8645_v37, %v3444_v2 }
 0xa2a   :  { %v3476_v3 = vsub.f32 %v8649_v42, %v3445_v47  ;;  %v3477_v56 = vsub.f32 %v8670_v51, %v3446_v40  ;;  %v3478_v4 = vsub.f32 %v8673_v43, %v3447_v10  ;;  %v8749_v1 = vmul.f32 %v8039_v52, %v3471_v28 }
 0xa2b   :  { %v8752_v59 = vmul.f32 %v8039_v52, %v3472_v58  ;;  %v8755_v12 = vmul.f32 %v8039_v52, %v3473_v46  ;;  %v8758_v62 = vmul.f32 %v8039_v52, %v3474_v53  ;;  %v8761_v35 = vmul.f32 %v8039_v52, %v3475_v32 }
 0xa2c   :  { %v8764_v31 = vmul.f32 %v8039_v52, %v3476_v3  ;;  %v8767_v0 = vmul.f32 %v8039_v52, %v3477_v56  ;;  %v8770_v27 = vmul.f32 %v8039_v52, %v3478_v4  ;;  %v3503_v45 = vmul.f32 %v8749_v1, %v8749_v1 }
 0xa2d   :  { %v3504_v8 = vmul.f32 %v8752_v59, %v8752_v59  ;;  %v3505_v6 = vmul.f32 %v8755_v12, %v8755_v12  ;;  %v3506_v36 = vmul.f32 %v8758_v62, %v8758_v62  ;;  %v3507_v50 = vmul.f32 %v8761_v35, %v8761_v35 }
 0xa2e   :  { %v3508_v9 = vmul.f32 %v8764_v31, %v8764_v31  ;;  %v3509_v40 = vmul.f32 %v8767_v0, %v8767_v0  ;;  %v3510_v10 = vmul.f32 %v8770_v27, %v8770_v27 }
 0xa2f   :  { %v3535_v2 = vrot.slane %v3504_v8, 7  ;;  %v3537_v47 = vrot.slane %v3505_v6, 6  ;;  %v3539_v58 = vrot.slane %v3506_v36, 5  ;;  %v3541_v53 = vrot.slane %v3507_v50, 4 }
 0xa30   :  { %v3543_v3 = vrot.slane %v3508_v9, 3  ;;  %v3545_v4 = vrot.slane %v3509_v40, 2  ;;  %v3547_v6 = vrot.slane %v3510_v10, 1 }
 0xa31   :  { %v3536_v28 = vsel %vm2442_vm13, %v3535_v2, %v3503_v45 }
 0xa32   :  { %v3538_v46 = vsel %vm2445_vm14, %v3537_v47, %v3536_v28 }
 0xa33   :  { %v3540_v32 = vsel %vm2448_vm15, %v3539_v58, %v3538_v46 }
 0xa34   :  { %v3542_v56 = vsel %vm2451_vm12, %v3541_v53, %v3540_v32 }
 0xa35   :  { %v3544_v8 = vsel %vm2454_vm9, %v3543_v3, %v3542_v56 }
 0xa36   :  { %v3546_v42 = vsel %vm2457_vm11, %v3545_v4, %v3544_v8 }
 0xa37   :  { %v3548_v43 = vsel %vm9288_vm8, %v3547_v6, %v3546_v42 }
 0xa38   :  { %3565 = vadd.xlane.f32.xlu0 %v3548_v43 }
 0xa45   :  { %v3436_v37 = vpop.xlane.xlu0 %3435 }
 0xa46   :  { %v3438_v45 = vmul.f32 0.03125, %v3436_v37 }
 0xa48   :  { %v3448_v36 = vrot.slane %v3438_v45, 1  ;;  %v3449_v2 = vrot.slane %v3438_v45, 2  ;;  %v3450_v47 = vrot.slane %v3438_v45, 3  ;;  %v3451_v50 = vrot.slane %v3438_v45, 4 }
 0xa49   :  { %v3452_v28 = vrot.slane %v3438_v45, 5  ;;  %v3453_v58 = vrot.slane %v3438_v45, 6  ;;  %v3454_v9 = vrot.slane %v3438_v45, 7  ;;  %v3479_v46 = vsub.f32 %v8712_v57, %v3438_v45 }
 0xa4a   :  { %v3480_v40 = vsub.f32 %v8694_v61, %v3448_v36  ;;  %v3481_v10 = vsub.f32 %v8698_v54, %v3449_v2  ;;  %v3482_v53 = vsub.f32 %v8703_v11, %v3450_v47  ;;  %v3483_v42 = vsub.f32 %v8707_v13, %v3451_v50 }
 0xa4b   :  { %v3484_v43 = vsub.f32 %v8717_v30, %v3452_v28  ;;  %v3485_v37 = vsub.f32 %v8729_v49, %v3453_v58  ;;  %v3486_v32 = vsub.f32 %v8733_v63, %v3454_v9  ;;  %v8804_v3 = vmul.f32 %v8039_v52, %v3479_v46 }
 0xa4c   :  { %v8807_v56 = vmul.f32 %v8039_v52, %v3480_v40  ;;  %v8810_v4 = vmul.f32 %v8039_v52, %v3481_v10  ;;  %v8813_v8 = vmul.f32 %v8039_v52, %v3482_v53  ;;  %v8816_v6 = vmul.f32 %v8039_v52, %v3483_v42 }
 0xa4d   :  { %v8819_v45 = vmul.f32 %v8039_v52, %v3484_v43  ;;  %v8822_v36 = vmul.f32 %v8039_v52, %v3485_v37  ;;  %v8825_v2 = vmul.f32 %v8039_v52, %v3486_v32  ;;  %v3511_v9 = vmul.f32 %v8804_v3, %v8804_v3 }
 0xa4e   :  { %v3512_v47 = vmul.f32 %v8807_v56, %v8807_v56  ;;  %v3513_v50 = vmul.f32 %v8810_v4, %v8810_v4  ;;  %v3514_v28 = vmul.f32 %v8813_v8, %v8813_v8  ;;  %v3515_v58 = vmul.f32 %v8816_v6, %v8816_v6 }
 0xa4f   :  { %v3516_v46 = vmul.f32 %v8819_v45, %v8819_v45  ;;  %v3517_v10 = vmul.f32 %v8822_v36, %v8822_v36  ;;  %v3518_v53 = vmul.f32 %v8825_v2, %v8825_v2 }
 0xa50   :  { %v3549_v52 = vrot.slane %v3512_v47, 7  ;;  %v3551_v40 = vrot.slane %v3513_v50, 6  ;;  %v3553_v43 = vrot.slane %v3514_v28, 5  ;;  %v3555_v32 = vrot.slane %v3515_v58, 4 }
 0xa51   :  { %v3557_v63 = vrot.slane %v3516_v46, 3  ;;  %v3559_v49 = vrot.slane %v3517_v10, 2  ;;  %v3561_v50 = vrot.slane %v3518_v53, 1  ;;  %v8852_v10 = vld [vmem:[#allocation10 + $0x1] ss:$0 sm:$0xff] }
 0xa52   :  { %v3550_v42 = vsel %vm2442_vm13, %v3549_v52, %v3511_v9 }
 0xa53   :  { %v3552_v37 = vsel %vm2445_vm14, %v3551_v40, %v3550_v42 }
 0xa54   :  { %v3554_v30 = vsel %vm2448_vm15, %v3553_v43, %v3552_v37 }
 0xa55   :  { %v3556_v13 = vsel %vm2451_vm12, %v3555_v32, %v3554_v30 }
 0xa56   :  { %v3558_v47 = vsel %vm2454_vm9, %v3557_v63, %v3556_v13 }
 0xa57   :  { %v3560_v61 = vsel %vm2457_vm11, %v3559_v49, %v3558_v47 }
 0xa58   :  { %v3562_v11 = vsel %vm9288_vm8, %v3561_v50, %v3560_v61 }
 0xa59   :  { %3567 = vadd.xlane.f32.xlu1 %v3562_v11  ;;  %v8857_v11 = vld [vmem:[#allocation11 + $0x1] ss:$0 sm:$0xff] }
 0xac5   :  { %v3566_v57 = vpop.xlane.xlu0 %3565 }
 0xac6   :  { %v3569_v9 = vmul.f32 0.03125, %v3566_v57 }
 0xac8   :  { %v3571_v28 = vadd.f32 1e-05, %v3569_v9 }
 0xaca   :  { %7095 = vrsqrt.f32 %v3571_v28 }
 0xad4   :  { %v7096_v52 = vpop.eup %7095 }
 0xad5   :  { %v3577_v58 = vrot.slane %v7096_v52, 1  ;;  %v3578_v40 = vrot.slane %v7096_v52, 2  ;;  %v3579_v42 = vrot.slane %v7096_v52, 3  ;;  %v3607_v13 = vmul.f32 %v7096_v52, %v8749_v1 }
 0xad6   :  { %v3580_v53 = vrot.slane %v7096_v52, 4  ;;  %v3581_v43 = vrot.slane %v7096_v52, 5  ;;  %v3582_v1 = vrot.slane %v7096_v52, 6 }
 0xad7   :  { %v3608_v46 = vmul.f32 %v3577_v58, %v8752_v59  ;;  %v3609_v30 = vmul.f32 %v3578_v40, %v8755_v12  ;;  %v3610_v57 = vmul.f32 %v3579_v42, %v8758_v62  ;;  %v3631_v59 = vmul.f32 %v8852_v10, %v3607_v13 }
 0xad8   :  { %v3611_v47 = vmul.f32 %v3580_v53, %v8761_v35  ;;  %v3612_v50 = vmul.f32 %v3581_v43, %v8764_v31  ;;  %v3583_v40 = vrot.slane %v7096_v52, 7  ;;  %v3613_v42 = vmul.f32 %v3582_v1, %v8767_v0 }
 0xad9   :  { %v3632_v49 = vmul.f32 %v8852_v10, %v3608_v46  ;;  %v3633_v61 = vmul.f32 %v8852_v10, %v3609_v30  ;;  %v3634_v37 = vmul.f32 %v8852_v10, %v3610_v57  ;;  %v3655_v9 = vadd.f32 %v8857_v11, %v3631_v59 }
 0xada   :  { %v3635_v46 = vmul.f32 %v8852_v10, %v3611_v47  ;;  %v3636_v30 = vmul.f32 %v8852_v10, %v3612_v50  ;;  %v3614_v31 = vmul.f32 %v3583_v40, %v8770_v27  ;;  %v3637_v53 = vmul.f32 %v8852_v10, %v3613_v42 }
 0xadb   :  { %v3656_v63 = vadd.f32 %v8857_v11, %v3632_v49  ;;  %v3657_v12 = vadd.f32 %v8857_v11, %v3633_v61  ;;  %v3658_v62 = vadd.f32 %v8857_v11, %v3634_v37  ;;  %v3671_v13 = vmax.f32 %v3655_v9, 0.0 }
 0xadc   :  { %v3659_v59 = vadd.f32 %v8857_v11, %v3635_v46  ;;  %v3660_v52 = vadd.f32 %v8857_v11, %v3636_v30  ;;  %v3638_v1 = vmul.f32 %v8852_v10, %v3614_v31  ;;  %v3661_v47 = vadd.f32 %v8857_v11, %v3637_v53 }
 0xadd   :  { %v3672_v32 = vmax.f32 %v3656_v63, 0.0  ;;  %v3673_v28 = vmax.f32 %v3657_v12, 0.0  ;;  %v3674_v35 = vmax.f32 %v3658_v62, 0.0  ;;  %v3687_v0 = vpack.c.bf16 %v3671_v13, %v3671_v13 }
 0xade   :  { %v3675_v50 = vmax.f32 %v3659_v59, 0.0  ;;  %v3676_v9 = vmax.f32 %v3660_v52, 0.0  ;;  %v3662_v40 = vadd.f32 %v8857_v11, %v3638_v1  ;;  %v3677_v42 = vmax.f32 %v3661_v47, 0.0 }
 0xadf   :  { %v3688_v58 = vpack.c.bf16 %v3672_v32, %v3672_v32  ;;  %v3689_v61 = vpack.c.bf16 %v3673_v28, %v3673_v28  ;;  %v3690_v37 = vpack.c.bf16 %v3674_v35, %v3674_v35  ;;  %v3719_v28 = vunpack.c.l.b16 %v3687_v0 }
 0xae0   :  { %v3691_v46 = vpack.c.bf16 %v3675_v50, %v3675_v50  ;;  %v8879_v30 = vpack.c.bf16 %v3676_v9, %v3676_v9  ;;  %v8882_v35 = vpack.c.bf16 %v3677_v42, %v3677_v42 }
 0xae1   :  { %v3720_v63 = vunpack.c.l.b16 %v3688_v58  ;;  %v3721_v12 = vunpack.c.l.b16 %v3689_v61  ;;  %v3722_v62 = vunpack.c.l.b16 %v3690_v37  ;;  %v3678_v61 = vmax.f32 %v3662_v40, 0.0 }
 0xae2   :  { %v3724_v31 = vunpack.c.l.b16 %v8879_v30 }
 0xae3   :  { %v3735_v32 = vrot.slane %v3720_v63, 7  ;;  %v3737_v27 = vrot.slane %v3721_v12, 6  ;;  %v3723_v63 = vunpack.c.l.b16 %v3691_v46 }
 0xae5   :  { %v3736_v58 = vsel %vm2442_vm13, %v3735_v32, %v3719_v28 }
 0xae6   :  { %v3568_v49 = vpop.xlane.xlu1 %3567  ;;  %v3738_v13 = vsel %vm2445_vm14, %v3737_v27, %v3736_v58 }
 0xae7   :  { %v3570_v57 = vmul.f32 0.03125, %v3568_v49  ;;  %v3739_v49 = vrot.slane %v3722_v62, 5 }
 0xae9   :  { %v3572_v43 = vadd.f32 1e-05, %v3570_v57  ;;  %v3740_v53 = vsel %vm2448_vm15, %v3739_v49, %v3738_v13 }
 0xaeb   :  { %7097 = vrsqrt.f32 %v3572_v43 }
 0xaf5   :  { %v7098_v57 = vpop.eup %7097 }
 0xaf6   :  { %v3584_v43 = vrot.slane %v7098_v57, 1  ;;  %v3585_v59 = vrot.slane %v7098_v57, 2  ;;  %v3586_v52 = vrot.slane %v7098_v57, 3  ;;  %v3587_v0 = vrot.slane %v7098_v57, 4 }
 0xaf7   :  { %v3588_v12 = vrot.slane %v7098_v57, 5  ;;  %v3589_v37 = vrot.slane %v7098_v57, 6  ;;  %v3590_v32 = vrot.slane %v7098_v57, 7  ;;  %v3615_v1 = vmul.f32 %v7098_v57, %v8804_v3 }
 0xaf8   :  { %v3616_v47 = vmul.f32 %v3584_v43, %v8807_v56  ;;  %v3617_v50 = vmul.f32 %v3585_v59, %v8810_v4  ;;  %v3618_v9 = vmul.f32 %v3586_v52, %v8813_v8  ;;  %v3619_v28 = vmul.f32 %v3587_v0, %v8816_v6 }
 0xaf9   :  { %v3620_v27 = vmul.f32 %v3588_v12, %v8819_v45  ;;  %v3621_v62 = vmul.f32 %v3589_v37, %v8822_v36  ;;  %v3622_v58 = vmul.f32 %v3590_v32, %v8825_v2  ;;  %v3639_v40 = vmul.f32 %v8852_v10, %v3615_v1 }
 0xafa   :  { %v3640_v42 = vmul.f32 %v8852_v10, %v3616_v47  ;;  %v3641_v3 = vmul.f32 %v8852_v10, %v3617_v50  ;;  %v3642_v56 = vmul.f32 %v8852_v10, %v3618_v9  ;;  %v3643_v4 = vmul.f32 %v8852_v10, %v3619_v28 }
 0xafb   :  { %v3644_v8 = vmul.f32 %v8852_v10, %v3620_v27  ;;  %v3645_v6 = vmul.f32 %v8852_v10, %v3621_v62  ;;  %v3646_v45 = vmul.f32 %v8852_v10, %v3622_v58  ;;  %v3663_v36 = vadd.f32 %v8857_v11, %v3639_v40 }
 0xafc   :  { %v3664_v2 = vadd.f32 %v8857_v11, %v3640_v42  ;;  %v3665_v46 = vadd.f32 %v8857_v11, %v3641_v3  ;;  %v3666_v30 = vadd.f32 %v8857_v11, %v3642_v56  ;;  %v3667_v13 = vadd.f32 %v8857_v11, %v3643_v4 }
 0xafd   :  { %v3668_v49 = vadd.f32 %v8857_v11, %v3644_v8  ;;  %v3669_v57 = vadd.f32 %v8857_v11, %v3645_v6  ;;  %v3670_v43 = vadd.f32 %v8857_v11, %v3646_v45  ;;  %v3679_v59 = vmax.f32 %v3663_v36, 0.0 }
 0xafe   :  { %v3680_v52 = vmax.f32 %v3664_v2, 0.0  ;;  %v3681_v0 = vmax.f32 %v3665_v46, 0.0  ;;  %v3682_v10 = vmax.f32 %v3666_v30, 0.0  ;;  %v3683_v12 = vmax.f32 %v3667_v13, 0.0 }
 0xaff   :  { %v3684_v37 = vmax.f32 %v3668_v49, 0.0  ;;  %v3685_v32 = vmax.f32 %v3669_v57, 0.0  ;;  %v3686_v1 = vmax.f32 %v3670_v43, 0.0  ;;  %v3695_v47 = vpack.c.bf16 %v3679_v59, %v3679_v59 }
 0xb00   :  { %v3696_v50 = vpack.c.bf16 %v3680_v52, %v3680_v52  ;;  %v3697_v9 = vpack.c.bf16 %v3681_v0, %v3681_v0  ;;  %v3698_v28 = vpack.c.bf16 %v3682_v10, %v3682_v10  ;;  %v3699_v27 = vpack.c.bf16 %v3683_v12, %v3683_v12 }
 0xb01   :  { %v3694_v62 = vpack.c.bf16 %v3678_v61, %v3678_v61  ;;  %v3700_v58 = vpack.c.bf16 %v3684_v37, %v3684_v37  ;;  %v3701_v40 = vpack.c.bf16 %v3685_v32, %v3685_v32  ;;  %v3741_v42 = vrot.slane %v3723_v63, 4 }
 0xb02   :  { %v3702_v3 = vpack.c.bf16 %v3686_v1, %v3686_v1  ;;  %v3728_v56 = vunpack.c.l.b16 %v3696_v50  ;;  %v3729_v11 = vunpack.c.l.b16 %v3697_v9  ;;  %v3730_v4 = vunpack.c.l.b16 %v3698_v28 }
 0xb03   :  { %v3725_v8 = vunpack.c.l.b16 %v8882_v35  ;;  %v3731_v6 = vunpack.c.l.b16 %v3699_v27  ;;  %v3742_v45 = vsel %vm2451_vm12, %v3741_v42, %v3740_v53  ;;  %v3743_v36 = vrot.slane %v3724_v31, 3  ;;  %v7131_v42 = vld [vmem:[%s9315_s28 + $0x8] sm:$0xff]  }
 0xb04   :  { %v3727_v2 = vunpack.c.l.b16 %v3695_v47  ;;  %v3732_v46 = vunpack.c.l.b16 %v3700_v58  ;;  %v3749_v30 = vrot.slane %v3728_v56, 7  ;;  %v3751_v13 = vrot.slane %v3729_v11, 6  ;;  %v6916_v58 = vld [vmem:[%s9320_s12 + $0x80] sm:$0xff]   ;;  %v7133_v56 = vld [vmem:[%s9315_s28 + $0x10] sm:$0xff]  }
 0xb05   :  { %v3726_v49 = vunpack.c.l.b16 %v3694_v62  ;;  %v3733_v57 = vunpack.c.l.b16 %v3701_v40  ;;  %v3734_v61 = vunpack.c.l.b16 %v3702_v3  ;;  %v3744_v43 = vsel %vm2454_vm9, %v3743_v36, %v3742_v45  ;;  %v6915_v62 = vld [vmem:[%s9320_s12 + $0xc0] sm:$0xff]   ;;  %v6917_v40 = vld [vmem:[%s9320_s12 + $0xc8] sm:$0xff]   ;;  %v7134_v11 = vld [vmem:[%s9314_s4 + $0x10] sm:$0xff]  }
 0xb06   :  { %v3750_v63 = vsel %vm2442_vm13, %v3749_v30, %v3727_v2  ;;  %v3753_v59 = vrot.slane %v3730_v4, 5  ;;  %v3745_v52 = vrot.slane %v3725_v8, 2  ;;  %v3755_v0 = vrot.slane %v3731_v6, 4  ;;  %v7132_v3 = vld [vmem:[%s9314_s4 + $0x8] sm:$0xff]   ;;  %v6919_v8 = vld [vmem:[%s9320_s12 + $0xd0] sm:$0xff]   ;;  %v6921_v45 = vld [vmem:[%s9320_s12 + $0xd8] sm:$0xff]  }
 0xb07   :  { %v3752_v35 = vsel %vm2445_vm14, %v3751_v13, %v3750_v63  ;;  %v3757_v31 = vrot.slane %v3732_v46, 3  ;;  %v3759_v37 = vrot.slane %v3733_v57, 2  ;;  %v3747_v32 = vrot.slane %v3726_v49, 1  ;;  %v6918_v4 = vld [vmem:[%s9320_s12 + $0x88] sm:$0xff]   ;;  %v6920_v6 = vld [vmem:[%s9320_s12 + $0x90] sm:$0xff]   ;;  %v7135_v36 = vld [vmem:[%s9315_s28 + $0x18] sm:$0xff]  }
 0xb08   :  { %v3754_v53 = vsel %vm2448_vm15, %v3753_v59, %v3752_v35  ;;  %v3746_v10 = vsel %vm2457_vm11, %v3745_v52, %v3744_v43  ;;  %v3761_v47 = vrot.slane %v3734_v61, 1  ;;  %v7136_v2 = vld [vmem:[%s9314_s4 + $0x18] sm:$0xff]   ;;  %v7137_v46 = vld [vmem:[%s9315_s28 + $0x20] sm:$0xff]   ;;  %v6925_v61 = vld [vmem:[%s9320_s12 + $0xe8] sm:$0xff]  }
 0xb09   :  { %v3756_v12 = vsel %vm2451_vm12, %v3755_v0, %v3754_v53  ;;  %v3748_v9 = vsel %vm9288_vm8, %v3747_v32, %v3746_v10  ;;  %v7138_v30 = vld [vmem:[%s9314_s4 + $0x20] sm:$0xff]   ;;  %v6922_v13 = vld [vmem:[%s9320_s12 + $0x98] sm:$0xff]   ;;  %v7139_v43 = vld [vmem:[%s9315_s28 + $0x28] sm:$0xff]  }
 0xb0a   :  { %v3758_v1 = vsel %vm2454_vm9, %v3757_v31, %v3756_v12  ;;  %v6923_v49 = vld [vmem:[%s9320_s12 + $0xe0] sm:$0xff]   ;;  %v7140_v63 = vld [vmem:[%s9314_s4 + $0x28] sm:$0xff]   ;;  %v7141_v59 = vld [vmem:[%s9315_s28 + $0x30] sm:$0xff]  }
 0xb0b   :  { %v3760_v50 = vsel %vm2457_vm11, %v3759_v37, %v3758_v1  ;;  %v6924_v57 = vld [vmem:[%s9320_s12 + $0xa0] sm:$0xff]   ;;  %v7142_v52 = vld [vmem:[%s9314_s4 + $0x30] sm:$0xff]   ;;  %v6926_v35 = vld [vmem:[%s9320_s12 + $0xa8] sm:$0xff]  }
 0xb0c   :  { %v3762_v28 = vsel %vm9288_vm8, %v3761_v47, %v3760_v50  ;;  %v6927_v0 = vld [vmem:[%s9320_s12 + $0xf0] sm:$0xff]   ;;  %v7143_v53 = vld [vmem:[%s9315_s28 + $0x38] sm:$0xff]   ;;  %v6934_v50 = vld [vmem:[#allocation20 + $0x58] sm:$0xff]   ;;  %vm9388_vm8 = vcmp.gt.f32.partialorder %v8248_v41, 0.5 }
 0xb0d   :  { %v8922_v27 = vpack.c.b16 %v3762_v28, %v3748_v9  ;;  %v7144_v31 = vld [vmem:[%s9314_s4 + $0x38] sm:$0xff]   ;;  %v6928_v10 = vld [vmem:[%s9320_s12 + $0xb0] sm:$0xff]  }
 0xb0e   :  { %v6929_v12 = vld [vmem:[%s9320_s12 + $0xf8] sm:$0xff]   ;;  %v6931_v32 = vld [vmem:[#allocation20 + $0x40] sm:$0xff]  }
 0xb0f   :  { %6544 = vmatprep.subr.bf16.mxu0 %v8922_v27  ;;  %6562 = vmatprep.subr.bf16.mxu1 %v8922_v27  ;;  %v6930_v37 = vld [vmem:[%s9320_s12 + $0xb8] sm:$0xff]  }
 0xb10   :  { %6545 = vmatpush3.bf16.msra.mxu0 %v8922_v27  ;;  %6563 = vmatpush3.bf16.msra.mxu1 %v8922_v27  ;;  %v6932_v1 = vld [vmem:[#allocation20 + $0x48] sm:$0xff]   ;;  %v6933_v47 = vld [vmem:[#allocation20 + $0x50] sm:$0xff]  }
 0xb11   :  { %6183 = vmatprep.subr.bf16.mxu0 %v6915_v62  ;;  %6580 = vmatprep.subr.bf16.mxu1 %v6931_v32 }
 0xb13   :  { %6565 = vmatmul.mubr.msk.bf16.vlgmr.msra.gmra.mrb[104].mxu1 %vm1301_vm4, %v7131_v42  ;;  %6547 = vmatmul.mubr.msk.bf16.vlgmr.msra.gmra.mrb[112].mxu0 %vm1301_vm4, %v7132_v3 }
 0xb14   :  { %6568 = vmatprep.mubr.msk.bf16.mxu1 %vm1301_vm4, %v7133_v56  ;;  %6550 = vmatprep.mubr.msk.bf16.mxu0 %vm1301_vm4, %v7134_v11 }
 0xb15   :  { %6184 = vmatpush3.bf16.msra.mxu0 %v6916_v58  ;;  %6581 = vmatpush3.bf16.msra.mxu1 %v6931_v32 }
 0xb16   :  { %6185 = vmatprep.subr.bf16.mxu0 %v6917_v40  ;;  %6582 = vmatprep.subr.bf16.mxu1 %v6932_v1 }
 0xb19   :  { %6186 = vmatpush3.bf16.msra.mxu0 %v6918_v4  ;;  %6583 = vmatpush3.bf16.msra.mxu1 %v6932_v1 }
 0xb1a   :  { %6187 = vmatprep.subr.bf16.mxu0 %v6919_v8  ;;  %6584 = vmatprep.subr.bf16.mxu1 %v6933_v47 }
 0xb1b   :  { %6569 = vmatmul.mubr.msk.bf16.gmra.mrb[108].mxu1 %vm1301_vm4, %v7135_v36  ;;  %6551 = vmatmul.mubr.msk.bf16.gmra.mrb[116].mxu0 %vm1301_vm4, %v7136_v2 }
 0xb1c   :  { %6572 = vmatprep.mubr.msk.bf16.mxu1 %vm1301_vm4, %v7137_v46  ;;  %6554 = vmatprep.mubr.msk.bf16.mxu0 %vm1301_vm4, %v7138_v30 }
 0xb1d   :  { %6188 = vmatpush3.bf16.msra.mxu0 %v6920_v6  ;;  %6585 = vmatpush3.bf16.msra.mxu1 %v6933_v47 }
 0xb1e   :  { %6189 = vmatprep.subr.bf16.mxu0 %v6921_v45  ;;  %6586 = vmatprep.subr.bf16.mxu1 %v6934_v50 }
 0xb21   :  { %6190 = vmatpush3.bf16.msra.mxu0 %v6922_v13  ;;  %6587 = vmatpush3.bf16.msra.mxu1 %v6934_v50 }
 0xb22   :  { %6191 = vmatprep.subr.bf16.mxu0 %v6923_v49 }
 0xb23   :  { %6573 = vmatmul.mubr.msk.bf16.gmra.mrb[112].mxu1 %vm1301_vm4, %v7139_v43  ;;  %6555 = vmatmul.mubr.msk.bf16.gmra.mrb[120].mxu0 %vm1301_vm4, %v7140_v63 }
 0xb24   :  { %6576 = vmatprep.mubr.msk.bf16.mxu1 %vm1301_vm4, %v7141_v59  ;;  %6558 = vmatprep.mubr.msk.bf16.mxu0 %vm1301_vm4, %v7142_v52 }
 0xb25   :  { %6192 = vmatpush3.bf16.msra.mxu0 %v6924_v57 }
 0xb26   :  { %6193 = vmatprep.subr.bf16.mxu0 %v6925_v61 }
 0xb29   :  { %6194 = vmatpush3.bf16.msra.mxu0 %v6926_v35 }
 0xb2a   :  { %6195 = vmatprep.subr.bf16.mxu0 %v6927_v0 }
 0xb2b   :  { %6577 = vmatmul.mubr.msk.bf16.gmra.mrb[116].mxu1 %vm1301_vm4, %v7143_v53  ;;  %6559 = vmatmul.mubr.msk.bf16.gmra.mrb[124].mxu0 %vm1301_vm4, %v7144_v31 }
 0xb2d   :  { %6196 = vmatpush3.bf16.msra.mxu0 %v6928_v10 }
 0xb2e   :  { %6197 = vmatprep.subr.bf16.mxu0 %v6929_v12 }
 0xb31   :  { %6198 = vmatpush3.bf16.msra.mxu0 %v6930_v37 }
 0xb32   :  { %6632 = vmatprep.subr.bf16.mxu0 %v9321_v38 }
 0xbe6   :  { %v6566_v9 = vpop.f32.mrb[104].mxu1  ;;  %v6548_v28 = vpop.f32.mrb[112].mxu0 }
 0xbe7   :  { %v3896_v62 = vpop.f32.mrb[105].mxu1  ;;  %v3799_v58 = vpop.f32.mrb[113].mxu0 }
 0xbe8   :  { %v6567_v40 = vpop.f32.mrb[106].mxu1  ;;  %v6549_v42 = vpop.f32.mrb[114].mxu0 }
 0xbe9   :  { %v3995_v3 = vpack.c.bf16 %v6567_v40, %v6566_v9  ;;  %v3994_v56 = vpack.c.bf16 %v6549_v42, %v6548_v28  ;;  %v3899_v11 = vpop.f32.mrb[107].mxu1  ;;  %v3802_v4 = vpop.f32.mrb[115].mxu0 }
 0xbea   :  { %v3993_v8 = vpack.c.bf16 %v3899_v11, %v3896_v62  ;;  %v3992_v6 = vpack.c.bf16 %v3802_v4, %v3799_v58 }
 0xbec   :  { %4144 = vmatprep.mubr.bf16.mxu0 %v3993_v8 }
 0xbed   :  { %4145 = vmatmul.mubr.bf16.vlgmr.msra.gmra.mrb[128].mxu0 %v3992_v6 }
 0xbee   :  { %4152 = vmatprep.mubr.bf16.mxu0 %v3995_v3  ;;  %v6570_v45 = vpop.f32.mrb[108].mxu1  ;;  %v6552_v36 = vpop.f32.mrb[116].mxu0 }
 0xbef   :  { %v3912_v2 = vpop.f32.mrb[109].mxu1  ;;  %v3815_v46 = vpop.f32.mrb[117].mxu0 }
 0xbf0   :  { %v6571_v30 = vpop.f32.mrb[110].mxu1  ;;  %v6553_v13 = vpop.f32.mrb[118].mxu0 }
 0xbf1   :  { %v3999_v49 = vpack.c.bf16 %v6571_v30, %v6570_v45  ;;  %v3998_v57 = vpack.c.bf16 %v6553_v13, %v6552_v36  ;;  %v3915_v61 = vpop.f32.mrb[111].mxu1  ;;  %v3818_v43 = vpop.f32.mrb[119].mxu0  ;;  %v6935_v45 = vld [vmem:[#allocation20 + $0x60] sm:$0xff]   ;;  %v6936_v36 = vld [vmem:[#allocation20 + $0x68] sm:$0xff]   ;;  %v8976_v13 = vld [vmem:[#allocation19 + $0x1] ss:$0 sm:$0xff] }
 0xbf2   :  { %v3997_v63 = vpack.c.bf16 %v3915_v61, %v3912_v2  ;;  %v3996_v59 = vpack.c.bf16 %v3818_v43, %v3815_v46  ;;  %6588 = vmatprep.subr.bf16.mxu1 %v6935_v45  ;;  %v6937_v2 = vld [vmem:[#allocation20 + $0x70] sm:$0xff]   ;;  %v6938_v46 = vld [vmem:[#allocation20 + $0x78] sm:$0xff]  }
 0xbf3   :  { %6589 = vmatpush3.bf16.msra.mxu1 %v6935_v45 }
 0xbf4   :  { %6590 = vmatprep.subr.bf16.mxu1 %v6936_v36 }
 0xbf5   :  { %4153 = vmatmul.mubr.bf16.gmra.mrb[132].mxu0 %v3994_v56 }
 0xbf6   :  { %4160 = vmatprep.mubr.bf16.mxu0 %v3997_v63  ;;  %v6574_v52 = vpop.f32.mrb[112].mxu1  ;;  %v6556_v35 = vpop.f32.mrb[120].mxu0 }
 0xbf7   :  { %v3928_v0 = vpop.f32.mrb[113].mxu1  ;;  %v3831_v53 = vpop.f32.mrb[121].mxu0  ;;  %6591 = vmatpush3.bf16.msra.mxu1 %v6936_v36 }
 0xbf8   :  { %v6575_v31 = vpop.f32.mrb[114].mxu1  ;;  %v6557_v10 = vpop.f32.mrb[122].mxu0  ;;  %6592 = vmatprep.subr.bf16.mxu1 %v6937_v2 }
 0xbf9   :  { %v4003_v12 = vpack.c.bf16 %v6575_v31, %v6574_v52  ;;  %v4002_v37 = vpack.c.bf16 %v6557_v10, %v6556_v35  ;;  %v3931_v32 = vpop.f32.mrb[115].mxu1  ;;  %v3834_v1 = vpop.f32.mrb[123].mxu0 }
 0xbfa   :  { %v4001_v47 = vpack.c.bf16 %v3931_v32, %v3928_v0  ;;  %v4000_v50 = vpack.c.bf16 %v3834_v1, %v3831_v53 }
 0xbfb   :  { %6593 = vmatpush3.bf16.msra.mxu1 %v6937_v2 }
 0xbfc   :  { %6594 = vmatprep.subr.bf16.mxu1 %v6938_v46 }
 0xbfd   :  { %4161 = vmatmul.mubr.bf16.gmra.mrb[136].mxu0 %v3996_v59 }
 0xbfe   :  { %4168 = vmatprep.mubr.bf16.mxu0 %v3999_v49  ;;  %v6578_v9 = vpop.f32.mrb[116].mxu1  ;;  %v6560_v28 = vpop.f32.mrb[124].mxu0 }
 0xbff   :  { %v3944_v62 = vpop.f32.mrb[117].mxu1  ;;  %v3847_v58 = vpop.f32.mrb[125].mxu0  ;;  %6595 = vmatpush3.bf16.msra.mxu1 %v6938_v46 }
 0xc00   :  { %v6579_v40 = vpop.f32.mrb[118].mxu1  ;;  %v6561_v42 = vpop.f32.mrb[126].mxu0  ;;  %6612 = vmatprep.subr.bf16.mxu1 %v9321_v38 }
 0xc01   :  { %v4007_v3 = vpack.c.bf16 %v6579_v40, %v6578_v9  ;;  %v4006_v56 = vpack.c.bf16 %v6561_v42, %v6560_v28  ;;  %v3947_v11 = vpop.f32.mrb[119].mxu1  ;;  %v3850_v4 = vpop.f32.mrb[127].mxu0  ;;  %v6939_v40 = vld [vmem:[#allocation22 + $0x40] sm:$0xff]  }
 0xc02   :  { %v4005_v8 = vpack.c.bf16 %v3947_v11, %v3944_v62  ;;  %v4004_v6 = vpack.c.bf16 %v3850_v4, %v3847_v58 }
 0xc05   :  { %4169 = vmatmul.mubr.bf16.gmra.mrb[140].mxu0 %v3998_v57 }
 0xc06   :  { %4176 = vmatprep.mubr.bf16.mxu0 %v4001_v47 }
 0xc0d   :  { %4177 = vmatmul.mubr.bf16.gmra.mrb[144].mxu0 %v4000_v50 }
 0xc0e   :  { %4184 = vmatprep.mubr.bf16.mxu0 %v4003_v12 }
 0xc15   :  { %4185 = vmatmul.mubr.bf16.gmra.mrb[148].mxu0 %v4002_v37 }
 0xc16   :  { %4192 = vmatprep.mubr.bf16.mxu0 %v4005_v8 }
 0xc1d   :  { %4193 = vmatmul.mubr.bf16.gmra.mrb[152].mxu0 %v4004_v6  ;;  %v6940_v6 = vld [vmem:[#allocation22 + $0x48] sm:$0xff]  }
 0xc1e   :  { %4200 = vmatprep.mubr.bf16.mxu0 %v4007_v3 }
 0xc25   :  { %4201 = vmatmul.mubr.bf16.gmra.mrb[156].mxu0 %v4006_v56 }
 0xc26   :  { %6648 = vmatprep.mubr.msk.bf16.mxu0 %vm9286_vm2, %v9321_v38 }
 0xcc0   :  { %v6199_v30 = vpop.f32.mrb[128].mxu0 }
 0xcc1   :  { %v6200_v49 = vpop.f32.mrb[129].mxu0 }
 0xcc2   :  { %v6201_v57 = vadd.f32 %v6200_v49, %v6199_v30  ;;  %v6202_v61 = vpop.f32.mrb[130].mxu0  ;;  %v6941_v49 = vld [vmem:[#allocation22 + $0x50] sm:$0xff]  }
 0xcc3   :  { %v6203_v43 = vpop.f32.mrb[131].mxu0 }
 0xcc4   :  { %v4147_v63 = vadd.f32 %v6201_v57, %v8976_v13  ;;  %v6204_v59 = vadd.f32 %v6203_v43, %v6202_v61 }
 0xcc6   :  { %v4150_v52 = vadd.f32 %v6204_v59, %v8976_v13  ;;  %v4209_v35 = vmax.f32 %v4147_v63, 0.0 }
 0xcc8   :  { %v4210_v0 = vmax.f32 %v4150_v52, 0.0  ;;  %v6205_v53 = vpop.f32.mrb[132].mxu0 }
 0xcc9   :  { %v6206_v31 = vpop.f32.mrb[133].mxu0 }
 0xcca   :  { %v6207_v10 = vadd.f32 %v6206_v31, %v6205_v53  ;;  %v6208_v12 = vpop.f32.mrb[134].mxu0  ;;  %v4242_v37 = vpack.c.bf16 %v4210_v0, %v4209_v35  ;;  %v6942_v35 = vld [vmem:[#allocation22 + $0x58] sm:$0xff]  }
 0xccb   :  { %v6209_v32 = vpop.f32.mrb[135].mxu0 }
 0xccc   :  { %v4155_v1 = vadd.f32 %v6207_v10, %v8976_v13  ;;  %v6210_v47 = vadd.f32 %v6209_v32, %v6208_v12  ;;  %6596 = vmatprep.mubr.bf16.mxu1 %v4242_v37  ;;  %v6943_v37 = vld [vmem:[#allocation22 + $0x60] sm:$0xff]  }
 0xcce   :  { %v4158_v50 = vadd.f32 %v6210_v47, %v8976_v13  ;;  %v4211_v9 = vmax.f32 %v4155_v1, 0.0 }
 0xcd0   :  { %v4212_v28 = vmax.f32 %v4158_v50, 0.0  ;;  %v6211_v62 = vpop.f32.mrb[136].mxu0 }
 0xcd1   :  { %v6212_v58 = vpop.f32.mrb[137].mxu0 }
 0xcd2   :  { %v4243_v42 = vpack.c.bf16 %v4212_v28, %v4211_v9  ;;  %v6213_v3 = vadd.f32 %v6212_v58, %v6211_v62  ;;  %v6214_v56 = vpop.f32.mrb[138].mxu0  ;;  %v6944_v62 = vld [vmem:[#allocation22 + $0x68] sm:$0xff]  }
 0xcd3   :  { %v6215_v11 = vpop.f32.mrb[139].mxu0 }
 0xcd4   :  { %6597 = vmatmul.mubr.bf16.vlgmr.msra.gmra.mrb[120].mxu1 %v4243_v42  ;;  %v4163_v4 = vadd.f32 %v6213_v3, %v8976_v13  ;;  %v6216_v8 = vadd.f32 %v6215_v11, %v6214_v56  ;;  %v6945_v11 = vld [vmem:[#allocation22 + $0x70] sm:$0xff]  }
 0xcd5   :  { %6613 = vmatpush3.bf16.msra.mxu1 %v6939_v40 }
 0xcd6   :  { %v4166_v45 = vadd.f32 %v6216_v8, %v8976_v13  ;;  %6614 = vmatprep.subr.bf16.mxu1 %v9321_v38  ;;  %v4213_v36 = vmax.f32 %v4163_v4, 0.0 }
 0xcd8   :  { %v4214_v2 = vmax.f32 %v4166_v45, 0.0  ;;  %v6217_v46 = vpop.f32.mrb[140].mxu0 }
 0xcd9   :  { %v6218_v30 = vpop.f32.mrb[141].mxu0  ;;  %6615 = vmatpush3.bf16.msra.mxu1 %v6940_v6 }
 0xcda   :  { %v6219_v57 = vadd.f32 %v6218_v30, %v6217_v46  ;;  %v6220_v61 = vpop.f32.mrb[142].mxu0  ;;  %v4244_v43 = vpack.c.bf16 %v4214_v2, %v4213_v36  ;;  %6616 = vmatprep.subr.bf16.mxu1 %v9321_v38  ;;  %v6946_v46 = vld [vmem:[#allocation22 + $0x78] sm:$0xff]  }
 0xcdb   :  { %v6221_v63 = vpop.f32.mrb[143].mxu0 }
 0xcdc   :  { %v4171_v59 = vadd.f32 %v6219_v57, %v8976_v13  ;;  %v6222_v52 = vadd.f32 %v6221_v63, %v6220_v61  ;;  %6600 = vmatprep.mubr.bf16.mxu1 %v4244_v43 }
 0xcdd   :  { %6617 = vmatpush3.bf16.msra.mxu1 %v6941_v49 }
 0xcde   :  { %v4174_v0 = vadd.f32 %v6222_v52, %v8976_v13  ;;  %6618 = vmatprep.subr.bf16.mxu1 %v9321_v38  ;;  %v4215_v53 = vmax.f32 %v4171_v59, 0.0 }
 0xce0   :  { %v4216_v31 = vmax.f32 %v4174_v0, 0.0  ;;  %v6223_v10 = vpop.f32.mrb[144].mxu0 }
 0xce1   :  { %v6224_v12 = vpop.f32.mrb[145].mxu0  ;;  %6619 = vmatpush3.bf16.msra.mxu1 %v6942_v35 }
 0xce2   :  { %v4245_v32 = vpack.c.bf16 %v4216_v31, %v4215_v53  ;;  %v6225_v1 = vadd.f32 %v6224_v12, %v6223_v10  ;;  %v6226_v47 = vpop.f32.mrb[146].mxu0  ;;  %6620 = vmatprep.subr.bf16.mxu1 %v9321_v38 }
 0xce3   :  { %v6227_v50 = vpop.f32.mrb[147].mxu0 }
 0xce4   :  { %6601 = vmatmul.mubr.bf16.gmra.mrb[124].mxu1 %v4245_v32  ;;  %v4179_v9 = vadd.f32 %v6225_v1, %v8976_v13  ;;  %v6228_v28 = vadd.f32 %v6227_v50, %v6226_v47 }
 0xce5   :  { %6621 = vmatpush3.bf16.msra.mxu1 %v6943_v37 }
 0xce6   :  { %v4182_v58 = vadd.f32 %v6228_v28, %v8976_v13  ;;  %6622 = vmatprep.subr.bf16.mxu1 %v9321_v38  ;;  %v4217_v40 = vmax.f32 %v4179_v9, 0.0 }
 0xce8   :  { %v4218_v42 = vmax.f32 %v4182_v58, 0.0  ;;  %v6229_v3 = vpop.f32.mrb[148].mxu0 }
 0xce9   :  { %v6230_v56 = vpop.f32.mrb[149].mxu0  ;;  %6623 = vmatpush3.bf16.msra.mxu1 %v6944_v62 }
 0xcea   :  { %v6231_v4 = vadd.f32 %v6230_v56, %v6229_v3  ;;  %v6232_v8 = vpop.f32.mrb[150].mxu0  ;;  %v4246_v6 = vpack.c.bf16 %v4218_v42, %v4217_v40  ;;  %6624 = vmatprep.subr.bf16.mxu1 %v9321_v38  ;;  %v6947_v56 = vld [vmem:[#allocation23 + $0x40] sm:$0xff]  }
 0xceb   :  { %v6233_v45 = vpop.f32.mrb[151].mxu0  ;;  %6633 = vmatpush3.bf16.msra.mxu0 %v6947_v56 }
 0xcec   :  { %v4187_v36 = vadd.f32 %v6231_v4, %v8976_v13  ;;  %v6234_v2 = vadd.f32 %v6233_v45, %v6232_v8  ;;  %6604 = vmatprep.mubr.bf16.mxu1 %v4246_v6  ;;  %6634 = vmatprep.subr.bf16.mxu0 %v9321_v38  ;;  %v6950_v4 = vld [vmem:[#allocation23 + $0x58] sm:$0xff]   ;;  %v6952_v8 = vld [vmem:[#allocation23 + $0x68] sm:$0xff]   ;;  %v6953_v6 = vld [vmem:[#allocation23 + $0x70] sm:$0xff]  }
 0xced   :  { %6625 = vmatpush3.bf16.msra.mxu1 %v6945_v11  ;;  %v6948_v11 = vld [vmem:[#allocation23 + $0x48] sm:$0xff]   ;;  %v6954_v45 = vld [vmem:[#allocation23 + $0x78] sm:$0xff]  }
 0xcee   :  { %v4190_v30 = vadd.f32 %v6234_v2, %v8976_v13  ;;  %6626 = vmatprep.subr.bf16.mxu1 %v9321_v38  ;;  %v4219_v49 = vmax.f32 %v4187_v36, 0.0  ;;  %v6955_v36 = vld [vmem:[#allocation7] sm:$0xff]   ;;  %v6956_v2 = vld [vmem:[#allocation7 + $0x8] sm:$0xff]  }
 0xcef   :  { %6635 = vmatpush3.bf16.msra.mxu0 %v6948_v11 }
 0xcf0   :  { %v4220_v57 = vmax.f32 %v4190_v30, 0.0  ;;  %v6235_v61 = vpop.f32.mrb[152].mxu0  ;;  %6636 = vmatprep.subr.bf16.mxu0 %v9321_v38  ;;  %v5898_v30 = vld [vmem:[%s9328_s10 + $0x1] ss:$0 sm:$0xff] }
 0xcf1   :  { %v6236_v43 = vpop.f32.mrb[153].mxu0  ;;  %6627 = vmatpush3.bf16.msra.mxu1 %v6946_v46  ;;  %v5675_v46 = vld [vmem:[#allocation17 + $0x1] ss:$0 sm:$0xff] }
 0xcf2   :  { %v4247_v63 = vpack.c.bf16 %v4220_v57, %v4219_v49  ;;  %v6237_v59 = vadd.f32 %v6236_v43, %v6235_v61  ;;  %v6238_v52 = vpop.f32.mrb[154].mxu0  ;;  %6652 = vmatprep.subr.bf16.mxu1 %v9321_v38  ;;  %v1102_v57 = vadd.f32 %v8081_v14, %v5675_v46 }
 0xcf3   :  { %v6239_v35 = vpop.f32.mrb[155].mxu0 }
 0xcf4   :  { %6605 = vmatmul.mubr.bf16.gmra.mrb[128].mxu1 %v4247_v63  ;;  %v4195_v0 = vadd.f32 %v6237_v59, %v8976_v13  ;;  %v6240_v53 = vadd.f32 %v6239_v35, %v6238_v52  ;;  %v1094_v63 = vadd.f32 %v5675_v46, %v8083_v16  ;;  %v1105_v35 = vadd.f32 %v8085_v17, %v5675_v46 }
 0xcf5   :  { %v1118_v16 = vadd.f32 %v8089_v19, %v5675_v46  ;;  %v1110_v17 = vadd.f32 %v5675_v46, %v8091_v20  ;;  %v1134_v20 = vadd.f32 %v8097_v23, %v5675_v46 }
 0xcf6   :  { %v4198_v31 = vadd.f32 %v6240_v53, %v8976_v13  ;;  %v4221_v10 = vmax.f32 %v4195_v0, 0.0 }
 0xcf8   :  { %v4222_v12 = vmax.f32 %v4198_v31, 0.0  ;;  %v6241_v37 = vpop.f32.mrb[156].mxu0 }
 0xcf9   :  { %v6242_v32 = vpop.f32.mrb[157].mxu0 }
 0xcfa   :  { %v6243_v1 = vadd.f32 %v6242_v32, %v6241_v37  ;;  %v6244_v47 = vpop.f32.mrb[158].mxu0  ;;  %v4248_v50 = vpack.c.bf16 %v4222_v12, %v4221_v10  ;;  %v1097_v10 = vadd.f32 %v5675_v46, %v8087_v18 }
 0xcfb   :  { %v6245_v9 = vpop.f32.mrb[159].mxu0 }
 0xcfc   :  { %v4203_v28 = vadd.f32 %v6243_v1, %v8976_v13  ;;  %v6246_v62 = vadd.f32 %v6245_v9, %v6244_v47  ;;  %6608 = vmatprep.mubr.bf16.mxu1 %v4248_v50 }
 0xcfe   :  { %v4206_v58 = vadd.f32 %v6246_v62, %v8976_v13  ;;  %v4223_v40 = vmax.f32 %v4203_v28, 0.0  ;;  %v6949_v13 = vld [vmem:[#allocation23 + $0x50] sm:$0xff]   ;;  %v1121_v62 = vadd.f32 %v8093_v21, %v5675_v46  ;;  %v1126_v21 = vadd.f32 %v5675_v46, %v8099_v24 }
 0xcff   :  { %6637 = vmatpush3.bf16.msra.mxu0 %v6949_v13 }
 0xd00   :  { %v4224_v42 = vmax.f32 %v4206_v58, 0.0  ;;  %6638 = vmatprep.subr.bf16.mxu0 %v9321_v38 }
 0xd02   :  { %v4249_v3 = vpack.c.bf16 %v4224_v42, %v4223_v40  ;;  %v1113_v42 = vadd.f32 %v5675_v46, %v8095_v22 }
 0xd03   :  { %6639 = vmatpush3.bf16.msra.mxu0 %v6950_v4 }
 0xd04   :  { %6609 = vmatmul.mubr.bf16.gmra.mrb[132].mxu1 %v4249_v3  ;;  %6640 = vmatprep.subr.bf16.mxu0 %v9321_v38 }
 0xd05   :  { %6628 = vmatprep.mubr.msk.bf16.mxu1 %vm9286_vm2, %v9321_v38 }
 0xd0c   :  { %6629 = vmatmul.mubr.bf16.vlgmr.msra.gmra.mrb[136].mxu1 %v8922_v27  ;;  %v6951_v27 = vld [vmem:[#allocation23 + $0x60] sm:$0xff]  }
 0xd0d   :  { %6668 = vmatprep.mubr.msk.bf16.mxu1 %vm9286_vm2, %v9321_v38  ;;  %6641 = vmatpush3.bf16.msra.mxu0 %v6951_v27  ;;  %vm9380_vm2 = vcmp.gt.f32.partialorder %v8259_v44, 0.5 }
 0xd0e   :  { %6642 = vmatprep.subr.bf16.mxu0 %v9321_v38  ;;  %6653 = vmatpush3.bf16.msra.mxu1 %v6955_v36 }
 0xd0f   :  { %6654 = vmatprep.subr.bf16.mxu1 %v9321_v38 }
 0xd11   :  { %6643 = vmatpush3.bf16.msra.mxu0 %v6952_v8 }
 0xd12   :  { %6644 = vmatprep.subr.bf16.mxu0 %v9321_v38  ;;  %6655 = vmatpush3.bf16.msra.mxu1 %v6956_v2 }
 0xd13   :  { %6656 = vmatprep.subr.bf16.mxu1 %v9321_v38 }
 0xd15   :  { %6645 = vmatpush3.bf16.msra.mxu0 %v6953_v6 }
 0xd16   :  { %6646 = vmatprep.subr.bf16.mxu0 %v9321_v38 }
 0xd19   :  { %6647 = vmatpush3.bf16.msra.mxu0 %v6954_v45  ;;  %v1137_v45 = vadd.f32 %v8101_v25, %v5675_v46  ;;  %v9372_v25 = vld [vmem:[#allocation64_spill] sm:$0xff] }
 0xda7   :  { %v6598_v49 = vpop.f32.mrb[120].mxu1 }
 0xda8   :  { %v4349_v61 = vadd.f32 %v6598_v49, %v5898_v30  ;;  %v4340_v43 = vpop.f32.mrb[121].mxu1  ;;  %v1129_v49 = vadd.f32 %v5675_v46, %v8103_v29 }
 0xda9   :  { %v4341_v59 = vadd.f32 %v5898_v30, %v4340_v43  ;;  %v6599_v52 = vpop.f32.mrb[122].mxu1 }
 0xdaa   :  { %v9020_v0 = vmul.f32 %v4349_v61, %v1102_v57  ;;  %v4352_v53 = vadd.f32 %v6599_v52, %v5898_v30  ;;  %v4343_v31 = vpop.f32.mrb[123].mxu1 }
 0xdab   :  { %v9023_v12 = vmul.f32 %v4341_v59, %v1094_v63  ;;  %v4344_v37 = vadd.f32 %v5898_v30, %v4343_v31  ;;  %v9371_v59 = vld [vmem:[#allocation63_spill] sm:$0xff] }
 0xdac   :  { %v9025_v32 = vmul.f32 %v4352_v53, %v1105_v35  ;;  %v1150_v24 = vadd.f32 %v9371_v59, %v5675_v46  ;;  %v1142_v53 = vadd.f32 %v5675_v46, %v9372_v25  ;;  %v6969_v59 = vld [vmem:[#allocation26 + $0x1c] ss:$12 sps:$4 sm:$0xff]   ;;  %v6977_v25 = vld [vmem:[#allocation26 + $0x4c] ss:$12 sps:$4 sm:$0xff]  }
 0xdad   :  { %v9027_v14 = vmul.f32 %v4344_v37, %v1097_v10  ;;  %v9373_v37 = vld [vmem:[#allocation65_spill] sm:$0xff] }
 0xdb7   :  { %v6602_v1 = vpop.f32.mrb[124].mxu1 }
 0xdb8   :  { %v4365_v47 = vadd.f32 %v6602_v1, %v5898_v30  ;;  %v4356_v50 = vpop.f32.mrb[125].mxu1  ;;  %v1153_v1 = vadd.f32 %v9373_v37, %v5675_v46  ;;  %v6985_v37 = vld [vmem:[#allocation26 + $0x7c] ss:$12 sps:$4 sm:$0xff]  }
 0xdb9   :  { %v4357_v9 = vadd.f32 %v5898_v30, %v4356_v50  ;;  %v6603_v28 = vpop.f32.mrb[126].mxu1  ;;  %v9374_v50 = vld [vmem:[#allocation66_spill] sm:$0xff] }
 0xdba   :  { %v9032_v58 = vmul.f32 %v4365_v47, %v1118_v16  ;;  %v4368_v18 = vadd.f32 %v6603_v28, %v5898_v30  ;;  %v4359_v40 = vpop.f32.mrb[127].mxu1 }
 0xdbb   :  { %v9035_v3 = vmul.f32 %v4357_v9, %v1110_v17  ;;  %v4360_v56 = vadd.f32 %v5898_v30, %v4359_v40  ;;  %v1145_v17 = vadd.f32 %v5675_v46, %v9374_v50  ;;  %v5908_v40 = vld [vmem:[%s9345_s27 + $0x1] ss:$0 sm:$0xff]  ;;  %v6957_v46 = vld [vmem:[#allocation7 + $0x10] sm:$0xff]  }
 0xdbc   :  { %v9037_v11 = vmul.f32 %v4368_v18, %v1121_v62  ;;  %6657 = vmatpush3.bf16.msra.mxu1 %v6957_v46  ;;  %v9382_v46 = vld [vmem:[#allocation72_spill] sm:$0xff] }
 0xdbd   :  { %v9039_v19 = vmul.f32 %v4360_v56, %v1113_v42  ;;  %6658 = vmatprep.subr.bf16.mxu1 %v9321_v38 }
 0xdc7   :  { %v6606_v13 = vpop.f32.mrb[128].mxu1 }
 0xdc8   :  { %v4381_v4 = vadd.f32 %v6606_v13, %v5898_v30  ;;  %v4372_v27 = vpop.f32.mrb[129].mxu1 }
 0xdc9   :  { %v4373_v8 = vadd.f32 %v5898_v30, %v4372_v27  ;;  %v6607_v6 = vpop.f32.mrb[130].mxu1 }
 0xdca   :  { %v9044_v36 = vmul.f32 %v4381_v4, %v1134_v20  ;;  %v4384_v22 = vadd.f32 %v6607_v6, %v5898_v30  ;;  %v4375_v2 = vpop.f32.mrb[131].mxu1 }
 0xdcb   :  { %v9047_v57 = vmul.f32 %v4373_v8, %v1126_v21  ;;  %v4376_v61 = vadd.f32 %v5898_v30, %v4375_v2  ;;  %v6961_v2 = vld [vmem:[#allocation7 + $0x30] sm:$0xff]  }
 0xdcc   :  { %v9049_v43 = vmul.f32 %v4384_v22, %v1137_v45  ;;  %v6959_v45 = vld [vmem:[#allocation7 + $0x20] sm:$0xff]   ;;  %v6960_v22 = vld [vmem:[#allocation7 + $0x28] sm:$0xff]  }
 0xdcd   :  { %v9051_v23 = vmul.f32 %v4376_v61, %v1129_v49  ;;  %v6962_v49 = vld [vmem:[#allocation7 + $0x38] sm:$0xff]   ;;  %v6963_v61 = vld [vmem:[#allocation26] ss:$12 sps:$4 sm:$0xff]  }
 0xdd7   :  { %v6610_v63 = vpop.f32.mrb[132].mxu1 }
 0xdd8   :  { %v4397_v52 = vadd.f32 %v6610_v63, %v5898_v30  ;;  %v4388_v35 = vpop.f32.mrb[133].mxu1  ;;  %v6965_v63 = vld [vmem:[#allocation26 + $0x4] ss:$12 sps:$4 sm:$0xff]  }
 0xdd9   :  { %v4389_v31 = vadd.f32 %v5898_v30, %v4388_v35  ;;  %v6611_v10 = vpop.f32.mrb[134].mxu1  ;;  %5212 = vmatprep.subr.bf16.mxu0 %v6965_v63  ;;  %v6971_v35 = vld [vmem:[#allocation26 + $0x30] ss:$12 sps:$4 sm:$0xff]  }
 0xdda   :  { %v9056_v29 = vmul.f32 %v4397_v52, %v1150_v24  ;;  %v4400_v16 = vadd.f32 %v6611_v10, %v5898_v30  ;;  %v4391_v47 = vpop.f32.mrb[135].mxu1  ;;  %v6967_v24 = vld [vmem:[#allocation26 + $0x18] ss:$12 sps:$4 sm:$0xff]   ;;  %v6973_v52 = vld [vmem:[#allocation26 + $0x34] ss:$12 sps:$4 sm:$0xff]  }
 0xddb   :  { %v9059_v9 = vmul.f32 %v4389_v31, %v1142_v53  ;;  %v4392_v28 = vadd.f32 %v5898_v30, %v4391_v47  ;;  %v6958_v30 = vld [vmem:[#allocation7 + $0x18] sm:$0xff]   ;;  %v6979_v10 = vld [vmem:[#allocation26 + $0x60] ss:$12 sps:$4 sm:$0xff]   ;;  %v6987_v47 = vld [vmem:[#allocation26 + $0x90] ss:$12 sps:$4 sm:$0xff]  }
 0xddc   :  { %v9061_v62 = vmul.f32 %v4400_v16, %v1153_v1  ;;  %6659 = vmatpush3.bf16.msra.mxu1 %v6958_v30  ;;  %v6975_v53 = vld [vmem:[#allocation26 + $0x48] ss:$12 sps:$4 sm:$0xff]   ;;  %v6981_v31 = vld [vmem:[#allocation26 + $0x64] ss:$12 sps:$4 sm:$0xff]  }
 0xddd   :  { %v9063_v18 = vmul.f32 %v4392_v28, %v1145_v17  ;;  %6660 = vmatprep.subr.bf16.mxu1 %v9321_v38  ;;  %v6983_v1 = vld [vmem:[#allocation26 + $0x78] ss:$12 sps:$4 sm:$0xff]   ;;  %v6989_v16 = vld [vmem:[#allocation26 + $0x94] ss:$12 sps:$4 sm:$0xff]   ;;  %v4421_v17 = vsel %vm533_vm5, %v9020_v0, -1e+30 }
 0xdde   :  { %vm9381_vm5 = vcmp.gt.f32.partialorder %v8250_v7, 0.5  ;;  %v9384_v30 = vld [vmem:[#allocation70_spill] sm:$0xff]  ;;  %v4430_v7 = vsel %vm9388_vm8, %v9049_v43, -1e+30  ;;  %vm9419_vm8 = vcmask 1047559  }
 0xddf   :  { %v4654_v42 = vpop.f32.mrb[136].mxu1  ;;  %v4432_v41 = vsel %vm544_vm1, %v9063_v18, -1e+30  ;;  %v4501_v60 = vrot.slane %v4430_v7, 4 }
 0xde0   :  { %v4655_v56 = vadd.f32 %v5908_v40, %v4654_v42  ;;  %v6630_v13 = vpop.f32.mrb[137].mxu1  ;;  %6661 = vmatpush3.bf16.msra.mxu1 %v6959_v45 }
 0xde1   :  { %v4657_v20 = vpop.f32.mrb[138].mxu1  ;;  %6662 = vmatprep.subr.bf16.mxu1 %v9321_v38  ;;  %v9378_v13 = vld [vmem:[#allocation71_spill] sm:$0xff] }
 0xde2   :  { %v4658_v4 = vadd.f32 %v5908_v40, %v4657_v20  ;;  %v6631_v27 = vpop.f32.mrb[139].mxu1  ;;  %v4661_v21 = vmax.f32 %v4655_v56, 0.0  ;;  %v4419_v40 = vsel %vm531_vm6, %v9023_v12, -1e+30  ;;  %v4422_v56 = vsel %vm534_vm7, %v9025_v32, -1e+30 }
 0xde3   :  { %vm9379_vm4 = vcmp.gt.f32.partialorder %v9378_v13, 0.5  ;;  %v4447_v27 = vrot.slane %v4421_v17, 4  ;;  %v4423_v12 = vsel %vm9381_vm5, %v9035_v3, -1e+30  ;;  %vm9383_vm6 = vcmp.gt.f32.partialorder %v9382_v46, 0.5 }
 0xde4   :  { %v4662_v8 = vmax.f32 %v4658_v4, 0.0  ;;  %6663 = vmatpush3.bf16.msra.mxu1 %v6960_v22  ;;  %v4420_v20 = vsel %vm9379_vm4, %v9027_v14, -1e+30  ;;  %v4425_v4 = vsel %vm9380_vm2, %v9032_v58, -1e+30  ;;  %vm9385_vm7 = vcmp.gt.f32.partialorder %v9384_v30, 0.5 }
 0xde5   :  { %6664 = vmatprep.subr.bf16.mxu1 %v9321_v38  ;;  %v4441_v0 = vrot.slane %v4420_v20, 4  ;;  %v4426_v32 = vsel %vm9383_vm6, %v9037_v11, -1e+30  ;;  %v4424_v14 = vsel %vm9385_vm7, %v9039_v19, -1e+30  ;;  %vm9386_vm2 = vcmp.gt.f32.partialorder %v8237_v55, 0.5 }
 0xde6   :  { %v4680_v6 = vpack.c.bf16 %v4662_v8, %v4661_v21  ;;  %v4435_v21 = vrot.slane %v4419_v40, 4  ;;  %v4453_v8 = vrot.slane %v4422_v56, 4  ;;  %v4429_v44 = vsel %vm9386_vm2, %v9044_v36, -1e+30 }
 0xde7   :  { %vm9387_vm4 = vcmp.gt.f32.partialorder %v8246_v26, 0.5  ;;  %vm9389_vm5 = vcmp.gt.f32.partialorder %v8227_v39, 0.5  ;;  %v4433_v11 = vsel %vm545_vm10, %v9056_v29, -1e+30  ;;  %v4431_v55 = vsel %vm543_vm0, %v9059_v9, -1e+30  ;;  %vm9420_vm10 = vmmov %vm9419_vm8 }
 0xde8   :  { %6649 = vmatmul.mubr.bf16.vlgmr.msra.gmra.mrb[160].mxu0 %v4680_v6  ;;  %6665 = vmatpush3.bf16.msra.mxu1 %v6961_v2  ;;  %v4471_v6 = vrot.slane %v4425_v4, 4  ;;  %v4427_v58 = vsel %vm9387_vm4, %v9047_v57, -1e+30  ;;  %v4428_v3 = vsel %vm9389_vm5, %v9051_v23, -1e+30  ;;  %v4459_v43 = vrot.slane %v4423_v12, 4 }
 0xde9   :  { %5244 = vmatprep.mubr.bf16.mxu0 %v9324_v5  ;;  %6666 = vmatprep.subr.bf16.mxu1 %v9321_v38  ;;  %v4434_v26 = vsel %vm546_vm3, %v9061_v62, -1e+30  ;;  %v4477_v45 = vrot.slane %v4426_v32, 4  ;;  %v4465_v39 = vrot.slane %v4424_v14, 4  ;;  %v4495_v23 = vrot.slane %v4429_v44, 4 }
 0xdea   :  { %5213 = vmatpush1.bf16.msra.mxu0 %v6963_v61  ;;  %v4448_v22 = vmax.f32 %v4421_v17, %v4447_v27  ;;  %v4483_v2 = vrot.slane %v4427_v58, 4  ;;  %v4489_v29 = vrot.slane %v4428_v3, 4  ;;  %v4507_v61 = vrot.slane %v4431_v55, 4 }
 0xdeb   :  { %5214 = vmatprep.subr.bf16.mxu0 %v6969_v59  ;;  %v4525_v63 = vrot.slane %v4434_v26, 4  ;;  %v4513_v9 = vrot.slane %v4432_v41, 4  ;;  %v4436_v59 = vmax.f32 %v4419_v40, %v4435_v21  ;;  %v4472_v62 = vmax.f32 %v4425_v4, %v4471_v6 }
 0xdec   :  { %6667 = vmatpush3.bf16.msra.mxu1 %v6962_v49  ;;  %v4519_v49 = vrot.slane %v4433_v11, 4  ;;  %v4496_v18 = vmax.f32 %v4429_v44, %v4495_v23 }
 0xded   :  { %6672 = vmatprep.subr.bf16.mxu1 %v9321_v38  ;;  %v4526_v50 = vmax.f32 %v4434_v26, %v4525_v63  ;;  %v4514_v17 = vmax.f32 %v4432_v41, %v4513_v9  ;;  %v4437_v28 = vrot.slane %v4436_v59, 2  ;;  %v4473_v27 = vrot.slane %v4472_v62, 2 }
 0xdee   :  { %5215 = vmatpush1.bf16.msra.mxu0 %v6967_v24  ;;  %v4454_v24 = vmax.f32 %v4422_v56, %v4453_v8  ;;  %v4497_v4 = vrot.slane %v4496_v18, 2 }
 0xdef   :  { %5216 = vmatprep.subr.bf16.mxu0 %v6973_v52  ;;  %v4442_v52 = vmax.f32 %v4420_v20, %v4441_v0  ;;  %v4515_v30 = vrot.slane %v4514_v17, 2 }
 0xdf0   :  { %v4455_v42 = vrot.slane %v4454_v24, 2 }
 0xdf1   :  { %v4443_v13 = vrot.slane %v4442_v52, 2  ;;  %v4516_v23 = vmax.f32 %v4514_v17, %v4515_v30 }
 0xdf2   :  { %5217 = vmatpush1.bf16.msra.mxu0 %v6971_v35  ;;  %v4460_v35 = vmax.f32 %v4423_v12, %v4459_v43  ;;  %v4456_v44 = vmax.f32 %v4454_v24, %v4455_v42 }
 0xdf3   :  { %5218 = vmatprep.subr.bf16.mxu0 %v6977_v25  ;;  %v4478_v25 = vmax.f32 %v4426_v32, %v4477_v45  ;;  %v4527_v32 = vrot.slane %v4526_v50, 2 }
 0xdf4   :  { %v4461_v40 = vrot.slane %v4460_v35, 2 }
 0xdf5   :  { %v4479_v56 = vrot.slane %v4478_v25, 2 }
 0xdf6   :  { %5219 = vmatpush1.bf16.msra.mxu0 %v6975_v53  ;;  %v4466_v53 = vmax.f32 %v4424_v14, %v4465_v39  ;;  %v4438_v14 = vmax.f32 %v4436_v59, %v4437_v28  ;;  %v4528_v39 = vmax.f32 %v4526_v50, %v4527_v32  ;;  %v9393_v28 = vld [vmem:[#allocation73_spill] sm:$0xff] }
 0xdf7   :  { %5220 = vmatprep.subr.bf16.mxu0 %v6981_v31  ;;  %v4449_v31 = vrot.slane %v4448_v22, 2  ;;  %v9394_v42 = vrot.slane %v9393_v28, 2  ;;  %v9397_v30 = vrot.slane %v9393_v28, 6 }
 0xdf8   :  { %v4467_v20 = vrot.slane %v4466_v53, 2 }
 0xdf9   :  { %v4450_v21 = vmax.f32 %v4448_v22, %v4449_v31  ;;  %v4439_v22 = vrot.slane %v4438_v14, 1 }
 0xdfa   :  { %5221 = vmatpush1.bf16.msra.mxu0 %v6979_v10  ;;  %v4484_v10 = vmax.f32 %v4427_v58, %v4483_v2  ;;  %v4444_v58 = vmax.f32 %v4442_v52, %v4443_v13  ;;  %v4468_v19 = vmax.f32 %v4466_v53, %v4467_v20  ;;  %v4457_v2 = vrot.slane %v4456_v44, 1 }
 0xdfb   :  { %5222 = vmatprep.subr.bf16.mxu0 %v6985_v37  ;;  %v4502_v37 = vmax.f32 %v4430_v7, %v4501_v60  ;;  %v4474_v7 = vmax.f32 %v4472_v62, %v4473_v27  ;;  %v4451_v36 = vrot.slane %v4450_v21, 1  ;;  %v4529_v53 = vrot.slane %v4528_v39, 1 }
 0xdfc   :  { %v4485_v8 = vrot.slane %v4484_v10, 2  ;;  %v4445_v60 = vrot.slane %v4444_v58, 1  ;;  %v4469_v63 = vrot.slane %v4468_v19, 1  ;;  %v4440_v31 = vmax.f32 %v4438_v14, %v4439_v22 }
 0xdfd   :  { %v4503_v0 = vrot.slane %v4502_v37, 2  ;;  %v4452_v59 = vmax.f32 %v4450_v21, %v4451_v36  ;;  %v4530_v21 = vmax.f32 %v4528_v39, %v4529_v53  ;;  %v9410_v53 = vld [vmem:[#allocation80_spill] sm:$0xff] }
 0xdfe   :  { %5223 = vmatpush1.bf16.msra.mxu0 %v6983_v1  ;;  %v4490_v1 = vmax.f32 %v4428_v3, %v4489_v29  ;;  %v4462_v3 = vmax.f32 %v4460_v35, %v4461_v40  ;;  %v4486_v26 = vmax.f32 %v4484_v10, %v4485_v8  ;;  %v4475_v29 = vrot.slane %v4474_v7, 1 }
 0xdff   :  { %5224 = vmatprep.subr.bf16.mxu0 %v6989_v16  ;;  %v4520_v16 = vmax.f32 %v4433_v11, %v4519_v49  ;;  %v4480_v11 = vmax.f32 %v4478_v25, %v4479_v56  ;;  %v4504_v57 = vmax.f32 %v4502_v37, %v4503_v0  ;;  %v4458_v10 = vmax.f32 %v4456_v44, %v4457_v2 }
 0xe00   :  { %v4491_v6 = vrot.slane %v4490_v1, 2  ;;  %v4463_v49 = vrot.slane %v4462_v3, 1  ;;  %v4487_v24 = vrot.slane %v4486_v26, 1  ;;  %v4446_v37 = vmax.f32 %v4444_v58, %v4445_v60 }
 0xe01   :  { %v4521_v12 = vrot.slane %v4520_v16, 2  ;;  %v4505_v52 = vrot.slane %v4504_v57, 1  ;;  %v4470_v50 = vmax.f32 %v4468_v19, %v4469_v63  ;;  %v4533_v13 = vmul.f32 %v4452_v59, %v9394_v42 }
 0xe02   :  { %5225 = vmatpush1.bf16.msra.mxu0 %v6987_v47  ;;  %v4508_v47 = vmax.f32 %v4431_v55, %v4507_v61  ;;  %v4498_v55 = vmax.f32 %v4496_v18, %v4497_v4  ;;  %v4492_v41 = vmax.f32 %v4490_v1, %v4491_v6  ;;  %v4481_v61 = vrot.slane %v4480_v11, 1 }
 0xe03   :  { %v4522_v43 = vmax.f32 %v4520_v16, %v4521_v12  ;;  %v4517_v18 = vrot.slane %v4516_v23, 1  ;;  %v4476_v1 = vmax.f32 %v4474_v7, %v4475_v29  ;;  %v4464_v16 = vmax.f32 %v4462_v3, %v4463_v49 }
 0xe04   :  { %v4509_v46 = vrot.slane %v4508_v47, 2  ;;  %v4499_v9 = vrot.slane %v4498_v55, 1  ;;  %v4493_v62 = vrot.slane %v4492_v41, 1  ;;  %v4488_v27 = vmax.f32 %v4486_v26, %v4487_v24 }
 0xe05   :  { %v4523_v35 = vrot.slane %v4522_v43, 1  ;;  %v4506_v40 = vmax.f32 %v4504_v57, %v4505_v52  ;;  %v4518_v8 = vmax.f32 %v4516_v23, %v4517_v18  ;;  %v4531_v0 = vmul.f32 %v4440_v31, %v9393_v28  ;;  %v9411_v31 = vld [vmem:[#allocation79_spill] sm:$0xff] }
 0xe06   :  { %v4510_v45 = vmax.f32 %v4508_v47, %v4509_v46  ;;  %v4482_v47 = vmax.f32 %v4480_v11, %v4481_v61  ;;  %v4500_v17 = vmax.f32 %v4498_v55, %v4499_v9  ;;  %v4494_v56 = vmax.f32 %v4492_v41, %v4493_v62  ;;  %v9401_v55 = vld [vmem:[#allocation77_spill] sm:$0xff]  ;;  %v5918_v9 = vld [vmem:[%s9346_s15 + $0x1] ss:$0 sm:$0xff] }
 0xe07   :  { %v4524_v20 = vmax.f32 %v4522_v43, %v4523_v35  ;;  %v9395_v6 = vrot.slane %v9393_v28, 3  ;;  %v9396_v46 = vrot.slane %v9393_v28, 1  ;;  %v4537_v14 = vmul.f32 %v4476_v1, %v9397_v30  ;;  %v9409_v35 = vld [vmem:[#allocation78_spill] sm:$0xff] }
 0xe08   :  { %v4511_v25 = vrot.slane %v4510_v45, 1  ;;  %v9398_v44 = vrot.slane %v9393_v28, 4  ;;  %v9399_v7 = vrot.slane %v9393_v28, 7  ;;  %v9400_v11 = vrot.slane %v9393_v28, 5 }
 0xe09   :  { %v4534_v12 = vmul.f32 %v4458_v10, %v9395_v6  ;;  %v4532_v32 = vmul.f32 %v4446_v37, %v9396_v46  ;;  %v9402_v36 = vrot.slane %v9401_v55, 2  ;;  %v4780_v57 = vadd.f32 %v4533_v13, %v8620_v15 }
 0xe0a   :  { %v4512_v4 = vmax.f32 %v4510_v45, %v4511_v25  ;;  %v4535_v58 = vmul.f32 %v4464_v16, %v9398_v44  ;;  %v4538_v3 = vmul.f32 %v4482_v47, %v9399_v7  ;;  %v4536_v19 = vmul.f32 %v4470_v50, %v9400_v11  ;;  %v9412_v16 = vld [vmem:[#allocation84_spill] sm:$0xff]  ;;  %v9413_v50 = vld [vmem:[#allocation82_spill] sm:$0xff] }
 0xe0b   :  { %v4541_v26 = vmul.f32 %v4500_v17, %v9402_v36  ;;  %v4539_v41 = vmul.f32 %v4488_v27, %v9401_v55  ;;  %v9403_v43 = vrot.slane %v9401_v55, 3  ;;  %v9404_v39 = vrot.slane %v9401_v55, 1 }
 0xe0c   :  { %v9405_v22 = vrot.slane %v9401_v55, 6  ;;  %v9406_v60 = vrot.slane %v9401_v55, 4  ;;  %v9407_v49 = vrot.slane %v9401_v55, 7  ;;  %v9408_v63 = vrot.slane %v9401_v55, 5 }
 0xe0d   :  { %v4542_v45 = vmul.f32 %v4506_v40, %v9403_v43  ;;  %v4540_v23 = vmul.f32 %v4494_v56, %v9404_v39  ;;  %v4778_v59 = vadd.f32 %v4531_v0, %v8600_v34  ;;  %v4781_v24 = vadd.f32 %v4534_v12, %v8626_v48  ;;  %v9414_v34 = vld [vmem:[#allocation81_spill] sm:$0xff]  ;;  %v9417_v40 = vld [vmem:[#allocation87_spill] sm:$0xff] }
 0xe0e   :  { %v4545_v2 = vmul.f32 %v4524_v20, %v9405_v22  ;;  %v4543_v29 = vmul.f32 %v4512_v4, %v9406_v60  ;;  %v4546_v61 = vmul.f32 %v4530_v21, %v9407_v49  ;;  %v4544_v15 = vmul.f32 %v4518_v8, %v9408_v63  ;;  %v9418_v20 = vld [vmem:[#allocation85_spill] sm:$0xff] }
 0xe0f   :  { %v4779_v52 = vadd.f32 %v4532_v32, %v8608_v33  ;;  %v4784_v62 = vadd.f32 %v4537_v14, %v8670_v51  ;;  %v4782_v25 = vadd.f32 %v4535_v58, %v9409_v35  ;;  %v4785_v18 = vadd.f32 %v4538_v3, %v9410_v53  ;;  %v9415_v33 = vld [vmem:[#allocation86_spill] sm:$0xff]  ;;  %v9416_v51 = vld [vmem:[#allocation83_spill] sm:$0xff] }
 0xe10   :  { %v4783_v10 = vadd.f32 %v4536_v19, %v9411_v31  ;;  %v4788_v37 = vadd.f32 %v4541_v26, %v8698_v54  ;;  %v4786_v47 = vadd.f32 %v4539_v41, %v9412_v16  ;;  %v4789_v17 = vadd.f32 %v4542_v45, %v9413_v50 }
 0xe11   :  { %v4787_v28 = vadd.f32 %v4540_v23, %v9414_v34  ;;  %v4792_v13 = vadd.f32 %v4545_v2, %v9415_v33  ;;  %v4790_v27 = vadd.f32 %v4543_v29, %v9416_v51  ;;  %v4793_v56 = vadd.f32 %v4546_v61, %v9417_v40 }
 0xe12   :  { %v4791_v4 = vadd.f32 %v4544_v15, %v9418_v20 }
 0xebb   :  { %v4771_v1 = vpop.f32.mrb[160].mxu0 }
 0xebc   :  { %v4772_v48 = vadd.f32 %v5918_v9, %v4771_v1  ;;  %v6650_v42 = vpop.f32.mrb[161].mxu0 }
 0xebd   :  { %v4774_v21 = vpop.f32.mrb[162].mxu0 }
 0xebe   :  { %v4775_v8 = vadd.f32 %v5918_v9, %v4774_v21  ;;  %v6651_v54 = vpop.f32.mrb[163].mxu0  ;;  %v4796_v0 = vrot.slane %v4772_v48, 1  ;;  %v4797_v6 = vrot.slane %v4772_v48, 2  ;;  %v4798_v12 = vrot.slane %v4772_v48, 3 }
 0xebf   :  { %v4799_v46 = vrot.slane %v4772_v48, 4  ;;  %v4800_v32 = vrot.slane %v4772_v48, 5  ;;  %v4801_v30 = vrot.slane %v4772_v48, 6  ;;  %v4802_v14 = vrot.slane %v4772_v48, 7 }
 0xec0   :  { %v4803_v44 = vrot.slane %v4775_v8, 1  ;;  %v4804_v58 = vrot.slane %v4775_v8, 2  ;;  %v4805_v7 = vrot.slane %v4775_v8, 3  ;;  %v4806_v3 = vrot.slane %v4775_v8, 4 }
 0xec1   :  { %v4807_v11 = vrot.slane %v4775_v8, 5  ;;  %v4808_v19 = vrot.slane %v4775_v8, 6  ;;  %v4809_v55 = vrot.slane %v4775_v8, 7  ;;  %v4826_v36 = vadd.f32 %v4778_v59, %v4772_v48 }
 0xec2   :  { %v4827_v26 = vadd.f32 %v4796_v0, %v4779_v52  ;;  %v4828_v41 = vadd.f32 %v4797_v6, %v4780_v57  ;;  %v4829_v43 = vadd.f32 %v4798_v12, %v4781_v24  ;;  %v4830_v45 = vadd.f32 %v4799_v46, %v4782_v25 }
 0xec3   :  { %v4831_v39 = vadd.f32 %v4800_v32, %v4783_v10  ;;  %v4832_v23 = vadd.f32 %v4801_v30, %v4784_v62  ;;  %v4833_v22 = vadd.f32 %v4802_v14, %v4785_v18  ;;  %v4834_v2 = vadd.f32 %v4786_v47, %v4775_v8 }
 0xec4   :  { %v4835_v60 = vadd.f32 %v4803_v44, %v4787_v28  ;;  %v4836_v29 = vadd.f32 %v4804_v58, %v4788_v37  ;;  %v4837_v49 = vadd.f32 %v4805_v7, %v4789_v17  ;;  %v4838_v61 = vadd.f32 %v4806_v3, %v4790_v27 }
 0xec5   :  { %v4839_v63 = vadd.f32 %v4807_v11, %v4791_v4  ;;  %v4840_v15 = vadd.f32 %v4808_v19, %v4792_v13  ;;  %v4841_v9 = vadd.f32 %v4809_v55, %v4793_v56  ;;  %v4859_v35 = vpack.c.bf16 %v4827_v26, %v4827_v26 }
 0xec6   :  { %v4860_v53 = vpack.c.bf16 %v4828_v41, %v4828_v41  ;;  %v4858_v31 = vpack.c.bf16 %v4826_v36, %v4826_v36  ;;  %v4861_v1 = vpack.c.bf16 %v4829_v43, %v4829_v43  ;;  %v4862_v59 = vpack.c.bf16 %v4830_v45, %v4830_v45 }
 0xec7   :  { %v4863_v52 = vpack.c.bf16 %v4831_v39, %v4831_v39  ;;  %v4867_v57 = vpack.c.bf16 %v4835_v60, %v4835_v60  ;;  %v4868_v24 = vpack.c.bf16 %v4836_v29, %v4836_v29  ;;  %v4864_v25 = vpack.c.bf16 %v4832_v23, %v4832_v23 }
 0xec8   :  { %v4865_v10 = vpack.c.bf16 %v4833_v22, %v4833_v22  ;;  %v4866_v62 = vpack.c.bf16 %v4834_v2, %v4834_v2  ;;  %v4869_v18 = vpack.c.bf16 %v4837_v49, %v4837_v49  ;;  %v4870_v16 = vpack.c.bf16 %v4838_v61, %v4838_v61 }
 0xec9   :  { %v4871_v47 = vpack.c.bf16 %v4839_v63, %v4839_v63  ;;  %v4898_v37 = vunpack.c.l.b16 %v4859_v35  ;;  %v4899_v50 = vunpack.c.l.b16 %v4860_v53  ;;  %v4872_v17 = vpack.c.bf16 %v4840_v15, %v4840_v15  ;;  %v6966_v15 = vld [vmem:[#allocation26 + $0x8] ss:$12 sps:$4 sm:$0xff]   ;;  %v6970_v35 = vld [vmem:[#allocation26 + $0x20] ss:$12 sps:$4 sm:$0xff]   ;;  %v6974_v53 = vld [vmem:[#allocation26 + $0x38] ss:$12 sps:$4 sm:$0xff]  }
 0xeca   :  { %v4873_v34 = vpack.c.bf16 %v4841_v9, %v4841_v9  ;;  %v4897_v28 = vunpack.c.l.b16 %v4858_v31  ;;  %v4900_v48 = vunpack.c.l.b16 %v4861_v1  ;;  %v4901_v42 = vunpack.c.l.b16 %v4862_v59  ;;  %v6978_v31 = vld [vmem:[#allocation26 + $0x50] ss:$12 sps:$4 sm:$0xff]   ;;  %v6982_v1 = vld [vmem:[#allocation26 + $0x68] ss:$12 sps:$4 sm:$0xff]   ;;  %v6986_v59 = vld [vmem:[#allocation26 + $0x80] ss:$12 sps:$4 sm:$0xff]  }
 0xecb   :  { %v4902_v33 = vunpack.c.l.b16 %v4863_v52  ;;  %v4906_v13 = vunpack.c.l.b16 %v4867_v57  ;;  %v4907_v51 = vunpack.c.l.b16 %v4868_v24  ;;  %v4903_v27 = vunpack.c.l.b16 %v4864_v25  ;;  %v6990_v52 = vld [vmem:[#allocation26 + $0x98] ss:$12 sps:$4 sm:$0xff]   ;;  %v6991_v57 = vld [vmem:[#allocation26 + $0xa8] ss:$12 sps:$4 sm:$0xff]   ;;  %v6994_v25 = vld [vmem:[#allocation26 + $0xb0] ss:$12 sps:$4 sm:$0xff]  }
 0xecc   :  { %v4904_v40 = vunpack.c.l.b16 %v4865_v10  ;;  %v4908_v56 = vunpack.c.l.b16 %v4869_v18  ;;  %v4913_v20 = vrot.slane %v4898_v37, 7  ;;  %v4905_v4 = vunpack.c.l.b16 %v4866_v62  ;;  %v6993_v24 = vld [vmem:[#allocation26 + $0xac] ss:$12 sps:$4 sm:$0xff]  }
 0xecd   :  { %v4909_v21 = vunpack.c.l.b16 %v4870_v16  ;;  %v4910_v8 = vunpack.c.l.b16 %v4871_v47  ;;  %v4915_v54 = vrot.slane %v4899_v50, 6  ;;  %v4911_v0 = vunpack.c.l.b16 %v4872_v17  ;;  %v6997_v10 = vld [vmem:[#allocation28 + $0x4] ss:$8 sps:$4 sm:$0xff]   ;;  %5226 = vmatprep.subr.bf16.mxu0 %v6993_v24 }
 0xece   :  { %v4914_v6 = vsel %vm2442_vm13, %v4913_v20, %v4897_v28  ;;  %v4917_v12 = vrot.slane %v4900_v48, 5  ;;  %v4927_v46 = vrot.slane %v4906_v13, 7  ;;  %v4912_v32 = vunpack.c.l.b16 %v4873_v34  ;;  %5227 = vmatpush1.bf16.msra.mxu0 %v6991_v57  ;;  %v5927_v62 = vld [vmem:[#allocation8] ss:$0 sm:$0xff]  ;;  %v6995_v34 = vld [vmem:[#allocation28] ss:$8 sps:$4 sm:$0xff]  }
 0xecf   :  { %v4916_v30 = vsel %vm2445_vm14, %v4915_v54, %v4914_v6  ;;  %v4919_v14 = vrot.slane %v4901_v42, 4  ;;  %v4929_v44 = vrot.slane %v4907_v51, 6  ;;  %v4921_v7 = vrot.slane %v4902_v33, 3  ;;  %5393 = vmatprep.subr.bf16.mxu0 %v6997_v10  ;;  %v7000_v48 = vld [vmem:[#allocation28 + $0x14] ss:$8 sps:$4 sm:$0xff]   ;;  %v9197_v6 = vld [vmem:[#allocation2 + $0x8] sm:$0xff] }
 0xed0   :  { %v4918_v58 = vsel %vm2448_vm15, %v4917_v12, %v4916_v30  ;;  %v4928_v3 = vsel %vm2442_vm13, %v4927_v46, %v4905_v4  ;;  %v4931_v11 = vrot.slane %v4908_v56, 5  ;;  %v4923_v55 = vrot.slane %v4903_v27, 2  ;;  %v6998_v42 = vld [vmem:[#allocation28 + $0x10] ss:$8 sps:$4 sm:$0xff]   ;;  %v7003_v33 = vld [vmem:[#allocation28 + $0x24] ss:$8 sps:$4 sm:$0xff]  }
 0xed1   :  { %v4920_v19 = vsel %vm2451_vm12, %v4919_v14, %v4918_v58  ;;  %v4930_v36 = vsel %vm2445_vm14, %v4929_v44, %v4928_v3  ;;  %v4933_v26 = vrot.slane %v4909_v21, 4  ;;  %v4925_v43 = vrot.slane %v4904_v40, 1  ;;  %v7001_v13 = vld [vmem:[#allocation28 + $0x20] ss:$8 sps:$4 sm:$0xff]   ;;  %v7006_v51 = vld [vmem:[#allocation28 + $0x34] ss:$8 sps:$4 sm:$0xff]  }
 0xed2   :  { %v4922_v41 = vsel %vm2454_vm9, %v4921_v7, %v4920_v19  ;;  %v4932_v45 = vsel %vm2448_vm15, %v4931_v11, %v4930_v36  ;;  %v4935_v39 = vrot.slane %v4910_v8, 3  ;;  %v4937_v2 = vrot.slane %v4911_v0, 2  ;;  %v7004_v27 = vld [vmem:[#allocation28 + $0x30] ss:$8 sps:$4 sm:$0xff]   ;;  %v7009_v40 = vld [vmem:[#allocation28 + $0x44] ss:$8 sps:$4 sm:$0xff]  }
 0xed3   :  { %v4924_v23 = vsel %vm2457_vm11, %v4923_v55, %v4922_v41  ;;  %v4934_v22 = vsel %vm2451_vm12, %v4933_v26, %v4932_v45  ;;  %v4939_v49 = vrot.slane %v4912_v32, 1  ;;  %vm9421_vm13 = vmmov 0   ;;  %v7007_v56 = vld [vmem:[#allocation28 + $0x40] ss:$8 sps:$4 sm:$0xff]   ;;  %v7012_v20 = vld [vmem:[#allocation28 + $0x54] ss:$8 sps:$4 sm:$0xff]  }
 0xed4   :  { %v4926_v60 = vsel %vm9419_vm8, %v4925_v43, %v4924_v23  ;;  %v4936_v29 = vsel %vm2454_vm9, %v4935_v39, %v4934_v22  ;;  %v7010_v4 = vld [vmem:[#allocation28 + $0x50] ss:$8 sps:$4 sm:$0xff]   ;;  %v7013_v21 = vld [vmem:[#allocation28 + $0x60] ss:$8 sps:$4 sm:$0xff]   ;;  %v7018_v8 = vld [vmem:[#allocation28 + $0x74] ss:$8 sps:$4 sm:$0xff]  }
 0xed5   :  { %v4938_v61 = vsel %vm2457_vm11, %v4937_v2, %v4936_v29  ;;  %v7016_v54 = vld [vmem:[#allocation28 + $0x70] ss:$8 sps:$4 sm:$0xff]   ;;  %v7019_v46 = vld [vmem:[#allocation29] sm:$0xff]   ;;  %v7020_v32 = vld [vmem:[#allocation29 + $0x8] sm:$0xff]  }
 0xed6   :  { %v4940_v63 = vsel %vm9420_vm10, %v4939_v49, %v4938_v61  ;;  %v9195_v0 = vld [vmem:[#allocation2] sm:$0xff]  ;;  %v7021_v30 = vld [vmem:[#allocation29 + $0x10] sm:$0xff]   ;;  %v7024_v58 = vld [vmem:[#allocation29 + $0x28] sm:$0xff]  }
 0xed7   :  { %v4941_v9 = vpack.c.b16 %v4940_v63, %v4926_v60  ;;  %v5312_v12 = vpack.c.bf16 %v9197_v6, %v9195_v0  ;;  %v7022_v14 = vld [vmem:[#allocation29 + $0x18] sm:$0xff]   ;;  %v7023_v44 = vld [vmem:[#allocation29 + $0x20] sm:$0xff]   ;;  %v7025_v7 = vld [vmem:[#allocation29 + $0x30] sm:$0xff]  }
 0xed8   :  { %v7026_v3 = vld [vmem:[#allocation29 + $0x38] sm:$0xff]   ;;  %v5067_v11 = vld [vmem:[%s7822_s17] sm:$0x7]  ;;  %v9422_v19 = vld [vmem:[#allocation62_spill] sm:$0xff]  ;;  %s7648_s17 = smov [#allocation31]  }
 0xed9   :  { %6669 = vmatmul.mubr.bf16.vlgmr.msra.gmra.mrb[140].mxu1 %v4941_v9  ;;  %v5076_v55 = vrot.slane %v5067_v11, %v9422_v19  ;;  %s5591_s29 = sshll.u32 %s7648_s17, 4  ;;  %s5592_s29 = int_to_ptr.vmem [resolvable:$true] %s5591_s29 }
 0xeda   :  { %6673 = vmatpush3.bf16.msra.mxu1 %v6966_v15  ;;  %6688 = vmatprep.mubr.msk.bf16.mxu1 %vm9421_vm13, %v9321_v38  ;;  %s7541_s18 = scalar_lea.vmem %s5592_s29, 256  ;;  %p7546_p5 = scmp.lt.s32.totalorder %s5592_s29, %s5592_s29 }
 0xedb   :  { %6674 = vmatprep.subr.bf16.mxu1 %v9321_v38  ;;  %p7542_p4 = scmp.ne.s32.totalorder %s5592_s29, %s7541_s18  ;;  %p7547_p6 = scmp.lt.s32.totalorder %s7541_s18, %s7541_s18 }
 0xedd   :  { %p7548_p7 = por %p7547_p6, %p7546_p5 }
 0xede   :  { %6675 = vmatpush3.bf16.msra.mxu1 %v6970_v35  ;;  %v9423_v35 = vld [vmem:[#allocation61_spill] sm:$0xff] }
 0xedf   :  { %6676 = vmatprep.subr.bf16.mxu1 %v9321_v38  ;;  %p7549_p8 = pnand %p7548_p7, %p7542_p4 }
 0xee2   :  { %6677 = vmatpush3.bf16.msra.mxu1 %v6974_v53  ;;  %v5072_v53 = vrot.slane %v5067_v11, %v9423_v35 }
 0xee3   :  { %6678 = vmatprep.subr.bf16.mxu1 %v9321_v38 }
 0xee6   :  { %6679 = vmatpush3.bf16.msra.mxu1 %v6978_v31 }
 0xee7   :  { %6680 = vmatprep.subr.bf16.mxu1 %v9321_v38 }
 0xeea   :  { %6681 = vmatpush3.bf16.msra.mxu1 %v6982_v1 }
 0xeeb   :  { %6682 = vmatprep.subr.bf16.mxu1 %v9321_v38 }
 0xeee   :  { %6683 = vmatpush3.bf16.msra.mxu1 %v6986_v59 }
 0xeef   :  { %6684 = vmatprep.subr.bf16.mxu1 %v9321_v38 }
 0xef2   :  { %6685 = vmatpush3.bf16.msra.mxu1 %v6990_v52 }
 0xef3   :  { %6686 = vmatprep.subr.bf16.mxu1 %v9321_v38 }
 0xef6   :  { %6687 = vmatpush3.bf16.msra.mxu1 %v6994_v25 }
 0xef7   :  { %6692 = vmatprep.subr.bf16.mxu1 %v9321_v38 }
 0xfac   :  { %v5025_v18 = vpop.f32.mrb[140].mxu1 }
 0xfad   :  { %v6670_v16 = vpop.f32.mrb[141].mxu1  ;;  %v5026_v37 = vadd.f32 %v5927_v62, %v5025_v18 }
 0xfae   :  { %v5028_v47 = vpop.f32.mrb[142].mxu1 }
 0xfaf   :  { %v5029_v50 = vadd.f32 %v5927_v62, %v5028_v47  ;;  %v6671_v17 = vpop.f32.mrb[143].mxu1  ;;  %v9424_v62 = vld [vmem:[#allocation60_spill] sm:$0xff] }
 0xfb0   :  { %v9425_v18 = vsub.s32 2, %v9424_v62 }
 0xfb1   :  { %v5066_v28 = vpack.c.bf16 %v5029_v50, %v5026_v37 }
 0xfb2   :  { %v5080_v16 = vrot.slane %v5067_v11, %v9425_v18 }
 0xfb3   :  { %5245 = vmatmul.mubr.bf16.vlgmr.msra.gmra.mrb[164].mxu0 %v5066_v28  ;;  %6689 = vmatmul.mubr.bf16.vlgmr.msra.gmra.mrb[144].mxu1 %v5066_v28 }
 0xfb4   :  { %5394 = vmatpush1.bf16.msra.mxu0 %v6995_v34  ;;  %5425 = vmatprep.mubr.bf16.mxu0 %v9324_v5  ;;  %v7015_v5 = vld [vmem:[#allocation28 + $0x64] ss:$8 sps:$4 sm:$0xff]  }
 0xfb5   :  { %5395 = vmatprep.subr.bf16.mxu0 %v7000_v48  ;;  %6708 = vmatprep.mubr.msk.bf16.mxu1 %vm9421_vm13, %v9321_v38 }
 0xfb6   :  { %6693 = vmatpush3.bf16.msra.mxu1 %v7019_v46 }
 0xfb7   :  { %6694 = vmatprep.subr.bf16.mxu1 %v9321_v38 }
 0xfb8   :  { %5396 = vmatpush1.bf16.msra.mxu0 %v6998_v42 }
 0xfb9   :  { %5397 = vmatprep.subr.bf16.mxu0 %v7003_v33 }
 0xfba   :  { %6695 = vmatpush3.bf16.msra.mxu1 %v7020_v32 }
 0xfbb   :  { %6696 = vmatprep.subr.bf16.mxu1 %v9321_v38 }
 0xfbc   :  { %5398 = vmatpush1.bf16.msra.mxu0 %v7001_v13 }
 0xfbd   :  { %5399 = vmatprep.subr.bf16.mxu0 %v7006_v51 }
 0xfbe   :  { %6697 = vmatpush3.bf16.msra.mxu1 %v7021_v30 }
 0xfbf   :  { %6698 = vmatprep.subr.bf16.mxu1 %v9321_v38 }
 0xfc0   :  { %5400 = vmatpush1.bf16.msra.mxu0 %v7004_v27 }
 0xfc1   :  { %5401 = vmatprep.subr.bf16.mxu0 %v7009_v40 }
 0xfc2   :  { %6699 = vmatpush3.bf16.msra.mxu1 %v7022_v14 }
 0xfc3   :  { %6700 = vmatprep.subr.bf16.mxu1 %v9321_v38 }
 0xfc4   :  { %5402 = vmatpush1.bf16.msra.mxu0 %v7007_v56 }
 0xfc5   :  { %5403 = vmatprep.subr.bf16.mxu0 %v7012_v20 }
 0xfc6   :  { %6701 = vmatpush3.bf16.msra.mxu1 %v7023_v44 }
 0xfc7   :  { %6702 = vmatprep.subr.bf16.mxu1 %v9321_v38 }
 0xfc8   :  { %5404 = vmatpush1.bf16.msra.mxu0 %v7010_v4 }
 0xfc9   :  { %5405 = vmatprep.subr.bf16.mxu0 %v7015_v5 }
 0xfca   :  { %6703 = vmatpush3.bf16.msra.mxu1 %v7024_v58 }
 0xfcb   :  { %6704 = vmatprep.subr.bf16.mxu1 %v9321_v38 }
 0xfcc   :  { %5406 = vmatpush1.bf16.msra.mxu0 %v7013_v21 }
 0xfcd   :  { %5407 = vmatprep.subr.bf16.mxu0 %v7018_v8 }
 0xfce   :  { %6705 = vmatpush3.bf16.msra.mxu1 %v7025_v7 }
 0xfcf   :  { %6706 = vmatprep.subr.bf16.mxu1 %v9321_v38 }
 0xfd0   :  { %5408 = vmatpush1.bf16.msra.mxu0 %v7016_v54 }
 0xfd2   :  { %6707 = vmatpush3.bf16.msra.mxu1 %v7026_v3 }
 0xfd3   :  { %5426 = vmatmul.mubr.bf16.vlgmr.msra.gmra.mrb[164].mxu0 %v5312_v12 }
0x10a6   :  { %v5427_v36 = vpop.f32.mrb[164].mxu0 }
0x10a7   :  { %v5429_v26 = vpop.f32.mrb[165].mxu0  ;;  %v6712_v31 = vadd.f32 %v5427_v36, %v5072_v53 }
0x10a8   :  { %v6713_v41 = vadd.f32 %v5429_v26, %v5076_v55  ;;  %v5431_v43 = vpop.f32.mrb[166].mxu0 }
0x10a9   :  { %v5433_v45 = vpop.f32.mrb[167].mxu0  ;;  %v6714_v1 = vadd.f32 %v5431_v43, %v5072_v53  ;;  %v5976_v59 = vmul.f32 -1.442695, %v6712_v31 }
0x10aa   :  { %v5978_v39 = vmul.f32 -1.442695, %v6713_v41  ;;  %v6715_v23 = vadd.f32 %v5433_v45, %v5076_v55 }
0x10ab   :  { %v5977_v52 = vmul.f32 -1.442695, %v6714_v1 }
0x10ac   :  { %7099 = vpow2.f32 %v5978_v39  ;;  %v5979_v22 = vmul.f32 -1.442695, %v6715_v23 }
0x10ae   :  { %7101 = vpow2.f32 %v5979_v22 }
0x10b6   :  { %v7100_v2 = vpop.eup %7099 }
0x10b7   :  { %v5458_v60 = vadd.f32 1.0, %v7100_v2 }
0x10b8   :  { %v7102_v29 = vpop.eup %7101 }
0x10b9   :  { %7103 = vrcp.f32 %v5458_v60  ;;  %v5459_v49 = vadd.f32 1.0, %v7102_v29 }
0x10bb   :  { %7105 = vrcp.f32 %v5459_v49 }
0x10bc   :  { %7107 = vpow2.f32 %v5976_v59 }
0x10bd   :  { %7109 = vpow2.f32 %v5977_v52 }
0x10c3   :  { %v7104_v38 = vpop.eup %7103 }
0x10c4   :  { %v5464_v63 = vmul.f32 %v7104_v38, %v9195_v0 }
0x10c5   :  { %v7106_v61 = vpop.eup %7105 }
0x10c6   :  { %v5465_v15 = vmul.f32 %v7106_v61, %v9197_v6  ;;  %v7108_v57 = vpop.eup %7107 }
0x10c7   :  { %v7110_v24 = vpop.eup %7109  ;;  %v5444_v25 = vadd.f32 1.0, %v7108_v57 }
0x10c8   :  { %v5482_v9 = vpack.c.bf16 %v5465_v15, %v5464_v63  ;;  %v5445_v10 = vadd.f32 1.0, %v7110_v24 }
0x10c9   :  { %7111 = vrcp.f32 %v5444_v25 }
0x10ca   :  { %6709 = vmatmul.mubr.bf16.vlgmr.msra.gmra.mrb[144].mxu1 %v5482_v9  ;;  %7113 = vrcp.f32 %v5445_v10 }
0x10d3   :  { %v7112_v47 = vpop.eup %7111 }
0x10d4   :  { %v7114_v34 = vpop.eup %7113  ;;  %v5578_v42 = vsub.f32 1.0, %v7112_v47  ;;  %v5576_v51 = vmul.f32 %v7112_v47, %v9195_v0 }
0x10d5   :  { %v5579_v56 = vsub.f32 1.0, %v7114_v34  ;;  %v5577_v4 = vmul.f32 %v7114_v34, %v9197_v6 }
0x119d   :  { %v5565_v37 = vpop.f32.mrb[144].mxu1 }
0x119e   :  { %v6716_v50 = vadd.f32 %v5565_v37, %v5080_v16  ;;  %v6710_v17 = vpop.f32.mrb[145].mxu1 }
0x119f   :  { %v5568_v28 = vpop.f32.mrb[146].mxu1 }
0x11a0   :  { %v5574_v48 = vmax.f32 %v6716_v50, 0.0  ;;  %v6717_v33 = vadd.f32 %v5568_v28, %v5080_v16  ;;  %v6711_v13 = vpop.f32.mrb[147].mxu1 }
0x11a2   :  { %v5580_v27 = vmul.f32 %v5578_v42, %v5574_v48  ;;  %v5575_v40 = vmax.f32 %v6717_v33, 0.0 }
0x11a4   :  { %v5582_v20 = vadd.f32 %v5580_v27, %v5576_v51  ;;  %v5581_v5 = vmul.f32 %v5579_v56, %v5575_v40 }
0x11a6   :  { %5584 = vst [vmem:[#allocation31] sm:$0xff] %v5582_v20  ;;  %v5583_v21 = vadd.f32 %v5581_v5, %v5577_v4 }
0x11a8   :  { %5585 = vst [vmem:[#allocation31 + $0x8] sm:$0xff] %v5583_v21 }
0x11a9   :  { %7552 = shalt.err (!%p7549_p8)
}
0x11aa   :  { %s7553_s24 = scalar_lea.hbm %s7827_s25, 256 }
0x11ab   :  { %p7554_p9 = scmp.ne.s32.totalorder %s7827_s25, %s7553_s24  ;;  %p7557_p10 = scmp.lt.u32.totalorder %s7553_s24, %s7827_s25 }
0x11ad   :  { %p7559_p11 = pnand %p7557_p10, %p7554_p9 }
0x11af   :  { %7562 = shalt.err (!%p7559_p11)
}
0x11b0   :  { %5597 = dma.vmem_to_hbm [thread:$0]  %s5592_s29, 256, %s7827_s25, [#allocation4], %s7634_s2, %s7634_s2, %s7635_s8  }
0x11b1   :  { %7583 = dma.done.wait [#allocation4], 256  }
0x11b2   :  { %7584 = vsyncadd [#allocation4], 4294967040 }
0x11b3   :  { %5601 = vsyncpa [#allocation3], 1 }
0x11b4   :  { %5602 = vsyncpa [#allocation6], 1 }
0x11b5   :  { %5603 = vsyncpa [#allocation9], 1 }
0x11b6   :  { %5604 = vsyncpa [#allocation12], 1 }
0x11b7   :  { %5605 = vsyncpa [#allocation15], 1 }
0x11b8   :  { %5606 = vsyncpa [#allocation18], 1 }
0x11b9   :  { %5607 = vsyncpa [#allocation21], 1 }
0x11ba   :  { %5608 = vsyncpa [#allocation24], 1 }
0x11bb   :  { %5609 = vsyncpa [#allocation27], 1 }
0x11bc   :  { %5610 = vsyncpa [#allocation30], 1 }
0x11bd   :  { %5611 = vsyncpa [#allocation4], 1 }

</bundles_post_ra>
